<compile_context>
chip_gen: v5e
topology: v5e:2x2
jax: 0.10.0
libtpu: 0.0.40
codegen_flags: <defaults>
</compile_context>

<pallas_src>
import jax
import jax.numpy as jnp
from jax.experimental import pallas as pl
from jax.experimental.pallas import tpu as pltpu


INPUT_DIM = 784
HIDDEN_DIM = 500
LATENT_DIM = 50

# lane-dense padded dims (multiples of 128) for the *internal* feature axes
HID_PAD = 512          # 500 -> 512
LAT_PAD = 128          # 50  -> 128; mu||logvar fused projection is 256 wide


def _round_up(n, m):
    return (n + m - 1) // m * m


def _softplus(x):
    # numerically stable softplus (matches F.softplus semantics)
    return jnp.maximum(x, 0.0) + jnp.log1p(jnp.exp(-jnp.abs(x)))


# ---------------------------------------------------------------------------
# kernel
# ---------------------------------------------------------------------------
def vae_kernel(
    x_ref, eps_ref,
    w1_ref, b1_ref,
    wml_ref, bml_ref,        # fused [HID_PAD, 2*LAT_PAD] mu||logvar projection
    w2_ref, b2_ref,
    w3_ref, b3_ref,
    recon_ref, mu_ref, logvar_ref,
):
    bf16 = jnp.bfloat16

    x = x_ref[...]                                                # [TB, 784] bf16

    # ---- encode: fc1 + softplus (bf16 MXU, f32 accumulate, f32 elementwise) ----
    h1 = _softplus(
        jnp.dot(x, w1_ref[...], preferred_element_type=jnp.float32)
        + b1_ref[...]
    )                                                             # [TB, 512] f32

    # ---- fused mu || logvar projection: one lane-dense 256-wide matmul ----
    # (padded h1 cols 500..511 are softplus(0)=log 2, but the matching wml rows
    #  are zero, so they contribute nothing.)
    mulv = (
        jnp.dot(h1.astype(bf16), wml_ref[...], preferred_element_type=jnp.float32)
        + bml_ref[...]
    )                                                             # [TB, 256]
    mu = mulv[:, :LAT_PAD]                                        # [TB, 128]
    logvar = mulv[:, LAT_PAD:]                                    # [TB, 128]

    # ---- reparameterize ----
    # Padded logvar lanes are 0 -> std = 1 there; correctness of the decode does
    # NOT rely on padded z lanes being zero because the matching w2 rows are
    # zero-padded (eps is zero-padded anyway, keeping padded z lanes at 0).
    std = jnp.exp(0.5 * logvar)
    z = mu + eps_ref[...] * std                                   # [TB, 128] f32

    # ---- decode ----
    h2 = _softplus(
        jnp.dot(z.astype(bf16), w2_ref[...], preferred_element_type=jnp.float32)
        + b2_ref[...]
    )                                                             # [TB, 512]
    logits = (
        jnp.dot(h2.astype(bf16), w3_ref[...], preferred_element_type=jnp.float32)
        + b3_ref[...]
    )                                                             # [TB, 784]

    # exact sigmoid via a single EUP tanh: sigmoid(x) = 0.5*(tanh(x/2)+1)
    recon = 0.5 * (jnp.tanh(0.5 * logits) + 1.0)
    recon_ref[...] = recon.astype(recon_ref.dtype)                # bf16 store
    mu_ref[...] = mu
    logvar_ref[...] = logvar


# ---------------------------------------------------------------------------
# parameter handling
# ---------------------------------------------------------------------------
def init_params(key):
    """Deterministic logical parameters (shapes match the nn.Linear layers,
    stored as [in, out] so the kernel computes x @ W + b)."""
    ks = jax.random.split(key, 10)

    def linear(kw, kb, fan_in, fan_out):
        bound = 1.0 / jnp.sqrt(fan_in)
        w = jax.random.uniform(kw, (fan_in, fan_out), jnp.float32, -bound, bound)
        b = jax.random.uniform(kb, (1, fan_out), jnp.float32, -bound, bound)
        return w, b

    w1, b1 = linear(ks[0], ks[1], INPUT_DIM, HIDDEN_DIM)
    wmu, bmu = linear(ks[2], ks[3], HIDDEN_DIM, LATENT_DIM)
    wlv, blv = linear(ks[4], ks[5], HIDDEN_DIM, LATENT_DIM)
    w2, b2 = linear(ks[6], ks[7], LATENT_DIM, HIDDEN_DIM)
    w3, b3 = linear(ks[8], ks[9], HIDDEN_DIM, INPUT_DIM)
    return dict(
        w1=w1, b1=b1, wmu=wmu, bmu=bmu, wlv=wlv, blv=blv,
        w2=w2, b2=b2, w3=w3, b3=b3,
    )


def prepare_params(p):
    """Zero-pad internal feature dims to lane-aligned sizes, fuse mu/logvar
    weights, cast weights to bf16.  Biases stay f32 (tiny; added to the f32
    accumulator).  The 784 input/output axis is left unpadded."""
    def pad2(a, rows, cols):
        return jnp.pad(a, ((0, rows - a.shape[0]), (0, cols - a.shape[1])))

    w1 = pad2(p["w1"], INPUT_DIM, HID_PAD).astype(jnp.bfloat16)   # [784, 512]
    b1 = pad2(p["b1"], 1, HID_PAD)                                # [1, 512]

    wml = jnp.concatenate(
        [pad2(p["wmu"], HID_PAD, LAT_PAD), pad2(p["wlv"], HID_PAD, LAT_PAD)], axis=1
    ).astype(jnp.bfloat16)                                        # [512, 256]
    bml = jnp.concatenate(
        [pad2(p["bmu"], 1, LAT_PAD), pad2(p["blv"], 1, LAT_PAD)], axis=1
    )                                                             # [1, 256]

    w2 = pad2(p["w2"], LAT_PAD, HID_PAD).astype(jnp.bfloat16)     # [128, 512]
    b2 = pad2(p["b2"], 1, HID_PAD)                                # [1, 512]
    w3 = pad2(p["w3"], HID_PAD, INPUT_DIM).astype(jnp.bfloat16)   # [512, 784]
    b3 = p["b3"]                                                  # [1, 784]
    return (w1, b1, wml, bml, w2, b2, w3, b3)


# ---------------------------------------------------------------------------
# forward wrapper
# ---------------------------------------------------------------------------
def vae_forward(x_img, eps, padded_params, *, batch_tile=512):
    """x_img: [B, ...] f32 with prod(...) == 784; eps: [B, LATENT_DIM] f32."""
    B = x_img.shape[0]
    # x.view(-1, 784); cast to bf16 once here (the kernel consumes bf16), which
    # halves the largest input stream's HBM traffic.
    x = x_img.reshape(B, INPUT_DIM).astype(jnp.bfloat16)

    B_pad = _round_up(max(B, 8), 8)          # sublane alignment only
    if B_pad != B:
        x = jnp.pad(x, ((0, B_pad - B), (0, 0)))
    # eps is tiny (B x 50); zero-pad its lanes to 128 so z stays lane-dense.
    eps_p = jnp.zeros((B_pad, LAT_PAD), jnp.float32).at[:B, :LATENT_DIM].set(eps)

    # Batch tile: as large as batch_tile, but capped at ceil(B_pad/2) so the
    # grid has >= 2 steps whenever possible (lets "parallel" use both v7x TCs).
    half = _round_up(max((B_pad + 1) // 2, 8), 8)
    tb = max(8, min(batch_tile, half))
    grid = (pl.cdiv(B_pad, tb),)             # partial last tile handled by masking

    w1, b1, wml, bml, w2, b2, w3, b3 = padded_params

    def act_spec(feat):
        # activations: tiled over batch, pipelined
        return pl.BlockSpec((tb, feat), lambda i: (i, 0))

    def resident(arr):
        # weights/biases: constant block index -> DMA'd once, stays in VMEM
        return pl.BlockSpec(arr.shape, lambda i: (0, 0))

    recon_p, mu_p, logvar_p = pl.pallas_call(
        vae_kernel,
        out_shape=(
            jax.ShapeDtypeStruct((B_pad, INPUT_DIM), jnp.bfloat16),  # recon (largest stream) in bf16
            jax.ShapeDtypeStruct((B_pad, LAT_PAD), jnp.float32),
            jax.ShapeDtypeStruct((B_pad, LAT_PAD), jnp.float32),
        ),
        grid=grid,
        in_specs=[
            act_spec(INPUT_DIM), act_spec(LAT_PAD),
            resident(w1), resident(b1),
            resident(wml), resident(bml),
            resident(w2), resident(b2),
            resident(w3), resident(b3),
        ],
        out_specs=(act_spec(INPUT_DIM), act_spec(LAT_PAD), act_spec(LAT_PAD)),
        compiler_params=pltpu.CompilerParams(
            dimension_semantics=("parallel",),   # shards batch tiles across v7x TCs
            vmem_limit_bytes=48 << 20,           # ~15 MiB working set at tb=512
        ),
    )(x, eps_p, w1, b1, wml, bml, w2, b2, w3, b3)

    # strip padding; cast recon back to f32 for drop-in parity with the torch
    # module (consumers that accept bf16 should use recon_p[:B] directly).
    recon = recon_p[:B].astype(jnp.float32)
    mu = mu_p[:B, :LATENT_DIM]
    logvar = logvar_p[:B, :LATENT_DIM]
    return recon, mu, logvar


# ---------------------------------------------------------------------------
# pure-JAX reference (same bf16 matmul operands, f32 accumulation)
# ---------------------------------------------------------------------------
def vae_reference(x_img, eps, p):
    bf16 = jnp.bfloat16

    def mm(a, w):
        return jnp.dot(a.astype(bf16), w.astype(bf16),
                       preferred_element_type=jnp.float32)

    x = x_img.reshape(x_img.shape[0], INPUT_DIM)
    h1 = _softplus(mm(x, p["w1"]) + p["b1"])
    mu = mm(h1, p["wmu"]) + p["bmu"]
    logvar = mm(h1, p["wlv"]) + p["blv"]
    z = mu + eps * jnp.exp(0.5 * logvar)
    h2 = _softplus(mm(z, p["w2"]) + p["b2"])
    recon = jax.nn.sigmoid(mm(h2, p["w3"]) + p["b3"])
    return recon, mu, logvar


if __name__ == "__main__":
    key = jax.random.PRNGKey(0)
    k_param, k_x, k_eps = jax.random.split(key, 3)

    B = 8
    x_img = jax.random.uniform(k_x, (B, 1, 28, 28), jnp.float32)   # MNIST-like
    params = init_params(k_param)
    # TODO(synk): eps reproduces torch.randn_like(std) but is drawn in the
    # wrapper (Pallas stateful PRNG would change the random stream semantics).
    eps = jax.random.normal(k_eps, (B, LATENT_DIM), jnp.float32)

    padded_params = prepare_params(params)
    recon, mu, logvar = jax.block_until_ready(
        vae_forward(x_img, eps, padded_params)
    )

    # sanity check against pure-JAX reference (same bf16 weights/operands);
    # recon tolerance accounts for its bf16 output quantization (<= ~2e-3 abs).
    r_recon, r_mu, r_logvar = vae_reference(x_img, eps, params)
    assert recon.shape == (B, INPUT_DIM)
    assert mu.shape == (B, LATENT_DIM) and logvar.shape == (B, LATENT_DIM)
    assert jnp.allclose(mu, r_mu, atol=2e-3, rtol=2e-3)
    assert jnp.allclose(logvar, r_logvar, atol=2e-3, rtol=2e-3)
    assert jnp.allclose(recon, r_recon, atol=1e-2, rtol=1e-2)

    print("KERNEL_OK")
</pallas_src>

<mosaic_0001>
module attributes {stable_mosaic.version = 11 : i64} {
  func.func @vae_kernel(%arg0: i32, %arg1: memref<8x784xbf16, #tpu.memory_space<vmem>>, %arg2: memref<8x128xf32, #tpu.memory_space<vmem>>, %arg3: memref<784x512xbf16, #tpu.memory_space<vmem>>, %arg4: memref<1x512xf32, #tpu.memory_space<vmem>>, %arg5: memref<512x256xbf16, #tpu.memory_space<vmem>>, %arg6: memref<1x256xf32, #tpu.memory_space<vmem>>, %arg7: memref<128x512xbf16, #tpu.memory_space<vmem>>, %arg8: memref<1x512xf32, #tpu.memory_space<vmem>>, %arg9: memref<512x784xbf16, #tpu.memory_space<vmem>>, %arg10: memref<1x784xf32, #tpu.memory_space<vmem>>, %arg11: memref<8x784xbf16, #tpu.memory_space<vmem>>, %arg12: memref<8x128xf32, #tpu.memory_space<vmem>>, %arg13: memref<8x128xf32, #tpu.memory_space<vmem>>) attributes {dimension_semantics = [#tpu.dimension_semantics<parallel>], iteration_bounds = array<i64: 1>, scalar_prefetch = 0 : i64, scratch_operands = 0 : i64, tpu.core_type = #tpu.core_type<tc>, window_params = [{transform_indices = @transform_0, window_bounds = array<i64: 8, 784>}, {transform_indices = @transform_1, window_bounds = array<i64: 8, 128>}, {pipeline_mode = #tpu.pipeline_mode<synchronous>, transform_indices = @transform_2, window_bounds = array<i64: 784, 512>}, {pipeline_mode = #tpu.pipeline_mode<synchronous>, transform_indices = @transform_3, window_bounds = array<i64: 1, 512>}, {pipeline_mode = #tpu.pipeline_mode<synchronous>, transform_indices = @transform_4, window_bounds = array<i64: 512, 256>}, {pipeline_mode = #tpu.pipeline_mode<synchronous>, transform_indices = @transform_5, window_bounds = array<i64: 1, 256>}, {pipeline_mode = #tpu.pipeline_mode<synchronous>, transform_indices = @transform_6, window_bounds = array<i64: 128, 512>}, {pipeline_mode = #tpu.pipeline_mode<synchronous>, transform_indices = @transform_7, window_bounds = array<i64: 1, 512>}, {pipeline_mode = #tpu.pipeline_mode<synchronous>, transform_indices = @transform_8, window_bounds = array<i64: 512, 784>}, {pipeline_mode = #tpu.pipeline_mode<synchronous>, transform_indices = @transform_9, window_bounds = array<i64: 1, 784>}, {transform_indices = @transform_10, window_bounds = array<i64: 8, 784>}, {transform_indices = @transform_11, window_bounds = array<i64: 8, 128>}, {transform_indices = @transform_12, window_bounds = array<i64: 8, 128>}]} {
    %c0 = arith.constant 0 : index
    %c0_0 = arith.constant 0 : index
    %0 = vector.load %arg1[%c0, %c0_0] : memref<8x784xbf16, #tpu.memory_space<vmem>>, vector<8x784xbf16>
    %c0_1 = arith.constant 0 : index
    %c0_2 = arith.constant 0 : index
    %1 = vector.load %arg3[%c0_1, %c0_2] : memref<784x512xbf16, #tpu.memory_space<vmem>>, vector<784x512xbf16>
    %cst = arith.constant dense<0.000000e+00> : vector<8x512xf32>
    %2 = tpu.matmul %0, %1, %cst {dimension_numbers = #tpu.dot_dimension_numbers<[1], [0], [0], [1], [0, 0, 1, 1], [], []>} : vector<8x784xbf16>, vector<784x512xbf16>, vector<8x512xf32> -> vector<8x512xf32>
    %c0_3 = arith.constant 0 : index
    %c0_4 = arith.constant 0 : index
    %3 = vector.load %arg4[%c0_3, %c0_4] : memref<1x512xf32, #tpu.memory_space<vmem>>, vector<1x512xf32>
    %4 = vector.broadcast %3 : vector<1x512xf32> to vector<8x512xf32>
    %5 = arith.addf %2, %4 : vector<8x512xf32>
    %cst_5 = arith.constant 0.000000e+00 : f32
    %6 = vector.broadcast %cst_5 : f32 to vector<8x512xf32>
    %7 = arith.maximumf %5, %6 : vector<8x512xf32>
    %8 = math.absf %5 : vector<8x512xf32>
    %cst_6 = arith.constant 0.000000e+00 : f32
    %9 = vector.broadcast %cst_6 : f32 to vector<8x512xf32>
    %10 = arith.subf %9, %8 : vector<8x512xf32>
    %11 = math.exp %10 : vector<8x512xf32>
    %12 = math.log1p %11 : vector<8x512xf32>
    %13 = arith.addf %7, %12 : vector<8x512xf32>
    %14 = arith.truncf %13 : vector<8x512xf32> to vector<8x512xbf16>
    %c0_7 = arith.constant 0 : index
    %c0_8 = arith.constant 0 : index
    %15 = vector.load %arg5[%c0_7, %c0_8] : memref<512x256xbf16, #tpu.memory_space<vmem>>, vector<512x256xbf16>
    %cst_9 = arith.constant dense<0.000000e+00> : vector<8x256xf32>
    %16 = tpu.matmul %14, %15, %cst_9 {dimension_numbers = #tpu.dot_dimension_numbers<[1], [0], [0], [1], [0, 0, 1, 1], [], []>} : vector<8x512xbf16>, vector<512x256xbf16>, vector<8x256xf32> -> vector<8x256xf32>
    %c0_10 = arith.constant 0 : index
    %c0_11 = arith.constant 0 : index
    %17 = vector.load %arg6[%c0_10, %c0_11] : memref<1x256xf32, #tpu.memory_space<vmem>>, vector<1x256xf32>
    %18 = vector.broadcast %17 : vector<1x256xf32> to vector<8x256xf32>
    %19 = arith.addf %16, %18 : vector<8x256xf32>
    %20 = vector.extract_strided_slice %19 {offsets = [0, 0], sizes = [8, 128], strides = [1, 1]} : vector<8x256xf32> to vector<8x128xf32>
    %21 = vector.extract_strided_slice %19 {offsets = [0, 128], sizes = [8, 128], strides = [1, 1]} : vector<8x256xf32> to vector<8x128xf32>
    %cst_12 = arith.constant 5.000000e-01 : f32
    %22 = vector.broadcast %cst_12 : f32 to vector<8x128xf32>
    %23 = arith.mulf %22, %21 : vector<8x128xf32>
    %24 = math.exp %23 : vector<8x128xf32>
    %c0_13 = arith.constant 0 : index
    %c0_14 = arith.constant 0 : index
    %25 = vector.load %arg2[%c0_13, %c0_14] : memref<8x128xf32, #tpu.memory_space<vmem>>, vector<8x128xf32>
    %26 = arith.mulf %25, %24 : vector<8x128xf32>
    %27 = arith.addf %20, %26 : vector<8x128xf32>
    %28 = arith.truncf %27 : vector<8x128xf32> to vector<8x128xbf16>
    %c0_15 = arith.constant 0 : index
    %c0_16 = arith.constant 0 : index
    %29 = vector.load %arg7[%c0_15, %c0_16] : memref<128x512xbf16, #tpu.memory_space<vmem>>, vector<128x512xbf16>
    %cst_17 = arith.constant dense<0.000000e+00> : vector<8x512xf32>
    %30 = tpu.matmul %28, %29, %cst_17 {dimension_numbers = #tpu.dot_dimension_numbers<[1], [0], [0], [1], [0, 0, 1, 1], [], []>} : vector<8x128xbf16>, vector<128x512xbf16>, vector<8x512xf32> -> vector<8x512xf32>
    %c0_18 = arith.constant 0 : index
    %c0_19 = arith.constant 0 : index
    %31 = vector.load %arg8[%c0_18, %c0_19] : memref<1x512xf32, #tpu.memory_space<vmem>>, vector<1x512xf32>
    %32 = vector.broadcast %31 : vector<1x512xf32> to vector<8x512xf32>
    %33 = arith.addf %30, %32 : vector<8x512xf32>
    %cst_20 = arith.constant 0.000000e+00 : f32
    %34 = vector.broadcast %cst_20 : f32 to vector<8x512xf32>
    %35 = arith.maximumf %33, %34 : vector<8x512xf32>
    %36 = math.absf %33 : vector<8x512xf32>
    %cst_21 = arith.constant 0.000000e+00 : f32
    %37 = vector.broadcast %cst_21 : f32 to vector<8x512xf32>
    %38 = arith.subf %37, %36 : vector<8x512xf32>
    %39 = math.exp %38 : vector<8x512xf32>
    %40 = math.log1p %39 : vector<8x512xf32>
    %41 = arith.addf %35, %40 : vector<8x512xf32>
    %42 = arith.truncf %41 : vector<8x512xf32> to vector<8x512xbf16>
    %c0_22 = arith.constant 0 : index
    %c0_23 = arith.constant 0 : index
    %43 = vector.load %arg9[%c0_22, %c0_23] : memref<512x784xbf16, #tpu.memory_space<vmem>>, vector<512x784xbf16>
    %cst_24 = arith.constant dense<0.000000e+00> : vector<8x784xf32>
    %44 = tpu.matmul %42, %43, %cst_24 {dimension_numbers = #tpu.dot_dimension_numbers<[1], [0], [0], [1], [0, 0, 1, 1], [], []>} : vector<8x512xbf16>, vector<512x784xbf16>, vector<8x784xf32> -> vector<8x784xf32>
    %c0_25 = arith.constant 0 : index
    %c0_26 = arith.constant 0 : index
    %45 = vector.load %arg10[%c0_25, %c0_26] : memref<1x784xf32, #tpu.memory_space<vmem>>, vector<1x784xf32>
    %46 = vector.broadcast %45 : vector<1x784xf32> to vector<8x784xf32>
    %47 = arith.addf %44, %46 : vector<8x784xf32>
    %cst_27 = arith.constant 5.000000e-01 : f32
    %48 = vector.broadcast %cst_27 : f32 to vector<8x784xf32>
    %49 = arith.mulf %48, %47 : vector<8x784xf32>
    %50 = math.tanh %49 : vector<8x784xf32>
    %cst_28 = arith.constant 1.000000e+00 : f32
    %51 = vector.broadcast %cst_28 : f32 to vector<8x784xf32>
    %52 = arith.addf %50, %51 : vector<8x784xf32>
    %cst_29 = arith.constant 5.000000e-01 : f32
    %53 = vector.broadcast %cst_29 : f32 to vector<8x784xf32>
    %54 = arith.mulf %53, %52 : vector<8x784xf32>
    %55 = arith.truncf %54 : vector<8x784xf32> to vector<8x784xbf16>
    %c0_30 = arith.constant 0 : index
    %c0_31 = arith.constant 0 : index
    %56 = vector.load %arg11[%c0_30, %c0_31] : memref<8x784xbf16, #tpu.memory_space<vmem>>, vector<8x784xbf16>
    tpu.vector_store %arg11[%c0_30, %c0_31], %55 {strides = array<i32>} : memref<8x784xbf16, #tpu.memory_space<vmem>>, vector<8x784xbf16>,
    %c0_32 = arith.constant 0 : index
    %c0_33 = arith.constant 0 : index
    %57 = vector.load %arg12[%c0_32, %c0_33] : memref<8x128xf32, #tpu.memory_space<vmem>>, vector<8x128xf32>
    tpu.vector_store %arg12[%c0_32, %c0_33], %20 {strides = array<i32>} : memref<8x128xf32, #tpu.memory_space<vmem>>, vector<8x128xf32>,
    %c0_34 = arith.constant 0 : index
    %c0_35 = arith.constant 0 : index
    %58 = vector.load %arg13[%c0_34, %c0_35] : memref<8x128xf32, #tpu.memory_space<vmem>>, vector<8x128xf32>
    tpu.vector_store %arg13[%c0_34, %c0_35], %21 {strides = array<i32>} : memref<8x128xf32, #tpu.memory_space<vmem>>, vector<8x128xf32>,
    return
  }
  func.func @transform_0(%arg0: i32) -> (i32, i32) {
    %c0_i32 = arith.constant 0 : i32
    %c0_i32_0 = arith.constant 0 : i32
    return %arg0, %c0_i32 : i32, i32
  }
  func.func @transform_1(%arg0: i32) -> (i32, i32) {
    %c0_i32 = arith.constant 0 : i32
    %c0_i32_0 = arith.constant 0 : i32
    return %arg0, %c0_i32 : i32, i32
  }
  func.func @transform_2(%arg0: i32) -> (i32, i32) {
    %c0_i32 = arith.constant 0 : i32
    %c0_i32_0 = arith.constant 0 : i32
    %c0_i32_1 = arith.constant 0 : i32
    return %c0_i32, %c0_i32_0 : i32, i32
  }
  func.func @transform_3(%arg0: i32) -> (i32, i32) {
    %c0_i32 = arith.constant 0 : i32
    %c0_i32_0 = arith.constant 0 : i32
    %c0_i32_1 = arith.constant 0 : i32
    return %c0_i32, %c0_i32_0 : i32, i32
  }
  func.func @transform_4(%arg0: i32) -> (i32, i32) {
    %c0_i32 = arith.constant 0 : i32
    %c0_i32_0 = arith.constant 0 : i32
    %c0_i32_1 = arith.constant 0 : i32
    return %c0_i32, %c0_i32_0 : i32, i32
  }
  func.func @transform_5(%arg0: i32) -> (i32, i32) {
    %c0_i32 = arith.constant 0 : i32
    %c0_i32_0 = arith.constant 0 : i32
    %c0_i32_1 = arith.constant 0 : i32
    return %c0_i32, %c0_i32_0 : i32, i32
  }
  func.func @transform_6(%arg0: i32) -> (i32, i32) {
    %c0_i32 = arith.constant 0 : i32
    %c0_i32_0 = arith.constant 0 : i32
    %c0_i32_1 = arith.constant 0 : i32
    return %c0_i32, %c0_i32_0 : i32, i32
  }
  func.func @transform_7(%arg0: i32) -> (i32, i32) {
    %c0_i32 = arith.constant 0 : i32
    %c0_i32_0 = arith.constant 0 : i32
    %c0_i32_1 = arith.constant 0 : i32
    return %c0_i32, %c0_i32_0 : i32, i32
  }
  func.func @transform_8(%arg0: i32) -> (i32, i32) {
    %c0_i32 = arith.constant 0 : i32
    %c0_i32_0 = arith.constant 0 : i32
    %c0_i32_1 = arith.constant 0 : i32
    return %c0_i32, %c0_i32_0 : i32, i32
  }
  func.func @transform_9(%arg0: i32) -> (i32, i32) {
    %c0_i32 = arith.constant 0 : i32
    %c0_i32_0 = arith.constant 0 : i32
    %c0_i32_1 = arith.constant 0 : i32
    return %c0_i32, %c0_i32_0 : i32, i32
  }
  func.func @transform_10(%arg0: i32) -> (i32, i32) {
    %c0_i32 = arith.constant 0 : i32
    %c0_i32_0 = arith.constant 0 : i32
    return %arg0, %c0_i32 : i32, i32
  }
  func.func @transform_11(%arg0: i32) -> (i32, i32) {
    %c0_i32 = arith.constant 0 : i32
    %c0_i32_0 = arith.constant 0 : i32
    return %arg0, %c0_i32 : i32, i32
  }
  func.func @transform_12(%arg0: i32) -> (i32, i32) {
    %c0_i32 = arith.constant 0 : i32
    %c0_i32_0 = arith.constant 0 : i32
    return %arg0, %c0_i32 : i32, i32
  }
}

</mosaic_0001>

<bundles_post_ra>
// kernel: tpu_custom_call.1
= control target key start
LH: loop header
LB: loop body
LE: loop exit
PB: predicated region body
PF: predicated region fallthrough
CT: control target
= control target key end

     0   :  { %18 = vsyncpa [#allocation3], 0  ;;  %vm1255_vm0 = vcmask 130048   ;;  %s10471_s0 = inlined_call_operand.vmem [shape: bf16[8,784], index: 0, kind: input, shape index: {}]   ;;  %s10472_s1 = inlined_call_operand.vmem [shape: f32[8,128], index: 1, kind: input, shape index: {}]   ;;  %s10473_s2 = inlined_call_operand.vmem [shape: bf16[784,512], index: 2, kind: input, shape index: {}]   ;;  %s10474_s3 = inlined_call_operand.vmem [shape: f32[1,512], index: 3, kind: input, shape index: {}]   ;;  %s10475_s4 = inlined_call_operand.vmem [shape: bf16[512,256], index: 4, kind: input, shape index: {}]   ;;  %s10476_s5 = inlined_call_operand.vmem [shape: f32[1,256], index: 5, kind: input, shape index: {}]   ;;  %s10477_s6 = inlined_call_operand.vmem [shape: bf16[128,512], index: 6, kind: input, shape index: {}]   ;;  %s10478_s7 = inlined_call_operand.vmem [shape: f32[1,512], index: 7, kind: input, shape index: {}]   ;;  %s10479_s8 = inlined_call_operand.vmem [shape: bf16[512,784], index: 8, kind: input, shape index: {}]   ;;  %s10480_s9 = inlined_call_operand.vmem [shape: f32[1,784], index: 9, kind: input, shape index: {}]   ;;  %s10481_s10 = inlined_call_operand.hbm [shape: bf16[8,784], index: 10, kind: output, shape index: {0}]   ;;  %s10482_s11 = inlined_call_operand.hbm [shape: f32[8,128], index: 11, kind: output, shape index: {1}]   ;;  %s10483_s12 = inlined_call_operand.hbm [shape: f32[8,128], index: 12, kind: output, shape index: {2}]  }
   0x1   :  { %v4494_v0 = vld [vmem:[%s10473_s2 + $0xe0] sm:$0xf]  ;;  %v6478_v1 = vld [vmem:[%s10473_s2 + $0xec] sm:$0xf0] }
   0x2   :  { %v4622_v2 = vld [vmem:[%s10473_s2 + $0x1e0] sm:$0xf]  ;;  %v4495_v3 = vor.u32 %v6478_v1, %v4494_v0  ;;  %v6510_v4 = vld [vmem:[%s10473_s2 + $0x1ec] sm:$0xf0] }
   0x3   :  { %v4750_v5 = vld [vmem:[%s10473_s2 + $0x2e0] sm:$0xf]  ;;  %v6542_v6 = vld [vmem:[%s10473_s2 + $0x2ec] sm:$0xf0]  ;;  %v4623_v7 = vor.u32 %v6510_v4, %v4622_v2 }
   0x4   :  { %v4751_v8 = vor.u32 %v6542_v6, %v4750_v5  ;;  %v4878_v9 = vld [vmem:[%s10473_s2 + $0x3e0] sm:$0xf]  ;;  %v6574_v10 = vld [vmem:[%s10473_s2 + $0x3ec] sm:$0xf0]  ;;  %1259 = vmatpush.bf16.msra.mxu0 %v4495_v3 }
   0x5   :  { %v4478_v11 = vld [vmem:[%s10473_s2 + $0xc0] sm:$0xf]  ;;  %v4879_v12 = vor.u32 %v6574_v10, %v4878_v9  ;;  %v6474_v13 = vld [vmem:[%s10473_s2 + $0xcc] sm:$0xf0]  ;;  %1272 = vmatpush.bf16.msra.mxu1 %v4623_v7 }
   0x6   :  { %v4606_v14 = vld [vmem:[%s10473_s2 + $0x1c0] sm:$0xf]  ;;  %v6506_v15 = vld [vmem:[%s10473_s2 + $0x1cc] sm:$0xf0]  ;;  %1285 = vmatpush.bf16.msra.mxu2 %v4751_v8  ;;  %v4479_v16 = vor.u32 %v6474_v13, %v4478_v11 }
   0x7   :  { %v4607_v17 = vor.u32 %v6506_v15, %v4606_v14  ;;  %v4734_v18 = vld [vmem:[%s10473_s2 + $0x2c0] sm:$0xf]  ;;  %v6538_v19 = vld [vmem:[%s10473_s2 + $0x2cc] sm:$0xf0]  ;;  %1298 = vmatpush.bf16.msra.mxu3 %v4879_v12 }
   0x8   :  { %v4862_v20 = vld [vmem:[%s10473_s2 + $0x3c0] sm:$0xf]  ;;  %v4735_v21 = vor.u32 %v6538_v19, %v4734_v18  ;;  %v6570_v22 = vld [vmem:[%s10473_s2 + $0x3cc] sm:$0xf0]  ;;  %1260 = vmatpush.bf16.msra.mxu0 %v4479_v16 }
   0x9   :  { %v4462_v23 = vld [vmem:[%s10473_s2 + $0xa0] sm:$0xf]  ;;  %v6470_v24 = vld [vmem:[%s10473_s2 + $0xac] sm:$0xf0]  ;;  %v4863_v25 = vor.u32 %v6570_v22, %v4862_v20  ;;  %1273 = vmatpush.bf16.msra.mxu1 %v4607_v17 }
   0xa   :  { %v4590_v26 = vld [vmem:[%s10473_s2 + $0x1a0] sm:$0xf]  ;;  %v6502_v27 = vld [vmem:[%s10473_s2 + $0x1ac] sm:$0xf0]  ;;  %v4463_v29 = vor.u32 %v6470_v24, %v4462_v23  ;;  %1286 = vmatpush.bf16.msra.mxu2 %v4735_v21 }
   0xb   :  { %v4718_v28 = vld [vmem:[%s10473_s2 + $0x2a0] sm:$0xf]  ;;  %v6534_v30 = vld [vmem:[%s10473_s2 + $0x2ac] sm:$0xf0]  ;;  %v4591_v33 = vor.u32 %v6502_v27, %v4590_v26  ;;  %1299 = vmatpush.bf16.msra.mxu3 %v4863_v25  ;;  %v42_v25 = vld [vmem:[%s10471_s0 + $0x8] sm:$0xff] }
   0xc   :  { %v4846_v31 = vld [vmem:[%s10473_s2 + $0x3a0] sm:$0xf]  ;;  %v6566_v32 = vld [vmem:[%s10473_s2 + $0x3ac] sm:$0xf0]  ;;  %v4719_v34 = vor.u32 %v6534_v30, %v4718_v28  ;;  %1261 = vmatpush.bf16.msra.mxu0 %v4463_v29 }
   0xd   :  { %v4446_v35 = vld [vmem:[%s10473_s2 + $0x80] sm:$0xf]  ;;  %v6466_v36 = vld [vmem:[%s10473_s2 + $0x8c] sm:$0xf0]  ;;  %v4847_v38 = vor.u32 %v6566_v32, %v4846_v31  ;;  %1274 = vmatpush.bf16.msra.mxu1 %v4591_v33 }
   0xe   :  { %v4574_v37 = vld [vmem:[%s10473_s2 + $0x180] sm:$0xf]  ;;  %v6498_v39 = vld [vmem:[%s10473_s2 + $0x18c] sm:$0xf0]  ;;  %v4447_v44 = vor.u32 %v6466_v36, %v4446_v35  ;;  %1287 = vmatpush.bf16.msra.mxu2 %v4719_v34  ;;  %v6476_v34 = vld [vmem:[%s10473_s2 + $0xe4] sm:$0xf]  ;;  %v257_v36 = vunpack.c.l.b16 %v42_v25 }
   0xf   :  { %v4702_v40 = vld [vmem:[%s10473_s2 + $0x280] sm:$0xf]  ;;  %v6530_v41 = vld [vmem:[%s10473_s2 + $0x28c] sm:$0xf0]  ;;  %v4575_v45 = vor.u32 %v6498_v39, %v4574_v37  ;;  %1300 = vmatpush.bf16.msra.mxu3 %v4847_v38  ;;  %v4496_v35 = vld [vmem:[%s10473_s2 + $0xf0] sm:$0xf0] }
  0x10   :  { %v4830_v42 = vld [vmem:[%s10473_s2 + $0x380] sm:$0xf]  ;;  %v6562_v43 = vld [vmem:[%s10473_s2 + $0x38c] sm:$0xf0]  ;;  %v4703_v46 = vor.u32 %v6530_v41, %v4702_v40  ;;  %1262 = vmatpush.bf16.msra.mxu0 %v4447_v44 }
  0x11   :  { %v4430_v47 = vld [vmem:[%s10473_s2 + $0x60] sm:$0xf]  ;;  %v6462_v48 = vld [vmem:[%s10473_s2 + $0x6c] sm:$0xf0]  ;;  %v4831_v50 = vor.u32 %v6562_v43, %v4830_v42  ;;  %1275 = vmatpush.bf16.msra.mxu1 %v4575_v45  ;;  %v258_v42 = vunpack.c.h.b16 %v42_v25  ;;  %v6496_v25 = vld [vmem:[%s10473_s2 + $0x184] sm:$0xf] }
  0x12   :  { %v4558_v49 = vld [vmem:[%s10473_s2 + $0x160] sm:$0xf]  ;;  %v6494_v51 = vld [vmem:[%s10473_s2 + $0x16c] sm:$0xf0]  ;;  %v4431_v56 = vor.u32 %v6462_v48, %v4430_v47  ;;  %1288 = vmatpush.bf16.msra.mxu2 %v4703_v46  ;;  %v6508_v46 = vld [vmem:[%s10473_s2 + $0x1e4] sm:$0xf] }
  0x13   :  { %v4686_v52 = vld [vmem:[%s10473_s2 + $0x260] sm:$0xf]  ;;  %v6526_v53 = vld [vmem:[%s10473_s2 + $0x26c] sm:$0xf0]  ;;  %v4559_v57 = vor.u32 %v6494_v51, %v4558_v49  ;;  %1301 = vmatpush.bf16.msra.mxu3 %v4831_v50  ;;  %v4624_v47 = vld [vmem:[%s10473_s2 + $0x1f0] sm:$0xf0]  ;;  %v4499_v49 = vor.u32 %v6476_v34, %v4496_v35 }
  0x14   :  { %v4814_v54 = vld [vmem:[%s10473_s2 + $0x360] sm:$0xf]  ;;  %v6558_v55 = vld [vmem:[%s10473_s2 + $0x36c] sm:$0xf0]  ;;  %v4687_v58 = vor.u32 %v6526_v53, %v4686_v52  ;;  %1263 = vmatpush.bf16.msra.mxu0 %v4431_v56  ;;  %v7396_v53 = vpack.c.b16 %v257_v36, %v257_v36  ;;  %v4480_v56 = vld [vmem:[%s10473_s2 + $0xd0] sm:$0xf0] }
  0x15   :  { %v4414_v59 = vld [vmem:[%s10473_s2 + $0x40] sm:$0xf]  ;;  %v6458_v60 = vld [vmem:[%s10473_s2 + $0x4c] sm:$0xf0]  ;;  %v4815_v62 = vor.u32 %v6558_v55, %v4814_v54  ;;  %1276 = vmatpush.bf16.msra.mxu1 %v4559_v57  ;;  %v6472_v55 = vld [vmem:[%s10473_s2 + $0xc4] sm:$0xf] }
  0x16   :  { %v4542_v61 = vld [vmem:[%s10473_s2 + $0x140] sm:$0xf]  ;;  %v6490_v63 = vld [vmem:[%s10473_s2 + $0x14c] sm:$0xf0]  ;;  %v4415_v4 = vor.u32 %v6458_v60, %v4414_v59  ;;  %1289 = vmatpush.bf16.msra.mxu2 %v4687_v58  ;;  %v7409_v60 = vpack.c.b16 %v258_v42, %v258_v42  ;;  %v4432_v34 = vld [vmem:[%s10473_s2 + $0x70] sm:$0xf0] }
  0x17   :  { %v4670_v0 = vld [vmem:[%s10473_s2 + $0x240] sm:$0xf]  ;;  %v6522_v1 = vld [vmem:[%s10473_s2 + $0x24c] sm:$0xf0]  ;;  %v4543_v5 = vor.u32 %v6490_v63, %v4542_v61  ;;  %1302 = vmatpush.bf16.msra.mxu3 %v4815_v62  ;;  %v4627_v61 = vor.u32 %v6508_v46, %v4624_v47  ;;  %v6504_v63 = vld [vmem:[%s10473_s2 + $0x1c4] sm:$0xf] }
  0x18   :  { %v4798_v2 = vld [vmem:[%s10473_s2 + $0x340] sm:$0xf]  ;;  %v6554_v3 = vld [vmem:[%s10473_s2 + $0x34c] sm:$0xf0]  ;;  %v4671_v6 = vor.u32 %v6522_v1, %v4670_v0  ;;  %1264 = vmatpush.bf16.msra.mxu0 %v4415_v4  ;;  %v4608_v0 = vld [vmem:[%s10473_s2 + $0x1d0] sm:$0xf0] }
  0x19   :  { %v4398_v7 = vld [vmem:[%s10473_s2 + $0x20] sm:$0xf]  ;;  %v6454_v8 = vld [vmem:[%s10473_s2 + $0x2c] sm:$0xf0]  ;;  %v4799_v10 = vor.u32 %v6554_v3, %v4798_v2  ;;  %1277 = vmatpush.bf16.msra.mxu1 %v4543_v5  ;;  %v4483_v2 = vor.u32 %v6472_v55, %v4480_v56  ;;  %v6456_v46 = vld [vmem:[%s10473_s2 + $0x44] sm:$0xf] }
  0x1a   :  { %v4526_v9 = vld [vmem:[%s10473_s2 + $0x120] sm:$0xf]  ;;  %v6486_v11 = vld [vmem:[%s10473_s2 + $0x12c] sm:$0xf0]  ;;  %v4399_v17 = vor.u32 %v6454_v8, %v4398_v7  ;;  %1290 = vmatpush.bf16.msra.mxu2 %v4671_v6  ;;  %v6468_v7 = vld [vmem:[%s10473_s2 + $0xa4] sm:$0xf] }
  0x1b   :  { %v4654_v12 = vld [vmem:[%s10473_s2 + $0x220] sm:$0xf]  ;;  %v6518_v13 = vld [vmem:[%s10473_s2 + $0x22c] sm:$0xf0]  ;;  %v4527_v21 = vor.u32 %v6486_v11, %v4526_v9  ;;  %1303 = vmatpush.bf16.msra.mxu3 %v4799_v10  ;;  %v4464_v8 = vld [vmem:[%s10473_s2 + $0xb0] sm:$0xf0]  ;;  %v4611_v10 = vor.u32 %v6504_v63, %v4608_v0 }
  0x1c   :  { %v4782_v14 = vld [vmem:[%s10473_s2 + $0x320] sm:$0xf]  ;;  %v6550_v15 = vld [vmem:[%s10473_s2 + $0x32c] sm:$0xf0]  ;;  %v4655_v22 = vor.u32 %v6518_v13, %v4654_v12  ;;  %1265 = vmatpush.bf16.msra.mxu0 %v4399_v17  ;;  %v6500_v12 = vld [vmem:[%s10473_s2 + $0x1a4] sm:$0xf] }
  0x1d   :  { %v4382_v16 = vld [vmem:[%s10473_s2] sm:$0xf]  ;;  %v6450_v18 = vld [vmem:[%s10473_s2 + $0xc] sm:$0xf0]  ;;  %v4783_v26 = vor.u32 %v6550_v15, %v4782_v14  ;;  %1278 = vmatpush.bf16.msra.mxu1 %v4527_v21  ;;  %v4592_v13 = vld [vmem:[%s10473_s2 + $0x1b0] sm:$0xf0]  ;;  %v4467_v15 = vor.u32 %v6468_v7, %v4464_v8 }
  0x1e   :  { %v4510_v19 = vld [vmem:[%s10473_s2 + $0x100] sm:$0xf]  ;;  %v6482_v20 = vld [vmem:[%s10473_s2 + $0x10c] sm:$0xf0]  ;;  %v4383_v33 = vor.u32 %v6450_v18, %v4382_v16  ;;  %1291 = vmatpush.bf16.msra.mxu2 %v4655_v22  ;;  %v4448_v21 = vld [vmem:[%s10473_s2 + $0x90] sm:$0xf0] }
  0x1f   :  { %v4638_v23 = vld [vmem:[%s10473_s2 + $0x200] sm:$0xf]  ;;  %v6514_v24 = vld [vmem:[%s10473_s2 + $0x20c] sm:$0xf0]  ;;  %v4511_v38 = vor.u32 %v6482_v20, %v4510_v19  ;;  %1304 = vmatpush.bf16.msra.mxu3 %v4783_v26  ;;  %v6464_v20 = vld [vmem:[%s10473_s2 + $0x84] sm:$0xf] }
  0x20   :  { %v4766_v27 = vld [vmem:[%s10473_s2 + $0x300] sm:$0xf]  ;;  %v6546_v28 = vld [vmem:[%s10473_s2 + $0x30c] sm:$0xf0]  ;;  %v4639_v39 = vor.u32 %v6514_v24, %v4638_v23  ;;  %1266 = vmatpush.bf16.msra.mxu0 %v4383_v33  ;;  %v44_v22 = vld [vmem:[%s10471_s0 + $0x18] sm:$0xf]  ;;  %v4595_v23 = vor.u32 %v6500_v12, %v4592_v13 }
  0x21   :  { %v5006_v29 = vld [vmem:[%s10473_s2 + $0x4e0] sm:$0xf]  ;;  %v6606_v30 = vld [vmem:[%s10473_s2 + $0x4ec] sm:$0xf0]  ;;  %v4767_v43 = vor.u32 %v6546_v28, %v4766_v27  ;;  %1279 = vmatpush.bf16.msra.mxu1 %v4511_v38  ;;  %v4576_v26 = vld [vmem:[%s10473_s2 + $0x190] sm:$0xf0]  ;;  %v4451_v28 = vor.u32 %v6464_v20, %v4448_v21  ;;  %v261_v35 = vunpack.c.l.b16 %v44_v22 }
  0x22   :  { %v5134_v31 = vld [vmem:[%s10473_s2 + $0x5e0] sm:$0xf]  ;;  %v6638_v32 = vld [vmem:[%s10473_s2 + $0x5ec] sm:$0xf0]  ;;  %v5007_v44 = vor.u32 %v6606_v30, %v5006_v29  ;;  %1292 = vmatpush.bf16.msra.mxu2 %v4639_v39  ;;  %v6460_v33 = vld [vmem:[%s10473_s2 + $0x64] sm:$0xf]  ;;  %v4579_v36 = vor.u32 %v6496_v25, %v4576_v26 }
  0x23   :  { %v41_v37 = vld [vmem:[%s10471_s0] sm:$0xff]  ;;  %v6642_v45 = vld [vmem:[%s10473_s2 + $0x60c] sm:$0xf0]  ;;  %v5135_v48 = vor.u32 %v6638_v32, %v5134_v31  ;;  %1305 = vmatpush.bf16.msra.mxu3 %v4767_v43  ;;  %v4560_v39 = vld [vmem:[%s10473_s2 + $0x170] sm:$0xf0] }
  0x24   :  { %v5150_v40 = vld [vmem:[%s10473_s2 + $0x600] sm:$0xf]  ;;  %v255_v41 = vunpack.c.l.b16 %v41_v37  ;;  %v6602_v51 = vld [vmem:[%s10473_s2 + $0x4cc] sm:$0xf0]  ;;  %v256_v58 = vunpack.c.h.b16 %v41_v37  ;;  %1311 = vmatpush.bf16.msrb.mxu0 %v5007_v44  ;;  %v6492_v38 = vld [vmem:[%s10473_s2 + $0x164] sm:$0xf] }
  0x25   :  { %v4990_v50 = vld [vmem:[%s10473_s2 + $0x4c0] sm:$0xf]  ;;  %v6634_v54 = vld [vmem:[%s10473_s2 + $0x5cc] sm:$0xf0]  ;;  %v5151_v59 = vor.u32 %v6642_v45, %v5150_v40  ;;  %1324 = vmatpush.bf16.msrb.mxu1 %v5135_v48  ;;  %1293 = vmatmul.bf16.vlgmr.msra.gmra.mxu2 %v7396_v53  ;;  %v4416_v47 = vld [vmem:[%s10473_s2 + $0x50] sm:$0xf0]  ;;  %v7516_v48 = vpack.c.b16 %v261_v35, %v261_v35 }
  0x26   :  { %v5118_v52 = vld [vmem:[%s10473_s2 + $0x5c0] sm:$0xf]  ;;  %v7407_v57 = vpack.c.b16 %v255_v41, %v255_v41  ;;  %v4991_v62 = vor.u32 %v6602_v51, %v4990_v50  ;;  %v6598_v4 = vld [vmem:[%s10473_s2 + $0x4ac] sm:$0xf0]  ;;  %v7437_v9 = vpack.c.b16 %v256_v58, %v256_v58  ;;  %1306 = vmatmul.bf16.vlgmr.msra.gmra.mxu3 %v7409_v60  ;;  %v4435_v41 = vor.u32 %v6460_v33, %v4432_v34  ;;  %v6488_v51 = vld [vmem:[%s10473_s2 + $0x144] sm:$0xf] }
  0x27   :  { %1350 = vmatpush.bf16.msrb.mxu3 %v4499_v49  ;;  %v5119_v1 = vor.u32 %v6634_v54, %v5118_v52  ;;  %v4974_v3 = vld [vmem:[%s10473_s2 + $0x4a0] sm:$0xf]  ;;  %v6630_v6 = vld [vmem:[%s10473_s2 + $0x5ac] sm:$0xf0]  ;;  %1344 = vmatpush.bf16.msrb.mxu2 %v5151_v59  ;;  %v4563_v49 = vor.u32 %v6492_v38, %v4560_v39  ;;  %v4544_v52 = vld [vmem:[%s10473_s2 + $0x150] sm:$0xf0]  ;;  %v4419_v55 = vor.u32 %v6456_v46, %v4416_v47 }
  0x28   :  { %v5102_v5 = vld [vmem:[%s10473_s2 + $0x5a0] sm:$0xf]  ;;  %1267 = vmatmul.bf16.vlgmr.msra.gmra.mxu0 %v7407_v57  ;;  %v4975_v11 = vor.u32 %v6598_v4, %v4974_v3  ;;  %v6594_v17 = vld [vmem:[%s10473_s2 + $0x48c] sm:$0xf0]  ;;  %1280 = vmatmul.bf16.vlgmr.msra.gmra.mxu1 %v7437_v9  ;;  %v4400_v63 = vld [vmem:[%s10473_s2 + $0x30] sm:$0xf0] }
  0x29   :  { %1312 = vmatpush.bf16.msrb.mxu0 %v4991_v62  ;;  %1325 = vmatpush.bf16.msrb.mxu1 %v5119_v1  ;;  %v5103_v14 = vor.u32 %v6630_v6, %v5102_v5  ;;  %v4958_v16 = vld [vmem:[%s10473_s2 + $0x480] sm:$0xf]  ;;  %v6626_v19 = vld [vmem:[%s10473_s2 + $0x58c] sm:$0xf0]  ;;  %v6452_v62 = vld [vmem:[%s10473_s2 + $0x24] sm:$0xf]  ;;  %v4547_v1 = vor.u32 %v6488_v51, %v4544_v52 }
  0x2a   :  { %v5086_v18 = vld [vmem:[%s10473_s2 + $0x580] sm:$0xf]  ;;  %v4959_v24 = vor.u32 %v6594_v17, %v4958_v16  ;;  %v6590_v30 = vld [vmem:[%s10473_s2 + $0x46c] sm:$0xf0]  ;;  %v6484_v0 = vld [vmem:[%s10473_s2 + $0x124] sm:$0xf]  ;;  %v4403_v7 = vor.u32 %v6452_v62, %v4400_v63 }
  0x2b   :  { %1363 = vmatpush.bf16.msra.mxu2 %v4627_v61  ;;  %1351 = vmatpush.bf16.msrb.mxu3 %v4483_v2  ;;  %v5087_v27 = vor.u32 %v6626_v19, %v5086_v18  ;;  %v4942_v29 = vld [vmem:[%s10473_s2 + $0x460] sm:$0xf]  ;;  %v6622_v32 = vld [vmem:[%s10473_s2 + $0x56c] sm:$0xf0]  ;;  %v4528_v3 = vld [vmem:[%s10473_s2 + $0x130] sm:$0xf0] }
  0x2c   :  { %v5070_v31 = vld [vmem:[%s10473_s2 + $0x560] sm:$0xf]  ;;  %v4943_v37 = vor.u32 %v6590_v30, %v4942_v29  ;;  %v6586_v43 = vld [vmem:[%s10473_s2 + $0x44c] sm:$0xf0]  ;;  %v6448_v12 = vld [vmem:[%s10473_s2 + $0x4] sm:$0xf]  ;;  %v4531_v19 = vor.u32 %v6484_v0, %v4528_v3 }
  0x2d   :  { %1313 = vmatpush.bf16.msrb.mxu0 %v4975_v11  ;;  %1326 = vmatpush.bf16.msrb.mxu1 %v5103_v14  ;;  %v5071_v40 = vor.u32 %v6622_v32, %v5070_v31  ;;  %v4926_v42 = vld [vmem:[%s10473_s2 + $0x440] sm:$0xf]  ;;  %v6618_v45 = vld [vmem:[%s10473_s2 + $0x54c] sm:$0xf0]  ;;  %v4384_v13 = vld [vmem:[%s10473_s2 + $0x10] sm:$0xf0] }
  0x2e   :  { %v5054_v44 = vld [vmem:[%s10473_s2 + $0x540] sm:$0xf]  ;;  %v4927_v50 = vor.u32 %v6586_v43, %v4926_v42  ;;  %v6582_v58 = vld [vmem:[%s10473_s2 + $0x42c] sm:$0xf0]  ;;  %v6540_v14 = vld [vmem:[%s10473_s2 + $0x2e4] sm:$0xf]  ;;  %v4387_v25 = vor.u32 %v6448_v12, %v4384_v13 }
  0x2f   :  { %1364 = vmatpush.bf16.msra.mxu2 %v4611_v10  ;;  %1352 = vmatpush.bf16.msrb.mxu3 %v4467_v15  ;;  %v5055_v54 = vor.u32 %v6618_v45, %v5054_v44  ;;  %v4910_v56 = vld [vmem:[%s10473_s2 + $0x420] sm:$0xf]  ;;  %v6614_v61 = vld [vmem:[%s10473_s2 + $0x52c] sm:$0xf0]  ;;  %v4752_v15 = vld [vmem:[%s10473_s2 + $0x2f0] sm:$0xf0] }
  0x30   :  { %v5038_v59 = vld [vmem:[%s10473_s2 + $0x520] sm:$0xf]  ;;  %v4911_v2 = vor.u32 %v6582_v58, %v4910_v56  ;;  %v43_v5 = vld [vmem:[%s10471_s0 + $0x10] sm:$0xff]  ;;  %v6572_v16 = vld [vmem:[%s10473_s2 + $0x3e4] sm:$0xf] }
  0x31   :  { %1314 = vmatpush.bf16.msrb.mxu0 %v4959_v24  ;;  %1327 = vmatpush.bf16.msrb.mxu1 %v5087_v27  ;;  %v4894_v4 = vld [vmem:[%s10473_s2 + $0x400] sm:$0xf]  ;;  %v5039_v6 = vor.u32 %v6614_v61, %v5038_v59  ;;  %v6578_v8 = vld [vmem:[%s10473_s2 + $0x40c] sm:$0xf0]  ;;  %v4880_v17 = vld [vmem:[%s10473_s2 + $0x3f0] sm:$0xf0]  ;;  %v259_v18 = vunpack.c.l.b16 %v43_v5 }
  0x32   :  { %v5022_v10 = vld [vmem:[%s10473_s2 + $0x500] sm:$0xf]  ;;  %v6610_v11 = vld [vmem:[%s10473_s2 + $0x50c] sm:$0xf0]  ;;  %v4895_v20 = vor.u32 %v6578_v8, %v4894_v4  ;;  %v6604_v21 = vld [vmem:[%s10473_s2 + $0x4e4] sm:$0xf]  ;;  %v4883_v29 = vor.u32 %v6572_v16, %v4880_v17 }
  0x33   :  { %1365 = vmatpush.bf16.msra.mxu2 %v4595_v23  ;;  %1353 = vmatpush.bf16.msrb.mxu3 %v4451_v28  ;;  %v5008_v22 = vld [vmem:[%s10473_s2 + $0x4f0] sm:$0xf0]  ;;  %v260_v23 = vunpack.c.h.b16 %v43_v5  ;;  %v5023_v24 = vor.u32 %v6610_v11, %v5022_v10  ;;  %v6480_v26 = vld [vmem:[%s10473_s2 + $0x104] sm:$0xf]  ;;  %v4755_v28 = vor.u32 %v6540_v14, %v4752_v15  ;;  %v7604_v34 = vpack.c.b16 %v259_v18, %v259_v18 }
  0x34   :  { %v4512_v27 = vld [vmem:[%s10473_s2 + $0x110] sm:$0xf0]  ;;  %v6636_v30 = vld [vmem:[%s10473_s2 + $0x5e4] sm:$0xf]  ;;  %v5011_v33 = vor.u32 %v6604_v21, %v5008_v22 }
  0x35   :  { %1315 = vmatpush.bf16.msrb.mxu0 %v4943_v37  ;;  %1328 = vmatpush.bf16.msrb.mxu1 %v5071_v40  ;;  %v5136_v31 = vld [vmem:[%s10473_s2 + $0x5f0] sm:$0xf0]  ;;  %v6536_v32 = vld [vmem:[%s10473_s2 + $0x2c4] sm:$0xf]  ;;  %v4515_v38 = vor.u32 %v6480_v26, %v4512_v27  ;;  %v7615_v39 = vpack.c.b16 %v260_v23, %v260_v23 }
  0x36   :  { %5164 = vmatmul.msk.bf16.vlgmr.msrb.gmra.mxu2 %vm1255_vm0, %v7516_v48  ;;  %v4736_v35 = vld [vmem:[%s10473_s2 + $0x2d0] sm:$0xf0]  ;;  %v6600_v40 = vld [vmem:[%s10473_s2 + $0x4c4] sm:$0xf]  ;;  %v5139_v42 = vor.u32 %v6636_v30, %v5136_v31 }
  0x37   :  { %1366 = vmatpush.bf16.msra.mxu2 %v4579_v36  ;;  %1354 = vmatpush.bf16.msrb.mxu3 %v4435_v41  ;;  %v6568_v36 = vld [vmem:[%s10473_s2 + $0x3c4] sm:$0xf]  ;;  %v4864_v37 = vld [vmem:[%s10473_s2 + $0x3d0] sm:$0xf0]  ;;  %v4739_v43 = vor.u32 %v6536_v32, %v4736_v35 }
  0x38   :  { %v4992_v41 = vld [vmem:[%s10473_s2 + $0x4d0] sm:$0xf0]  ;;  %v4867_v44 = vor.u32 %v6568_v36, %v4864_v37  ;;  %v6632_v45 = vld [vmem:[%s10473_s2 + $0x5c4] sm:$0xf] }
  0x39   :  { %1316 = vmatpush.bf16.msrb.mxu0 %v4927_v50  ;;  %1329 = vmatpush.bf16.msrb.mxu1 %v5055_v54  ;;  %v5120_v46 = vld [vmem:[%s10473_s2 + $0x5d0] sm:$0xf0]  ;;  %v6532_v47 = vld [vmem:[%s10473_s2 + $0x2a4] sm:$0xf] }
  0x3a   :  { %v4720_v50 = vld [vmem:[%s10473_s2 + $0x2b0] sm:$0xf0]  ;;  %v6564_v51 = vld [vmem:[%s10473_s2 + $0x3a4] sm:$0xf]  ;;  %v5123_v56 = vor.u32 %v6632_v45, %v5120_v46 }
  0x3b   :  { %1367 = vmatpush.bf16.msra.mxu2 %v4563_v49  ;;  %1355 = vmatpush.bf16.msrb.mxu3 %v4419_v55  ;;  %v4995_v49 = vor.u32 %v6600_v40, %v4992_v41  ;;  %v4848_v52 = vld [vmem:[%s10473_s2 + $0x3b0] sm:$0xf0]  ;;  %v6596_v54 = vld [vmem:[%s10473_s2 + $0x4a4] sm:$0xf]  ;;  %v4723_v58 = vor.u32 %v6532_v47, %v4720_v50 }
  0x3c   :  { %v4976_v55 = vld [vmem:[%s10473_s2 + $0x4b0] sm:$0xf0]  ;;  %v4851_v59 = vor.u32 %v6564_v51, %v4848_v52  ;;  %v6628_v61 = vld [vmem:[%s10473_s2 + $0x5a4] sm:$0xf] }
  0x3d   :  { %1317 = vmatpush.bf16.msrb.mxu0 %v4911_v2  ;;  %1330 = vmatpush.bf16.msrb.mxu1 %v5039_v6  ;;  %v5104_v62 = vld [vmem:[%s10473_s2 + $0x5b0] sm:$0xf0]  ;;  %v6528_v63 = vld [vmem:[%s10473_s2 + $0x284] sm:$0xf]  ;;  %v4979_v0 = vor.u32 %v6596_v54, %v4976_v55 }
  0x3e   :  { %v6560_v2 = vld [vmem:[%s10473_s2 + $0x384] sm:$0xf]  ;;  %v4832_v3 = vld [vmem:[%s10473_s2 + $0x390] sm:$0xf0]  ;;  %v5107_v6 = vor.u32 %v6628_v61, %v5104_v62 }
  0x3f   :  { %1368 = vmatpush.bf16.msra.mxu2 %v4547_v1  ;;  %1356 = vmatpush.bf16.msrb.mxu3 %v4403_v7  ;;  %v4704_v1 = vld [vmem:[%s10473_s2 + $0x290] sm:$0xf0]  ;;  %v6592_v4 = vld [vmem:[%s10473_s2 + $0x484] sm:$0xf]  ;;  %v4835_v8 = vor.u32 %v6560_v2, %v4832_v3 }
  0x40   :  { %v4960_v5 = vld [vmem:[%s10473_s2 + $0x490] sm:$0xf0]  ;;  %v4707_v7 = vor.u32 %v6528_v63, %v4704_v1  ;;  %v6624_v10 = vld [vmem:[%s10473_s2 + $0x584] sm:$0xf] }
  0x41   :  { %1318 = vmatpush.bf16.msrb.mxu0 %v4895_v20  ;;  %1331 = vmatpush.bf16.msrb.mxu1 %v5023_v24  ;;  %v5088_v11 = vld [vmem:[%s10473_s2 + $0x590] sm:$0xf0]  ;;  %v6524_v12 = vld [vmem:[%s10473_s2 + $0x264] sm:$0xf]  ;;  %v4963_v13 = vor.u32 %v6592_v4, %v4960_v5 }
  0x42   :  { %v4688_v14 = vld [vmem:[%s10473_s2 + $0x270] sm:$0xf0]  ;;  %v6556_v15 = vld [vmem:[%s10473_s2 + $0x364] sm:$0xf] }
  0x43   :  { %1369 = vmatpush.bf16.msra.mxu2 %v4531_v19  ;;  %1357 = vmatpush.bf16.msrb.mxu3 %v4387_v25  ;;  %v4816_v16 = vld [vmem:[%s10473_s2 + $0x370] sm:$0xf0]  ;;  %v6588_v17 = vld [vmem:[%s10473_s2 + $0x464] sm:$0xf]  ;;  %v5091_v19 = vor.u32 %v6624_v10, %v5088_v11  ;;  %v4691_v20 = vor.u32 %v6524_v12, %v4688_v14 }
  0x44   :  { %1319 = vmatmul.bf16.vlgmr.msrb.gmra.mxu0 %v7604_v34  ;;  %1332 = vmatmul.bf16.vlgmr.msrb.gmra.mxu1 %v7615_v39  ;;  %v4944_v18 = vld [vmem:[%s10473_s2 + $0x470] sm:$0xf0]  ;;  %v4819_v21 = vor.u32 %v6556_v15, %v4816_v16  ;;  %v6620_v22 = vld [vmem:[%s10473_s2 + $0x564] sm:$0xf] }
  0x45   :  { %1376 = vmatpush.bf16.msra.mxu0 %v4755_v28  ;;  %1389 = vmatpush.bf16.msra.mxu1 %v4883_v29  ;;  %v5072_v23 = vld [vmem:[%s10473_s2 + $0x570] sm:$0xf0]  ;;  %v6520_v24 = vld [vmem:[%s10473_s2 + $0x244] sm:$0xf]  ;;  %v4947_v25 = vor.u32 %v6588_v17, %v4944_v18 }
  0x46   :  { %1358 = vmatmul.bf16.vlgmr.msrb.gmra.mxu3 %v7407_v57  ;;  %v4672_v26 = vld [vmem:[%s10473_s2 + $0x250] sm:$0xf0]  ;;  %v6552_v27 = vld [vmem:[%s10473_s2 + $0x344] sm:$0xf]  ;;  %v5075_v31 = vor.u32 %v6620_v22, %v5072_v23 }
  0x47   :  { %1402 = vmatpush.bf16.msra.mxu3 %v5011_v33  ;;  %1370 = vmatpush.bf16.msra.mxu2 %v4515_v38  ;;  %v4800_v28 = vld [vmem:[%s10473_s2 + $0x350] sm:$0xf0]  ;;  %v6584_v29 = vld [vmem:[%s10473_s2 + $0x444] sm:$0xf]  ;;  %v4675_v33 = vor.u32 %v6520_v24, %v4672_v26 }
  0x48   :  { %v4928_v30 = vld [vmem:[%s10473_s2 + $0x450] sm:$0xf0]  ;;  %v6616_v32 = vld [vmem:[%s10473_s2 + $0x544] sm:$0xf]  ;;  %v4803_v35 = vor.u32 %v6552_v27, %v4800_v28 }
  0x49   :  { %1377 = vmatpush.bf16.msra.mxu0 %v4739_v43  ;;  %1390 = vmatpush.bf16.msra.mxu1 %v4867_v44  ;;  %v5056_v36 = vld [vmem:[%s10473_s2 + $0x550] sm:$0xf0]  ;;  %v6516_v37 = vld [vmem:[%s10473_s2 + $0x224] sm:$0xf]  ;;  %v4931_v40 = vor.u32 %v6584_v29, %v4928_v30 }
  0x4a   :  { %1371 = vmatmul.bf16.vlgmr.msra.gmra.mxu2 %v7437_v9  ;;  %v4656_v38 = vld [vmem:[%s10473_s2 + $0x230] sm:$0xf0]  ;;  %v6548_v41 = vld [vmem:[%s10473_s2 + $0x324] sm:$0xf] }
  0x4b   :  { %1415 = vmatpush.bf16.msrb.mxu2 %v5139_v42  ;;  %1403 = vmatpush.bf16.msra.mxu3 %v4995_v49  ;;  %v4784_v42 = vld [vmem:[%s10473_s2 + $0x330] sm:$0xf0] }
  0x4d   :  { %1378 = vmatpush.bf16.msra.mxu0 %v4723_v58  ;;  %1391 = vmatpush.bf16.msra.mxu1 %v4851_v59 }
  0x4f   :  { %1416 = vmatpush.bf16.msrb.mxu2 %v5123_v56  ;;  %1404 = vmatpush.bf16.msra.mxu3 %v4979_v0 }
  0x51   :  { %1379 = vmatpush.bf16.msra.mxu0 %v4707_v7  ;;  %1392 = vmatpush.bf16.msra.mxu1 %v4835_v8 }
  0x53   :  { %1417 = vmatpush.bf16.msrb.mxu2 %v5107_v6  ;;  %1405 = vmatpush.bf16.msra.mxu3 %v4963_v13 }
  0x55   :  { %1380 = vmatpush.bf16.msra.mxu0 %v4691_v20  ;;  %1393 = vmatpush.bf16.msra.mxu1 %v4819_v21 }
  0x57   :  { %1418 = vmatpush.bf16.msrb.mxu2 %v5091_v19  ;;  %1406 = vmatpush.bf16.msra.mxu3 %v4947_v25 }
  0x58   :  { %19 = vsyncpa [#allocation5], 0  ;;  %v6580_v43 = vld [vmem:[%s10473_s2 + $0x424] sm:$0xf]  ;;  %v4912_v44 = vld [vmem:[%s10473_s2 + $0x430] sm:$0xf0]  ;;  %v5059_v45 = vor.u32 %v6616_v32, %v5056_v36  ;;  %v4659_v49 = vor.u32 %v6516_v37, %v4656_v38  ;;  %v4787_v50 = vor.u32 %v6548_v41, %v4784_v42 }
  0x59   :  { %v6612_v46 = vld [vmem:[%s10473_s2 + $0x524] sm:$0xf]  ;;  %v5040_v47 = vld [vmem:[%s10473_s2 + $0x530] sm:$0xf0]  ;;  %1381 = vmatpush.bf16.msra.mxu0 %v4675_v33  ;;  %1394 = vmatpush.bf16.msra.mxu1 %v4803_v35  ;;  %v4915_v55 = vor.u32 %v6580_v43, %v4912_v44  ;;  %v4502_v61 = vld [vmem:[%s10473_s2 + $0xe8] sm:$0xf] }
  0x5a   :  { %v6512_v51 = vld [vmem:[%s10473_s2 + $0x204] sm:$0xf]  ;;  %v4640_v52 = vld [vmem:[%s10473_s2 + $0x210] sm:$0xf0]  ;;  %v6479_v62 = vld [vmem:[%s10473_s2 + $0xf4] sm:$0xf0]  ;;  %v5043_v0 = vor.u32 %v6612_v46, %v5040_v47 }
  0x5b   :  { %1419 = vmatpush.bf16.msrb.mxu2 %v5075_v31  ;;  %v6544_v54 = vld [vmem:[%s10473_s2 + $0x304] sm:$0xf]  ;;  %1407 = vmatpush.bf16.msra.mxu3 %v4931_v40  ;;  %v4768_v56 = vld [vmem:[%s10473_s2 + $0x310] sm:$0xf0]  ;;  %v4758_v2 = vld [vmem:[%s10473_s2 + $0x2e8] sm:$0xf]  ;;  %v4643_v4 = vor.u32 %v6512_v51, %v4640_v52  ;;  %v4503_v10 = vor.u32 %v6479_v62, %v4502_v61 }
  0x5c   :  { %v6576_v58 = vld [vmem:[%s10473_s2 + $0x404] sm:$0xf]  ;;  %v4896_v59 = vld [vmem:[%s10473_s2 + $0x410] sm:$0xf0]  ;;  %v6543_v3 = vld [vmem:[%s10473_s2 + $0x2f4] sm:$0xf0]  ;;  %v4771_v5 = vor.u32 %v6544_v54, %v4768_v56 }
  0x5d   :  { %v6640_v63 = vld [vmem:[%s10473_s2 + $0x604] sm:$0xf]  ;;  %v5152_v1 = vld [vmem:[%s10473_s2 + $0x610] sm:$0xf0]  ;;  %1382 = vmatpush.bf16.msra.mxu0 %v4659_v49  ;;  %1395 = vmatpush.bf16.msra.mxu1 %v4787_v50  ;;  %v4899_v8 = vor.u32 %v6576_v58, %v4896_v59  ;;  %v4886_v11 = vld [vmem:[%s10473_s2 + $0x3e8] sm:$0xf]  ;;  %v4759_v16 = vor.u32 %v6543_v3, %v4758_v2 }
  0x5e   :  { %v6608_v6 = vld [vmem:[%s10473_s2 + $0x504] sm:$0xf]  ;;  %v5024_v7 = vld [vmem:[%s10473_s2 + $0x510] sm:$0xf0]  ;;  %v6575_v12 = vld [vmem:[%s10473_s2 + $0x3f4] sm:$0xf0]  ;;  %v5155_v13 = vor.u32 %v6640_v63, %v5152_v1 }
  0x5f   :  { %1420 = vmatpush.bf16.msrb.mxu2 %v5059_v45  ;;  %1408 = vmatpush.bf16.msra.mxu3 %v4915_v55  ;;  %v4630_v14 = vld [vmem:[%s10473_s2 + $0x1e8] sm:$0xf]  ;;  %v6511_v15 = vld [vmem:[%s10473_s2 + $0x1f4] sm:$0xf0]  ;;  %v5027_v17 = vor.u32 %v6608_v6, %v5024_v7  ;;  %v4887_v20 = vor.u32 %v6575_v12, %v4886_v11  ;;  %s4351_s27 = sshll.u32 %s10482_s11, 4  ;;  %s7092_s28 = smov [#allocation6]   ;;  %s4352_s27 = int_to_ptr.hbm [resolvable:$true] %s4351_s27 }
  0x60   :  { %v4486_v18 = vld [vmem:[%s10473_s2 + $0xc8] sm:$0xf]  ;;  %v6475_v19 = vld [vmem:[%s10473_s2 + $0xd4] sm:$0xf0]  ;;  %v4631_v23 = vor.u32 %v6511_v15, %v4630_v14  ;;  %s4360_s29 = sshll.u32 %s7092_s28, 4  ;;  %s7093_s11 = smov [#allocation2]   ;;  %s4361_s29 = int_to_ptr.vmem [resolvable:$true] %s4360_s29 }
  0x61   :  { %1383 = vmatpush.bf16.msra.mxu0 %v4643_v4  ;;  %1396 = vmatpush.bf16.msra.mxu1 %v4771_v5  ;;  %v4742_v21 = vld [vmem:[%s10473_s2 + $0x2c8] sm:$0xf]  ;;  %v6539_v22 = vld [vmem:[%s10473_s2 + $0x2d4] sm:$0xf0]  ;;  %v4487_v26 = vor.u32 %v6475_v19, %v4486_v18  ;;  %s4340_s15 = sshll.u32 %s10481_s10, 4  ;;  %vm4329_vm9 = vcmask 125952   ;;  %s4341_s15 = int_to_ptr.hbm [resolvable:$true] %s4340_s15 }
  0x62   :  { %v4870_v24 = vld [vmem:[%s10473_s2 + $0x3c8] sm:$0xf]  ;;  %v6571_v25 = vld [vmem:[%s10473_s2 + $0x3d4] sm:$0xf0]  ;;  %v4743_v29 = vor.u32 %v6539_v22, %v4742_v21 }
  0x63   :  { %1421 = vmatpush.bf16.msrb.mxu2 %v5043_v0  ;;  %1409 = vmatpush.bf16.msra.mxu3 %v4899_v8  ;;  %v4614_v27 = vld [vmem:[%s10473_s2 + $0x1c8] sm:$0xf]  ;;  %v6507_v28 = vld [vmem:[%s10473_s2 + $0x1d4] sm:$0xf0]  ;;  %v4871_v32 = vor.u32 %v6571_v25, %v4870_v24 }
  0x64   :  { %1384 = vmatmul.bf16.vlgmr.msra.gmra.mxu0 %v7396_v53  ;;  %v4470_v30 = vld [vmem:[%s10473_s2 + $0xa8] sm:$0xf]  ;;  %v6471_v31 = vld [vmem:[%s10473_s2 + $0xb4] sm:$0xf0]  ;;  %1397 = vmatmul.bf16.vlgmr.msra.gmra.mxu1 %v7409_v60  ;;  %v4615_v36 = vor.u32 %v6507_v28, %v4614_v27 }
  0x65   :  { %1441 = vmatpush.bf16.msrb.mxu1 %v4503_v10  ;;  %1467 = vmatpush.bf16.msrb.mxu0 %v4759_v16  ;;  %v4726_v33 = vld [vmem:[%s10473_s2 + $0x2a8] sm:$0xf]  ;;  %v6535_v35 = vld [vmem:[%s10473_s2 + $0x2b4] sm:$0xf0]  ;;  %v4471_v40 = vor.u32 %v6471_v31, %v4470_v30 }
  0x66   :  { %1410 = vmatmul.bf16.vlgmr.msra.gmra.mxu3 %v7604_v34  ;;  %v4854_v37 = vld [vmem:[%s10473_s2 + $0x3a8] sm:$0xf]  ;;  %v6567_v38 = vld [vmem:[%s10473_s2 + $0x3b4] sm:$0xf0]  ;;  %v4727_v43 = vor.u32 %v6535_v35, %v4726_v33 }
  0x67   :  { %1435 = vmatpush.bf16.msrb.mxu3 %v5155_v13  ;;  %1422 = vmatpush.bf16.msrb.mxu2 %v5027_v17  ;;  %v4598_v41 = vld [vmem:[%s10473_s2 + $0x1a8] sm:$0xf]  ;;  %v6503_v42 = vld [vmem:[%s10473_s2 + $0x1b4] sm:$0xf0]  ;;  %v4855_v46 = vor.u32 %v6567_v38, %v4854_v37 }
  0x68   :  { %v4454_v44 = vld [vmem:[%s10473_s2 + $0x88] sm:$0xf]  ;;  %v6467_v45 = vld [vmem:[%s10473_s2 + $0x94] sm:$0xf0]  ;;  %v4599_v50 = vor.u32 %v6503_v42, %v4598_v41 }
  0x69   :  { %1442 = vmatpush.bf16.msrb.mxu1 %v4487_v26  ;;  %1468 = vmatpush.bf16.msrb.mxu0 %v4743_v29  ;;  %v4710_v47 = vld [vmem:[%s10473_s2 + $0x288] sm:$0xf]  ;;  %v6531_v49 = vld [vmem:[%s10473_s2 + $0x294] sm:$0xf0]  ;;  %v4455_v54 = vor.u32 %v6467_v45, %v4454_v44 }
  0x6a   :  { %1423 = vmatmul.bf16.vlgmr.msrb.gmra.mxu2 %v7615_v39  ;;  %v4838_v51 = vld [vmem:[%s10473_s2 + $0x388] sm:$0xf]  ;;  %v6563_v52 = vld [vmem:[%s10473_s2 + $0x394] sm:$0xf0]  ;;  %v4711_v58 = vor.u32 %v6531_v49, %v4710_v47 }
  0x6b   :  { %1480 = vmatpush.bf16.msra.mxu2 %v4887_v20  ;;  %1454 = vmatpush.bf16.msra.mxu3 %v4631_v23  ;;  %v4582_v55 = vld [vmem:[%s10473_s2 + $0x188] sm:$0xf]  ;;  %v6499_v56 = vld [vmem:[%s10473_s2 + $0x194] sm:$0xf0]  ;;  %v4839_v62 = vor.u32 %v6563_v52, %v4838_v51  ;;  %v6477_v51 = vld [vmem:[%s10473_s2 + $0xec] sm:$0xf] }
  0x6c   :  { %v4438_v59 = vld [vmem:[%s10473_s2 + $0x68] sm:$0xf]  ;;  %v6463_v61 = vld [vmem:[%s10473_s2 + $0x74] sm:$0xf0]  ;;  %v4583_v1 = vor.u32 %v6499_v56, %v4582_v55  ;;  %v4504_v52 = vld [vmem:[%s10473_s2 + $0xf8] sm:$0xf0] }
  0x6d   :  { %1443 = vmatpush.bf16.msrb.mxu1 %v4471_v40  ;;  %1469 = vmatpush.bf16.msrb.mxu0 %v4727_v43  ;;  %v4694_v63 = vld [vmem:[%s10473_s2 + $0x268] sm:$0xf]  ;;  %v6527_v0 = vld [vmem:[%s10473_s2 + $0x274] sm:$0xf0]  ;;  %v4439_v4 = vor.u32 %v6463_v61, %v4438_v59 }
  0x6e   :  { %v4822_v2 = vld [vmem:[%s10473_s2 + $0x368] sm:$0xf]  ;;  %v6559_v3 = vld [vmem:[%s10473_s2 + $0x374] sm:$0xf0]  ;;  %v4695_v7 = vor.u32 %v6527_v0, %v4694_v63  ;;  %v6509_v0 = vld [vmem:[%s10473_s2 + $0x1ec] sm:$0xf] }
  0x6f   :  { %1481 = vmatpush.bf16.msra.mxu2 %v4871_v32  ;;  %1455 = vmatpush.bf16.msra.mxu3 %v4615_v36  ;;  %v4566_v5 = vld [vmem:[%s10473_s2 + $0x168] sm:$0xf]  ;;  %v6495_v6 = vld [vmem:[%s10473_s2 + $0x174] sm:$0xf0]  ;;  %v4823_v11 = vor.u32 %v6559_v3, %v4822_v2  ;;  %v4507_v3 = vor.u32 %v6477_v51, %v4504_v52 }
  0x70   :  { %v4422_v8 = vld [vmem:[%s10473_s2 + $0x48] sm:$0xf]  ;;  %v6459_v10 = vld [vmem:[%s10473_s2 + $0x54] sm:$0xf0]  ;;  %v4567_v14 = vor.u32 %v6495_v6, %v4566_v5  ;;  %v6473_v5 = vld [vmem:[%s10473_s2 + $0xcc] sm:$0xf] }
  0x71   :  { %1444 = vmatpush.bf16.msrb.mxu1 %v4455_v54  ;;  %1470 = vmatpush.bf16.msrb.mxu0 %v4711_v58  ;;  %v4678_v12 = vld [vmem:[%s10473_s2 + $0x248] sm:$0xf]  ;;  %v6523_v13 = vld [vmem:[%s10473_s2 + $0x254] sm:$0xf0]  ;;  %v4423_v17 = vor.u32 %v6459_v10, %v4422_v8  ;;  %v4488_v6 = vld [vmem:[%s10473_s2 + $0xd8] sm:$0xf0] }
  0x72   :  { %v4806_v15 = vld [vmem:[%s10473_s2 + $0x348] sm:$0xf]  ;;  %v6555_v16 = vld [vmem:[%s10473_s2 + $0x354] sm:$0xf0]  ;;  %v4679_v20 = vor.u32 %v6523_v13, %v4678_v12 }
  0x73   :  { %1482 = vmatpush.bf16.msra.mxu2 %v4855_v46  ;;  %1456 = vmatpush.bf16.msra.mxu3 %v4599_v50  ;;  %v4550_v18 = vld [vmem:[%s10473_s2 + $0x148] sm:$0xf]  ;;  %v6491_v19 = vld [vmem:[%s10473_s2 + $0x154] sm:$0xf0]  ;;  %v4807_v23 = vor.u32 %v6555_v16, %v4806_v15  ;;  %v4616_v15 = vld [vmem:[%s10473_s2 + $0x1d8] sm:$0xf0]  ;;  %v4491_v16 = vor.u32 %v6473_v5, %v4488_v6 }
  0x74   :  { %v4406_v21 = vld [vmem:[%s10473_s2 + $0x28] sm:$0xf]  ;;  %v6455_v22 = vld [vmem:[%s10473_s2 + $0x34] sm:$0xf0]  ;;  %v4551_v26 = vor.u32 %v6491_v19, %v4550_v18  ;;  %v6469_v18 = vld [vmem:[%s10473_s2 + $0xac] sm:$0xf] }
  0x75   :  { %1445 = vmatpush.bf16.msrb.mxu1 %v4439_v4  ;;  %1471 = vmatpush.bf16.msrb.mxu0 %v4695_v7  ;;  %v4662_v24 = vld [vmem:[%s10473_s2 + $0x228] sm:$0xf]  ;;  %v6519_v25 = vld [vmem:[%s10473_s2 + $0x234] sm:$0xf0]  ;;  %v4407_v29 = vor.u32 %v6455_v22, %v4406_v21  ;;  %v4472_v19 = vld [vmem:[%s10473_s2 + $0xb8] sm:$0xf0] }
  0x76   :  { %5165 = vmatmul.msk.bf16.vlgmr.msrb.gmra.mxu3 %vm1255_vm0, %v7516_v48  ;;  %v4790_v27 = vld [vmem:[%s10473_s2 + $0x328] sm:$0xf]  ;;  %v6551_v28 = vld [vmem:[%s10473_s2 + $0x334] sm:$0xf0]  ;;  %v4663_v33 = vor.u32 %v6519_v25, %v4662_v24  ;;  %v4552_v5 = vld [vmem:[%s10473_s2 + $0x158] sm:$0xf0] }
  0x77   :  { %1483 = vmatpush.bf16.msra.mxu2 %v4839_v62  ;;  %1457 = vmatpush.bf16.msra.mxu3 %v4583_v1  ;;  %v4534_v30 = vld [vmem:[%s10473_s2 + $0x128] sm:$0xf]  ;;  %v6487_v31 = vld [vmem:[%s10473_s2 + $0x134] sm:$0xf0]  ;;  %v4791_v38 = vor.u32 %v6551_v28, %v4790_v27  ;;  %v4632_v1 = vld [vmem:[%s10473_s2 + $0x1f8] sm:$0xf0]  ;;  %v4475_v28 = vor.u32 %v6469_v18, %v4472_v19 }
  0x78   :  { %v4390_v32 = vld [vmem:[%s10473_s2 + $0x8] sm:$0xf]  ;;  %v6451_v35 = vld [vmem:[%s10473_s2 + $0x14] sm:$0xf0]  ;;  %v4535_v44 = vor.u32 %v6487_v31, %v4534_v30  ;;  %v4635_v8 = vor.u32 %v6509_v0, %v4632_v1  ;;  %v4600_v27 = vld [vmem:[%s10473_s2 + $0x1b8] sm:$0xf0] }
  0x79   :  { %1446 = vmatpush.bf16.msrb.mxu1 %v4423_v17  ;;  %1472 = vmatpush.bf16.msrb.mxu0 %v4679_v20  ;;  %v5014_v36 = vld [vmem:[%s10473_s2 + $0x4e8] sm:$0xf]  ;;  %v6607_v37 = vld [vmem:[%s10473_s2 + $0x4f4] sm:$0xf0]  ;;  %v4391_v49 = vor.u32 %v6451_v35, %v4390_v32  ;;  %v6465_v30 = vld [vmem:[%s10473_s2 + $0x8c] sm:$0xf] }
  0x7a   :  { %v4518_v40 = vld [vmem:[%s10473_s2 + $0x108] sm:$0xf]  ;;  %v6515_v42 = vld [vmem:[%s10473_s2 + $0x214] sm:$0xf0]  ;;  %v5015_v54 = vor.u32 %v6607_v37, %v5014_v36  ;;  %v4456_v31 = vld [vmem:[%s10473_s2 + $0x98] sm:$0xf0] }
  0x7b   :  { %1484 = vmatpush.bf16.msra.mxu2 %v4823_v11  ;;  %1458 = vmatpush.bf16.msra.mxu3 %v4567_v14  ;;  %v4646_v41 = vld [vmem:[%s10473_s2 + $0x208] sm:$0xf]  ;;  %v6547_v45 = vld [vmem:[%s10473_s2 + $0x314] sm:$0xf0]  ;;  %v6505_v14 = vld [vmem:[%s10473_s2 + $0x1cc] sm:$0xf] }
  0x7c   :  { %v4774_v43 = vld [vmem:[%s10473_s2 + $0x308] sm:$0xf]  ;;  %v6643_v47 = vld [vmem:[%s10473_s2 + $0x614] sm:$0xf0]  ;;  %v4647_v55 = vor.u32 %v6515_v42, %v4646_v41  ;;  %v4619_v21 = vor.u32 %v6505_v14, %v4616_v15  ;;  %v4584_v41 = vld [vmem:[%s10473_s2 + $0x198] sm:$0xf0]  ;;  %v4459_v42 = vor.u32 %v6465_v30, %v4456_v31 }
  0x7d   :  { %v5158_v46 = vld [vmem:[%s10473_s2 + $0x608] sm:$0xf]  ;;  %1447 = vmatpush.bf16.msrb.mxu1 %v4407_v29  ;;  %v6483_v50 = vld [vmem:[%s10473_s2 + $0x114] sm:$0xf0]  ;;  %1473 = vmatpush.bf16.msrb.mxu0 %v4663_v33  ;;  %v4775_v61 = vor.u32 %v6547_v45, %v4774_v43  ;;  %v4440_v45 = vld [vmem:[%s10473_s2 + $0x78] sm:$0xf0] }
  0x7e   :  { %v5142_v56 = vld [vmem:[%s10473_s2 + $0x5e8] sm:$0xf]  ;;  %v6639_v58 = vld [vmem:[%s10473_s2 + $0x5f4] sm:$0xf0]  ;;  %v5159_v63 = vor.u32 %v6643_v47, %v5158_v46  ;;  %v4519_v2 = vor.u32 %v6483_v50, %v4518_v40  ;;  %v6497_v40 = vld [vmem:[%s10473_s2 + $0x18c] sm:$0xf] }
  0x7f   :  { %1485 = vmatpush.bf16.msra.mxu2 %v4807_v23  ;;  %1459 = vmatpush.bf16.msra.mxu3 %v4551_v26  ;;  %v4998_v59 = vld [vmem:[%s10473_s2 + $0x4c8] sm:$0xf]  ;;  %v6603_v62 = vld [vmem:[%s10473_s2 + $0x4d4] sm:$0xf0]  ;;  %v5143_v4 = vor.u32 %v6639_v58, %v5142_v56  ;;  %v6501_v26 = vld [vmem:[%s10473_s2 + $0x1ac] sm:$0xf]  ;;  %v4587_v47 = vor.u32 %v6497_v40, %v4584_v41 }
  0x80   :  { %v4999_v7 = vor.u32 %v6603_v62, %v4998_v59  ;;  %v5126_v10 = vld [vmem:[%s10473_s2 + $0x5c8] sm:$0xf]  ;;  %v6635_v11 = vld [vmem:[%s10473_s2 + $0x5d4] sm:$0xf0]  ;;  %v4603_v33 = vor.u32 %v6501_v26, %v4600_v27  ;;  %v6457_v59 = vld [vmem:[%s10473_s2 + $0x4c] sm:$0xf] }
  0x81   :  { %1448 = vmatpush.bf16.msrb.mxu1 %v4391_v49  ;;  %1474 = vmatpush.bf16.msrb.mxu0 %v4647_v55  ;;  %v4982_v12 = vld [vmem:[%s10473_s2 + $0x4a8] sm:$0xf]  ;;  %v6599_v13 = vld [vmem:[%s10473_s2 + $0x4b4] sm:$0xf0]  ;;  %v5127_v17 = vor.u32 %v6635_v11, %v5126_v10  ;;  %v4568_v55 = vld [vmem:[%s10473_s2 + $0x178] sm:$0xf0] }
  0x82   :  { %v4983_v20 = vor.u32 %v6599_v13, %v4982_v12  ;;  %v5110_v22 = vld [vmem:[%s10473_s2 + $0x5a8] sm:$0xf]  ;;  %v6631_v23 = vld [vmem:[%s10473_s2 + $0x5b4] sm:$0xf0]  ;;  %v4408_v10 = vld [vmem:[%s10473_s2 + $0x38] sm:$0xf0] }
  0x83   :  { %1486 = vmatpush.bf16.msra.mxu2 %v4791_v38  ;;  %1460 = vmatpush.bf16.msra.mxu3 %v4535_v44  ;;  %v4966_v24 = vld [vmem:[%s10473_s2 + $0x488] sm:$0xf]  ;;  %v6595_v25 = vld [vmem:[%s10473_s2 + $0x494] sm:$0xf0]  ;;  %v5111_v29 = vor.u32 %v6631_v23, %v5110_v22  ;;  %v6461_v44 = vld [vmem:[%s10473_s2 + $0x6c] sm:$0xf] }
  0x84   :  { %1475 = vmatmul.bf16.vlgmr.msrb.gmra.mxu0 %v7396_v53  ;;  %1449 = vmatmul.bf16.vlgmr.msrb.gmra.mxu1 %v7407_v57  ;;  %v4967_v32 = vor.u32 %v6595_v25, %v4966_v24  ;;  %v5094_v35 = vld [vmem:[%s10473_s2 + $0x588] sm:$0xf]  ;;  %v6627_v36 = vld [vmem:[%s10473_s2 + $0x594] sm:$0xf0]  ;;  %v4443_v56 = vor.u32 %v6461_v44, %v4440_v45  ;;  %v4536_v18 = vld [vmem:[%s10473_s2 + $0x138] sm:$0xf0] }
  0x85   :  { %1493 = vmatpush.bf16.msra.mxu1 %v5015_v54  ;;  %1526 = vmatpush.bf16.msra.mxu0 %v5159_v63  ;;  %v4950_v37 = vld [vmem:[%s10473_s2 + $0x468] sm:$0xf]  ;;  %v6591_v38 = vld [vmem:[%s10473_s2 + $0x474] sm:$0xf0]  ;;  %v5095_v43 = vor.u32 %v6627_v36, %v5094_v35  ;;  %v6493_v54 = vld [vmem:[%s10473_s2 + $0x16c] sm:$0xf] }
  0x86   :  { %v4951_v46 = vor.u32 %v6591_v38, %v4950_v37  ;;  %v5078_v49 = vld [vmem:[%s10473_s2 + $0x568] sm:$0xf]  ;;  %v6623_v50 = vld [vmem:[%s10473_s2 + $0x574] sm:$0xf0]  ;;  %v4571_v63 = vor.u32 %v6493_v54, %v4568_v55  ;;  %v6449_v24 = vld [vmem:[%s10473_s2 + $0xc] sm:$0xf] }
  0x87   :  { %1487 = vmatpush.bf16.msra.mxu2 %v4775_v61  ;;  %1461 = vmatpush.bf16.msra.mxu3 %v4519_v2  ;;  %v4934_v51 = vld [vmem:[%s10473_s2 + $0x448] sm:$0xf]  ;;  %v6587_v52 = vld [vmem:[%s10473_s2 + $0x454] sm:$0xf0]  ;;  %v5079_v58 = vor.u32 %v6623_v50, %v5078_v49  ;;  %v4424_v61 = vld [vmem:[%s10473_s2 + $0x58] sm:$0xf0] }
  0x88   :  { %v4935_v62 = vor.u32 %v6587_v52, %v4934_v51  ;;  %v5062_v0 = vld [vmem:[%s10473_s2 + $0x548] sm:$0xf]  ;;  %v6619_v1 = vld [vmem:[%s10473_s2 + $0x554] sm:$0xf0]  ;;  %v4427_v6 = vor.u32 %v6457_v59, %v4424_v61  ;;  %v4392_v25 = vld [vmem:[%s10473_s2 + $0x18] sm:$0xf0] }
  0x89   :  { %1494 = vmatpush.bf16.msra.mxu1 %v4999_v7  ;;  %1545 = vmatpush.bf16.msrb.mxu0 %v4635_v8  ;;  %v4918_v2 = vld [vmem:[%s10473_s2 + $0x428] sm:$0xf]  ;;  %v5063_v7 = vor.u32 %v6619_v1, %v5062_v0  ;;  %v6453_v8 = vld [vmem:[%s10473_s2 + $0x2c] sm:$0xf]  ;;  %v6615_v14 = vld [vmem:[%s10473_s2 + $0x534] sm:$0xf0]  ;;  %v4395_v36 = vor.u32 %v6449_v24, %v4392_v25 }
  0x8a   :  { %1462 = vmatmul.bf16.vlgmr.msra.gmra.mxu3 %v7437_v9  ;;  %1488 = vmatmul.bf16.vlgmr.msra.gmra.mxu2 %v7409_v60  ;;  %v5046_v13 = vld [vmem:[%s10473_s2 + $0x528] sm:$0xf]  ;;  %v4411_v19 = vor.u32 %v6453_v8, %v4408_v10  ;;  %v4888_v30 = vld [vmem:[%s10473_s2 + $0x3f8] sm:$0xf0]  ;;  %v6537_v35 = vld [vmem:[%s10473_s2 + $0x2cc] sm:$0xf] }
  0x8b   :  { %1532 = vmatpush.bf16.msrb.mxu2 %v4507_v3  ;;  %1506 = vmatpush.bf16.msrb.mxu3 %v5143_v4  ;;  %v6583_v3 = vld [vmem:[%s10473_s2 + $0x434] sm:$0xf0]  ;;  %v6489_v4 = vld [vmem:[%s10473_s2 + $0x14c] sm:$0xf]  ;;  %v4902_v15 = vld [vmem:[%s10473_s2 + $0x408] sm:$0xf]  ;;  %v5047_v22 = vor.u32 %v6615_v14, %v5046_v13 }
  0x8c   :  { %v4919_v11 = vor.u32 %v6583_v3, %v4918_v2  ;;  %v4555_v12 = vor.u32 %v6489_v4, %v4552_v5  ;;  %v5030_v23 = vld [vmem:[%s10473_s2 + $0x508] sm:$0xf]  ;;  %v4744_v37 = vld [vmem:[%s10473_s2 + $0x2d8] sm:$0xf0]  ;;  %v6481_v38 = vld [vmem:[%s10473_s2 + $0x10c] sm:$0xf] }
  0x8d   :  { %1495 = vmatpush.bf16.msra.mxu1 %v4983_v20  ;;  %1546 = vmatpush.bf16.msrb.mxu0 %v4619_v21  ;;  %v6541_v20 = vld [vmem:[%s10473_s2 + $0x2ec] sm:$0xf]  ;;  %v4760_v21 = vld [vmem:[%s10473_s2 + $0x2f8] sm:$0xf0] }
  0x8e   :  { %v4763_v31 = vor.u32 %v6541_v20, %v4760_v21  ;;  %v4520_v40 = vld [vmem:[%s10473_s2 + $0x118] sm:$0xf0]  ;;  %v6601_v51 = vld [vmem:[%s10473_s2 + $0x4cc] sm:$0xf] }
  0x8f   :  { %1533 = vmatpush.bf16.msrb.mxu2 %v4491_v16  ;;  %1507 = vmatpush.bf16.msrb.mxu3 %v5127_v17  ;;  %v6579_v16 = vld [vmem:[%s10473_s2 + $0x414] sm:$0xf0]  ;;  %v6485_v17 = vld [vmem:[%s10473_s2 + $0x12c] sm:$0xf]  ;;  %v4523_v49 = vor.u32 %v6481_v38, %v4520_v40  ;;  %v4872_v50 = vld [vmem:[%s10473_s2 + $0x3d8] sm:$0xf0] }
  0x90   :  { %v4903_v26 = vor.u32 %v6579_v16, %v4902_v15  ;;  %v4539_v27 = vor.u32 %v6485_v17, %v4536_v18  ;;  %v5000_v52 = vld [vmem:[%s10473_s2 + $0x4d8] sm:$0xf0]  ;;  %v6533_v55 = vld [vmem:[%s10473_s2 + $0x2ac] sm:$0xf] }
  0x91   :  { %1496 = vmatpush.bf16.msra.mxu1 %v4967_v32  ;;  %1547 = vmatpush.bf16.msrb.mxu0 %v4603_v33  ;;  %v6605_v32 = vld [vmem:[%s10473_s2 + $0x4ec] sm:$0xf]  ;;  %v5016_v33 = vld [vmem:[%s10473_s2 + $0x4f8] sm:$0xf0] }
  0x92   :  { %v5019_v45 = vor.u32 %v6605_v32, %v5016_v33  ;;  %v5128_v59 = vld [vmem:[%s10473_s2 + $0x5d8] sm:$0xf0]  ;;  %v6597_v2 = vld [vmem:[%s10473_s2 + $0x4ac] sm:$0xf] }
  0x93   :  { %1534 = vmatpush.bf16.msrb.mxu2 %v4475_v28  ;;  %1508 = vmatpush.bf16.msrb.mxu3 %v5111_v29  ;;  %v6611_v28 = vld [vmem:[%s10473_s2 + $0x514] sm:$0xf0]  ;;  %v6573_v29 = vld [vmem:[%s10473_s2 + $0x3ec] sm:$0xf]  ;;  %v4856_v1 = vld [vmem:[%s10473_s2 + $0x3b8] sm:$0xf0] }
  0x94   :  { %5166 = vmatmul.msk.bf16.vlgmr.msra.gmra.mxu0 %vm1255_vm0, %v7516_v48  ;;  %v5031_v41 = vor.u32 %v6611_v28, %v5030_v23  ;;  %v4891_v44 = vor.u32 %v6573_v29, %v4888_v30  ;;  %v4984_v3 = vld [vmem:[%s10473_s2 + $0x4b8] sm:$0xf0]  ;;  %v6529_v5 = vld [vmem:[%s10473_s2 + $0x28c] sm:$0xf] }
  0x95   :  { %1497 = vmatpush.bf16.msra.mxu1 %v4951_v46  ;;  %1548 = vmatpush.bf16.msrb.mxu0 %v4587_v47  ;;  %v6569_v46 = vld [vmem:[%s10473_s2 + $0x3cc] sm:$0xf]  ;;  %v4747_v47 = vor.u32 %v6537_v35, %v4744_v37  ;;  %v5112_v8 = vld [vmem:[%s10473_s2 + $0x5b8] sm:$0xf0]  ;;  %v8322_v35 = vld [vmem:[%s10474_s3] sm:$0xf] }
  0x96   :  { %v4875_v61 = vor.u32 %v6569_v46, %v4872_v50  ;;  %v6593_v14 = vld [vmem:[%s10473_s2 + $0x48c] sm:$0xf]  ;;  %v4968_v15 = vld [vmem:[%s10473_s2 + $0x498] sm:$0xf0] }
  0x97   :  { %1535 = vmatpush.bf16.msrb.mxu2 %v4459_v42  ;;  %1509 = vmatpush.bf16.msrb.mxu3 %v5095_v43  ;;  %v6637_v42 = vld [vmem:[%s10473_s2 + $0x5ec] sm:$0xf]  ;;  %v5144_v43 = vld [vmem:[%s10473_s2 + $0x5f8] sm:$0xf0] }
  0x98   :  { %v5147_v54 = vor.u32 %v6637_v42, %v5144_v43  ;;  %v6525_v17 = vld [vmem:[%s10473_s2 + $0x26c] sm:$0xf]  ;;  %v4696_v18 = vld [vmem:[%s10473_s2 + $0x278] sm:$0xf0] }
  0x99   :  { %1498 = vmatpush.bf16.msra.mxu1 %v4935_v62  ;;  %1549 = vmatpush.bf16.msrb.mxu0 %v4571_v63  ;;  %v5003_v62 = vor.u32 %v6601_v51, %v5000_v52  ;;  %v6565_v63 = vld [vmem:[%s10473_s2 + $0x3ac] sm:$0xf]  ;;  %v4699_v24 = vor.u32 %v6525_v17, %v4696_v18  ;;  %v4824_v25 = vld [vmem:[%s10473_s2 + $0x378] sm:$0xf0] }
  0x9a   :  { %v4859_v10 = vor.u32 %v6565_v63, %v4856_v1  ;;  %v6625_v20 = vld [vmem:[%s10473_s2 + $0x58c] sm:$0xf]  ;;  %v5080_v33 = vld [vmem:[%s10473_s2 + $0x578] sm:$0xf0] }
  0x9b   :  { %1536 = vmatpush.bf16.msrb.mxu2 %v4443_v56  ;;  %1510 = vmatpush.bf16.msrb.mxu3 %v5079_v58  ;;  %v4728_v56 = vld [vmem:[%s10473_s2 + $0x2b8] sm:$0xf0]  ;;  %v6633_v58 = vld [vmem:[%s10473_s2 + $0x5cc] sm:$0xf] }
  0x9c   :  { %v4731_v0 = vor.u32 %v6533_v55, %v4728_v56  ;;  %v5131_v4 = vor.u32 %v6633_v58, %v5128_v59  ;;  %v6557_v23 = vld [vmem:[%s10473_s2 + $0x36c] sm:$0xf]  ;;  %v4808_v43 = vld [vmem:[%s10473_s2 + $0x358] sm:$0xf0] }
  0x9d   :  { %1499 = vmatpush.bf16.msra.mxu1 %v4919_v11  ;;  %1550 = vmatpush.bf16.msrb.mxu0 %v4555_v12  ;;  %v4987_v11 = vor.u32 %v6597_v2, %v4984_v3  ;;  %v6561_v12 = vld [vmem:[%s10473_s2 + $0x38c] sm:$0xf]  ;;  %v4827_v37 = vor.u32 %v6557_v23, %v4824_v25  ;;  %v5064_v52 = vld [vmem:[%s10473_s2 + $0x558] sm:$0xf0] }
  0x9e   :  { %v6521_v30 = vld [vmem:[%s10473_s2 + $0x24c] sm:$0xf]  ;;  %v4920_v63 = vld [vmem:[%s10473_s2 + $0x438] sm:$0xf0] }
  0x9f   :  { %1537 = vmatpush.bf16.msrb.mxu2 %v4427_v6  ;;  %1511 = vmatpush.bf16.msrb.mxu3 %v5063_v7  ;;  %v4712_v6 = vld [vmem:[%s10473_s2 + $0x298] sm:$0xf0]  ;;  %v6629_v7 = vld [vmem:[%s10473_s2 + $0x5ac] sm:$0xf] }
  0xa0   :  { %v4715_v13 = vor.u32 %v6529_v5, %v4712_v6  ;;  %v5115_v16 = vor.u32 %v6629_v7, %v5112_v8  ;;  %v6621_v32 = vld [vmem:[%s10473_s2 + $0x56c] sm:$0xf]  ;;  %v4648_v2 = vld [vmem:[%s10473_s2 + $0x218] sm:$0xf0] }
  0xa1   :  { %1500 = vmatpush.bf16.msra.mxu1 %v4903_v26  ;;  %1551 = vmatpush.bf16.msrb.mxu0 %v4539_v27  ;;  %v6589_v26 = vld [vmem:[%s10473_s2 + $0x46c] sm:$0xf]  ;;  %v4952_v27 = vld [vmem:[%s10473_s2 + $0x478] sm:$0xf0]  ;;  %v5083_v46 = vor.u32 %v6621_v32, %v5080_v33  ;;  %v5210_v33 = vld [vmem:[%s10475_s4 + $0x50] sm:$0xf] }
  0xa2   :  { %v4955_v38 = vor.u32 %v6589_v26, %v4952_v27  ;;  %v6553_v40 = vld [vmem:[%s10473_s2 + $0x34c] sm:$0xf]  ;;  %v5048_v5 = vld [vmem:[%s10473_s2 + $0x538] sm:$0xf0] }
  0xa3   :  { %1538 = vmatpush.bf16.msrb.mxu2 %v4411_v19  ;;  %1512 = vmatpush.bf16.msrb.mxu3 %v5047_v22  ;;  %v4971_v22 = vor.u32 %v6593_v14, %v4968_v15  ;;  %v6617_v51 = vld [vmem:[%s10473_s2 + $0x54c] sm:$0xf]  ;;  %v4811_v55 = vor.u32 %v6553_v40, %v4808_v43  ;;  %v5160_v7 = vld [vmem:[%s10473_s2 + $0x618] sm:$0xf0]  ;;  %v6653_v40 = vld [vmem:[%s10475_s4 + $0x44] sm:$0xf0] }
  0xa4   :  { %1501 = vmatmul.bf16.vlgmr.msra.gmra.mxu1 %v7604_v34  ;;  %v6549_v58 = vld [vmem:[%s10473_s2 + $0x32c] sm:$0xf]  ;;  %v4904_v18 = vld [vmem:[%s10473_s2 + $0x418] sm:$0xf0] }
  0xa5   :  { %1558 = vmatpush.bf16.msrb.mxu1 %v4763_v31  ;;  %1552 = vmatpush.bf16.msrb.mxu0 %v4523_v49  ;;  %v8285_v19 = vpop.f32.mrf.mxu0  ;;  %v8305_v29 = vpop.f32.mrf.mxu1  ;;  %v4680_v31 = vld [vmem:[%s10473_s2 + $0x258] sm:$0xf0]  ;;  %v6513_v1 = vld [vmem:[%s10473_s2 + $0x20c] sm:$0xf] }
  0xa6   :  { %v4664_v49 = vld [vmem:[%s10473_s2 + $0x238] sm:$0xf0]  ;;  %v6613_v3 = vld [vmem:[%s10473_s2 + $0x52c] sm:$0xf] }
  0xa7   :  { %1539 = vmatpush.bf16.msrb.mxu2 %v4395_v36  ;;  %1513 = vmatpush.bf16.msrb.mxu3 %v5031_v41  ;;  %v4683_v41 = vor.u32 %v6521_v30, %v4680_v31  ;;  %v6641_v6 = vld [vmem:[%s10473_s2 + $0x60c] sm:$0xf]  ;;  %v5051_v17 = vor.u32 %v6613_v3, %v5048_v5  ;;  %v6657_v30 = vld [vmem:[%s10475_s4 + $0x64] sm:$0xf0] }
  0xa8   :  { %1553 = vmatmul.bf16.vlgmr.msrb.gmra.mxu0 %v7437_v9  ;;  %v5096_v9 = vld [vmem:[%s10473_s2 + $0x598] sm:$0xf0]  ;;  %v8324_v36 = vpop.f32.mrf.mxu2  ;;  %v6577_v14 = vld [vmem:[%s10473_s2 + $0x40c] sm:$0xf]  ;;  %v6673_v3 = vld [vmem:[%s10475_s4 + $0xe4] sm:$0xf0] }
  0xa9   :  { %1559 = vmatpush.bf16.msrb.mxu1 %v4747_v47  ;;  %1597 = vmatpush.bf16.msra.mxu0 %v5147_v54  ;;  %v5099_v28 = vor.u32 %v6625_v20, %v5096_v9  ;;  %v8329_v42 = vpop.f32.mrf.mxu3  ;;  %v6517_v47 = vld [vmem:[%s10473_s2 + $0x22c] sm:$0xf]  ;;  %v243_v54 = vperm.slane %v8322_v35, 0  ;;  %v5226_v20 = vld [vmem:[%s10475_s4 + $0x70] sm:$0xf] }
  0xaa   :  { %1514 = vmatmul.bf16.vlgmr.msrb.gmra.mxu3 %v7615_v39  ;;  %1540 = vmatmul.bf16.vlgmr.msrb.gmra.mxu2 %v7407_v57  ;;  %v4840_v57 = vld [vmem:[%s10473_s2 + $0x398] sm:$0xf0]  ;;  %v4667_v59 = vor.u32 %v6517_v47, %v4664_v49  ;;  %v6659_v9 = vld [vmem:[%s10475_s4 + $0x74] sm:$0xf0]  ;;  %v5186_v49 = vld [vmem:[%s10475_s4 + $0x20] sm:$0xf] }
  0xab   :  { %1571 = vmatpush.bf16.msra.mxu3 %v4891_v44  ;;  %1584 = vmatpush.bf16.msra.mxu2 %v5019_v45  ;;  %v4843_v21 = vor.u32 %v6561_v12, %v4840_v57  ;;  %v6585_v44 = vld [vmem:[%s10473_s2 + $0x44c] sm:$0xf]  ;;  %v4936_v45 = vld [vmem:[%s10473_s2 + $0x458] sm:$0xf0]  ;;  %v4651_v12 = vor.u32 %v6513_v1, %v4648_v2  ;;  %v5227_v25 = vor.u32 %v6659_v9, %v5226_v20  ;;  %v6669_v20 = vld [vmem:[%s10475_s4 + $0xc4] sm:$0xf0] }
  0xac   :  { %v4939_v56 = vor.u32 %v6585_v44, %v4936_v45  ;;  %v4776_v57 = vld [vmem:[%s10473_s2 + $0x318] sm:$0xf0] }
  0xad   :  { %1560 = vmatpush.bf16.msrb.mxu1 %v4731_v0  ;;  %1598 = vmatpush.bf16.msra.mxu0 %v5131_v4  ;;  %v1270_v50 = vpop.f32.mrf.mxu0  ;;  %v5067_v0 = vor.u32 %v6617_v51, %v5064_v52  ;;  %v1283_v4 = vpop.f32.mrf.mxu1  ;;  %v6649_v51 = vld [vmem:[%s10475_s4 + $0x24] sm:$0xf0]  ;;  %v5290_v52 = vld [vmem:[%s10475_s4 + $0xf0] sm:$0xf] }
  0xaf   :  { %1572 = vmatpush.bf16.msra.mxu3 %v4875_v61  ;;  %1585 = vmatpush.bf16.msra.mxu2 %v5003_v62  ;;  %v4792_v61 = vld [vmem:[%s10473_s2 + $0x338] sm:$0xf0]  ;;  %v6581_v62 = vld [vmem:[%s10473_s2 + $0x42c] sm:$0xf] }
  0xb0   :  { %v1296_v8 = vpop.f32.mrf.mxu2 }
  0xb1   :  { %1561 = vmatpush.bf16.msrb.mxu1 %v4715_v13  ;;  %1599 = vmatpush.bf16.msra.mxu0 %v5115_v16  ;;  %v6545_v13 = vld [vmem:[%s10473_s2 + $0x30c] sm:$0xf]  ;;  %v1309_v15 = vpop.f32.mrf.mxu3  ;;  %v1269_v16 = vadd.f32 %v8285_v19, %v243_v54  ;;  %v5032_v19 = vld [vmem:[%s10473_s2 + $0x518] sm:$0xf0]  ;;  %v5274_v8 = vld [vmem:[%s10475_s4 + $0xd0] sm:$0xf] }
  0xb2   :  { %v4779_v23 = vor.u32 %v6545_v13, %v4776_v57  ;;  %v5228_v13 = vld [vmem:[%s10475_s4 + $0x78] sm:$0xf0] }
  0xb3   :  { %1573 = vmatpush.bf16.msra.mxu3 %v4859_v10  ;;  %1586 = vmatpush.bf16.msra.mxu2 %v4987_v11  ;;  %v4795_v10 = vor.u32 %v6549_v58, %v4792_v61  ;;  %v4923_v11 = vor.u32 %v6581_v62, %v4920_v63  ;;  %v1282_v26 = vadd.f32 %v8305_v29, %v1269_v16  ;;  %v5178_v63 = vld [vmem:[%s10475_s4 + $0x10] sm:$0xf] }
  0xb4   :  { %v5187_v62 = vor.u32 %v6649_v51, %v5186_v49  ;;  %v244_v49 = vperm.slane %v8322_v35, 1  ;;  %v5196_v51 = vld [vmem:[%s10475_s4 + $0x38] sm:$0xf0] }
  0xb5   :  { %1562 = vmatpush.bf16.msrb.mxu1 %v4699_v24  ;;  %1600 = vmatpush.bf16.msra.mxu0 %v5099_v28  ;;  %v4907_v24 = vor.u32 %v6577_v14, %v4904_v18  ;;  %v5218_v28 = vld [vmem:[%s10475_s4 + $0x60] sm:$0xf]  ;;  %v1295_v29 = vadd.f32 %v8324_v36, %v1282_v26  ;;  %v6667_v26 = vld [vmem:[%s10475_s4 + $0xb4] sm:$0xf0] }
  0xb6   :  { %v5219_v32 = vor.u32 %v6657_v30, %v5218_v28  ;;  %v5202_v36 = vld [vmem:[%s10475_s4 + $0x40] sm:$0xf]  ;;  %v5212_v28 = vld [vmem:[%s10475_s4 + $0x58] sm:$0xf0] }
  0xb7   :  { %1574 = vmatpush.bf16.msra.mxu3 %v4843_v21  ;;  %1587 = vmatpush.bf16.msra.mxu2 %v4971_v22  ;;  %v5163_v21 = vor.u32 %v6641_v6, %v5160_v7  ;;  %v6609_v22 = vld [vmem:[%s10473_s2 + $0x50c] sm:$0xf]  ;;  %v5170_v6 = vld [vmem:[%s10475_s4] sm:$0xf]  ;;  %v6645_v7 = vld [vmem:[%s10475_s4 + $0x4] sm:$0xf0] }
  0xb8   :  { %v5035_v27 = vor.u32 %v6609_v22, %v5032_v19  ;;  %v5171_v14 = vor.u32 %v6645_v7, %v5170_v6  ;;  %v5266_v18 = vld [vmem:[%s10475_s4 + $0xc0] sm:$0xf]  ;;  %v5220_v22 = vld [vmem:[%s10475_s4 + $0x68] sm:$0xf0]  ;;  %v6646_v7 = vld [vmem:[%s10475_s4 + $0x14] sm:$0xf] }
  0xb9   :  { %1563 = vmatpush.bf16.msrb.mxu1 %v4683_v41  ;;  %1601 = vmatpush.bf16.msra.mxu0 %v5083_v46  ;;  %v1346_v31 = vpop.f32.mrf.mxu2  ;;  %v5267_v19 = vor.u32 %v6669_v20, %v5266_v18  ;;  %v5276_v18 = vld [vmem:[%s10475_s4 + $0xd8] sm:$0xf0] }
  0xbb   :  { %1575 = vmatpush.bf16.msra.mxu3 %v4827_v37  ;;  %1588 = vmatpush.bf16.msra.mxu2 %v4955_v38  ;;  %v6655_v37 = vld [vmem:[%s10475_s4 + $0x54] sm:$0xf0]  ;;  %v1308_v38 = vadd.f32 %v8329_v42, %v1295_v29 }
  0xbc   :  { %v6651_v42 = vld [vmem:[%s10475_s4 + $0x34] sm:$0xf0] }
  0xbd   :  { %1564 = vmatpush.bf16.msrb.mxu1 %v4667_v59  ;;  %1602 = vmatpush.bf16.msra.mxu0 %v5067_v0  ;;  %v6647_v0 = vld [vmem:[%s10475_s4 + $0x14] sm:$0xf0] }
  0xbe   :  { %v5179_v5 = vor.u32 %v6647_v0, %v5178_v63  ;;  %v5188_v63 = vld [vmem:[%s10475_s4 + $0x28] sm:$0xf0] }
  0xbf   :  { %1576 = vmatpush.bf16.msra.mxu3 %v4811_v55  ;;  %1589 = vmatpush.bf16.msra.mxu2 %v4939_v56  ;;  %v6675_v56 = vld [vmem:[%s10475_s4 + $0xf4] sm:$0xf0] }
  0xc0   :  { %v5291_v61 = vor.u32 %v6675_v56, %v5290_v52 }
  0xc1   :  { %1565 = vmatpush.bf16.msrb.mxu1 %v4651_v12  ;;  %1603 = vmatpush.bf16.msra.mxu0 %v5051_v17  ;;  %v1320_v41 = vpop.f32.mrf.mxu0  ;;  %v1333_v44 = vpop.f32.mrf.mxu1  ;;  %v6658_v12 = vld [vmem:[%s10475_s4 + $0x74] sm:$0xf] }
  0xc2   :  { %v1321_v43 = vadd.f32 %v1320_v41, %v1308_v38  ;;  %v5231_v17 = vor.u32 %v6658_v12, %v5228_v13  ;;  %v6652_v38 = vld [vmem:[%s10475_s4 + $0x44] sm:$0xf]  ;;  %v5284_v13 = vld [vmem:[%s10475_s4 + $0xe8] sm:$0xf0] }
  0xc3   :  { %1577 = vmatpush.bf16.msra.mxu3 %v4795_v10  ;;  %1590 = vmatpush.bf16.msra.mxu2 %v4923_v11  ;;  %v6671_v10 = vld [vmem:[%s10475_s4 + $0xd4] sm:$0xf0]  ;;  %v6672_v12 = vld [vmem:[%s10475_s4 + $0xe4] sm:$0xf] }
  0xc4   :  { %1566 = vmatmul.bf16.vlgmr.msrb.gmra.mxu1 %v7396_v53  ;;  %v5211_v53 = vor.u32 %v6655_v37, %v5210_v33  ;;  %v1334_v45 = vadd.f32 %v1333_v44, %v1321_v43  ;;  %v5275_v57 = vor.u32 %v6671_v10, %v5274_v8  ;;  %v5250_v33 = vld [vmem:[%s10475_s4 + $0xa0] sm:$0xf]  ;;  %v6665_v37 = vld [vmem:[%s10475_s4 + $0xa4] sm:$0xf0]  ;;  %v5180_v10 = vld [vmem:[%s10475_s4 + $0x18] sm:$0xf0] }
  0xc5   :  { %1617 = vmatpush.bf16.msra.mxu1 %v5163_v21  ;;  %1604 = vmatpush.bf16.msra.mxu0 %v5035_v27  ;;  %v6656_v21 = vld [vmem:[%s10475_s4 + $0x64] sm:$0xf]  ;;  %v6654_v27 = vld [vmem:[%s10475_s4 + $0x54] sm:$0xf] }
  0xc6   :  { %v8439_v46 = vadd.f32 %v1346_v31, %v1334_v45  ;;  %v5215_v29 = vor.u32 %v6654_v27, %v5212_v28  ;;  %v6666_v28 = vld [vmem:[%s10475_s4 + $0xb4] sm:$0xf] }
  0xc7   :  { %1578 = vmatpush.bf16.msra.mxu3 %v4779_v23  ;;  %1591 = vmatpush.bf16.msra.mxu2 %v4907_v24  ;;  %v5223_v24 = vor.u32 %v6656_v21, %v5220_v22 }
  0xc8   :  { %1605 = vmatmul.bf16.vlgmr.msra.gmra.mxu0 %v7615_v39  ;;  %v5194_v39 = vld [vmem:[%s10475_s4 + $0x30] sm:$0xf]  ;;  %v1627_v50 = vand.u32 2147483647, %v8439_v46  ;;  %v1623_v44 = vmax.f32 %v8439_v46, 0.0 }
  0xc9   :  { %v5195_v47 = vor.u32 %v6651_v42, %v5194_v39  ;;  %v8451_v54 = vpop.f32.mrf.mxu3  ;;  %v1322_v55 = vpop.f32.mrf.mxu0  ;;  %2090 = vmatpush.bf16.msrb.mxu1 %v5291_v61  ;;  %v5242_v39 = vld [vmem:[%s10475_s4 + $0x90] sm:$0xf]  ;;  %v6663_v42 = vld [vmem:[%s10475_s4 + $0x94] sm:$0xf0]  ;;  %v6650_v46 = vld [vmem:[%s10475_s4 + $0x34] sm:$0xf] }
  0xca   :  { %1579 = vmatmul.bf16.vlgmr.msra.gmra.mxu3 %v7409_v60  ;;  %1592 = vmatmul.bf16.vlgmr.msra.gmra.mxu2 %v7604_v34  ;;  %v1348_v60 = vpop.f32.mrf.mxu2  ;;  %v5203_v34 = vor.u32 %v6653_v40, %v5202_v36  ;;  %v1631_v58 = vsub.f32 0.0, %v1627_v50  ;;  %v1335_v59 = vpop.f32.mrf.mxu1  ;;  %v5204_v36 = vld [vmem:[%s10475_s4 + $0x48] sm:$0xf0]  ;;  %v5251_v40 = vor.u32 %v6665_v37, %v5250_v33  ;;  %v5243_v52 = vor.u32 %v6663_v42, %v5242_v39  ;;  %v6661_v61 = vld [vmem:[%s10475_s4 + $0x84] sm:$0xf0] }
  0xcb   :  { %2077 = vmatpush.bf16.msrb.mxu3 %v5227_v25  ;;  %v5258_v25 = vld [vmem:[%s10475_s4 + $0xb0] sm:$0xf]  ;;  %v5207_v45 = vor.u32 %v6652_v38, %v5204_v36  ;;  %v5199_v56 = vor.u32 %v6650_v46, %v5196_v51  ;;  %v5234_v59 = vld [vmem:[%s10475_s4 + $0x80] sm:$0xf]  ;;  %v6691_v33 = vld [vmem:[%s10475_s4 + $0x174] sm:$0xf0] }
  0xcc   :  { %v1635_v2 = vmul.f32 1.442695, %v1631_v58  ;;  %v5259_v30 = vor.u32 %v6667_v26, %v5258_v25  ;;  %v6648_v58 = vld [vmem:[%s10475_s4 + $0x24] sm:$0xf]  ;;  %v5235_v0 = vor.u32 %v6661_v61, %v5234_v59  ;;  %v5268_v25 = vld [vmem:[%s10475_s4 + $0xc8] sm:$0xf0] }
  0xcd   :  { %v6664_v36 = vld [vmem:[%s10475_s4 + $0xa4] sm:$0xf]  ;;  %v5244_v39 = vld [vmem:[%s10475_s4 + $0x98] sm:$0xf0]  ;;  %v5338_v42 = vld [vmem:[%s10475_s4 + $0x150] sm:$0xf] }
  0xce   :  { %6967 = vpow2.f32 %v1635_v2  ;;  %v6674_v2 = vld [vmem:[%s10475_s4 + $0xf4] sm:$0xf]  ;;  %v5330_v61 = vld [vmem:[%s10475_s4 + $0x140] sm:$0xf] }
  0xcf   :  { %2078 = vmatpush.bf16.msrb.mxu3 %v5219_v32 }
  0xd1   :  { %v1361_v11 = vpop.f32.mrf.mxu3 }
  0xd2   :  { %v8464_v1 = vpop.f32.mrf.mxu2 }
  0xd3   :  { %2079 = vmatpush.bf16.msrb.mxu3 %v5211_v53 }
  0xd4   :  { %5167 = vmatmul.msk.bf16.vlgmr.msra.gmra.mxu1 %vm1255_vm0, %v7516_v48  ;;  %v5282_v48 = vld [vmem:[%s10475_s4 + $0xe0] sm:$0xf]  ;;  %v6968_v16 = vpop.eup %6967 }
  0xd5   :  { %v5283_v4 = vor.u32 %v6673_v3, %v5282_v48  ;;  %v1643_v9 = vadd.f32 1.0, %v6968_v16  ;;  %v1646_v23 = vmul.f32 -0.5, %v6968_v16  ;;  %v1649_v32 = vand.u32 2147483647, %v6968_v16  ;;  %v5292_v48 = vld [vmem:[%s10475_s4 + $0xf8] sm:$0xf0] }
  0xd7   :  { %2080 = vmatpush.bf16.msrb.mxu3 %v5203_v34  ;;  %2091 = vmatpush.bf16.msrb.mxu1 %v5283_v4  ;;  %6969 = vlog2.f32 %v1643_v9  ;;  %v1647_v31 = vadd.f32 1.0, %v1646_v23  ;;  %vm1650_vm1 = vcmp.lt.f32.partialorder %v1649_v32, 0.0004427343  ;;  %v5295_v4 = vor.u32 %v6674_v2, %v5292_v48 }
  0xd9   :  { %v1648_v43 = vmul.f32 %v6968_v16, %v1647_v31  ;;  %v5172_v16 = vld [vmem:[%s10475_s4 + $0x8] sm:$0xf0] }
  0xda   :  { %v1374_v15 = vpop.f32.mrf.mxu2 }
  0xdb   :  { %2081 = vmatpush.bf16.msrb.mxu3 %v5195_v47  ;;  %2092 = vmatpush.bf16.msrb.mxu1 %v5275_v57  ;;  %v5287_v57 = vor.u32 %v6672_v12, %v5284_v13  ;;  %v5183_v15 = vor.u32 %v6646_v7, %v5180_v10  ;;  %v6681_v12 = vld [vmem:[%s10475_s4 + $0x124] sm:$0xf0] }
  0xdd   :  { %v6970_v53 = vpop.eup %6969 }
  0xde   :  { %v1645_v41 = vmul.f32 0.6931472, %v6970_v53 }
  0xdf   :  { %2082 = vmatpush.bf16.msrb.mxu3 %v5187_v62  ;;  %2093 = vmatpush.bf16.msrb.mxu1 %v5267_v19  ;;  %v1360_v62 = vadd.f32 %v8451_v54, %v244_v49  ;;  %v5191_v54 = vor.u32 %v6648_v58, %v5188_v63  ;;  %v5236_v58 = vld [vmem:[%s10475_s4 + $0x88] sm:$0xf0] }
  0xe0   :  { %v1651_v34 = vsel %vm1650_vm1, %v1648_v43, %v1645_v41 }
  0xe1   :  { %v1385_v60 = vpop.f32.mrf.mxu0  ;;  %v1679_v47 = vadd.f32 %v1651_v34, %v1623_v44  ;;  %v1398_v50 = vpop.f32.mrf.mxu1  ;;  %v1373_v8 = vadd.f32 %v8464_v1, %v1360_v62  ;;  %v6644_v1 = vld [vmem:[%s10475_s4 + $0x4] sm:$0xf]  ;;  %v5346_v44 = vld [vmem:[%s10475_s4 + $0x160] sm:$0xf]  ;;  %v6685_v62 = vld [vmem:[%s10475_s4 + $0x144] sm:$0xf0] }
  0xe2   :  { %v5175_v22 = vor.u32 %v6644_v1, %v5172_v16  ;;  %v5331_v63 = vor.u32 %v6685_v62, %v5330_v61 }
  0xe3   :  { %2083 = vmatpush.bf16.msrb.mxu3 %v5179_v5  ;;  %2094 = vmatpush.bf16.msrb.mxu1 %v5259_v30  ;;  %v1683_v55 = vpack.c.bf16 %v1679_v47, %v1679_v47  ;;  %v5260_v30 = vld [vmem:[%s10475_s4 + $0xb8] sm:$0xf0] }
  0xe4   :  { %v5263_v32 = vor.u32 %v6666_v28, %v5260_v30 }
  0xe7   :  { %2084 = vmatpush.bf16.msrb.mxu3 %v5171_v14  ;;  %2095 = vmatpush.bf16.msrb.mxu1 %v5251_v40  ;;  %v1386_v14 = vadd.f32 %v1385_v60, %v1373_v8  ;;  %v5252_v40 = vld [vmem:[%s10475_s4 + $0xa8] sm:$0xf0]  ;;  %v6689_v60 = vld [vmem:[%s10475_s4 + $0x164] sm:$0xf0] }
  0xe8   :  { %v5255_v43 = vor.u32 %v6664_v36, %v5252_v40  ;;  %v5347_v34 = vor.u32 %v6689_v60, %v5346_v44  ;;  %v5418_v40 = vld [vmem:[%s10475_s4 + $0x1f0] sm:$0xf] }
  0xe9   :  { %v1411_v3 = vpop.f32.mrf.mxu3  ;;  %v1387_v5 = vpop.f32.mrf.mxu0  ;;  %v1399_v21 = vadd.f32 %v1398_v50, %v1386_v14  ;;  %v6687_v50 = vld [vmem:[%s10475_s4 + $0x154] sm:$0xf0] }
  0xea   :  { %2085 = vmatmul.bf16.vlgmr.msrb.gmra.mxu3 %v1683_v55  ;;  %v1400_v11 = vpop.f32.mrf.mxu1  ;;  %v5322_v5 = vld [vmem:[%s10475_s4 + $0x130] sm:$0xf] }
  0xeb   :  { %2129 = vmatpush.bf16.msra.mxu3 %v5231_v17  ;;  %2096 = vmatpush.bf16.msrb.mxu1 %v5243_v52  ;;  %v6670_v17 = vld [vmem:[%s10475_s4 + $0xd4] sm:$0xf]  ;;  %v1412_v23 = vadd.f32 %v1411_v3, %v1399_v21  ;;  %v5339_v52 = vor.u32 %v6687_v50, %v5338_v42  ;;  %v5314_v11 = vld [vmem:[%s10475_s4 + $0x120] sm:$0xf]  ;;  %v245_v21 = vperm.slane %v8322_v35, 2 }
  0xec   :  { %v5279_v9 = vor.u32 %v6670_v17, %v5276_v18  ;;  %v5306_v18 = vld [vmem:[%s10475_s4 + $0x110] sm:$0xf]  ;;  %v5410_v42 = vld [vmem:[%s10475_s4 + $0x1e0] sm:$0xf] }
  0xed   :  { %v1424_v6 = vpop.f32.mrf.mxu2 }
  0xee   :  { %v1425_v27 = vadd.f32 %v1424_v6, %v1412_v23  ;;  %v6683_v6 = vld [vmem:[%s10475_s4 + $0x134] sm:$0xf0] }
  0xef   :  { %2130 = vmatpush.bf16.msra.mxu3 %v5223_v24  ;;  %2097 = vmatpush.bf16.msrb.mxu1 %v5235_v0  ;;  %v6668_v24 = vld [vmem:[%s10475_s4 + $0xc4] sm:$0xf]  ;;  %v5323_v8 = vor.u32 %v6683_v6, %v5322_v5  ;;  %v5394_v5 = vld [vmem:[%s10475_s4 + $0x1c0] sm:$0xf]  ;;  %v6701_v6 = vld [vmem:[%s10475_s4 + $0x1c4] sm:$0xf0] }
  0xf0   :  { %v5271_v26 = vor.u32 %v6668_v24, %v5268_v25  ;;  %v5298_v25 = vld [vmem:[%s10475_s4 + $0x100] sm:$0xf] }
  0xf1   :  { %v1413_v20 = vpop.f32.mrf.mxu3 }
  0xf2   :  { %v6679_v20 = vld [vmem:[%s10475_s4 + $0x114] sm:$0xf0] }
  0xf3   :  { %2131 = vmatpush.bf16.msra.mxu3 %v5215_v29  ;;  %2142 = vmatpush.bf16.msra.mxu1 %v5295_v4  ;;  %v5354_v29 = vld [vmem:[%s10475_s4 + $0x170] sm:$0xf] }
  0xf4   :  { %v5355_v53 = vor.u32 %v6691_v33, %v5354_v29 }
  0xf5   :  { %v1426_v19 = vpop.f32.mrf.mxu2 }
  0xf6   :  { %2103 = vmatpush.bf16.msrb.mxu2 %v5355_v53  ;;  %v5307_v19 = vor.u32 %v6679_v20, %v5306_v18  ;;  %v6688_v53 = vld [vmem:[%s10475_s4 + $0x164] sm:$0xf]  ;;  %v6678_v20 = vld [vmem:[%s10475_s4 + $0x114] sm:$0xf] }
  0xf7   :  { %2132 = vmatpush.bf16.msra.mxu3 %v5207_v45  ;;  %2143 = vmatpush.bf16.msra.mxu1 %v5287_v57  ;;  %v6662_v45 = vld [vmem:[%s10475_s4 + $0x94] sm:$0xf]  ;;  %v5315_v57 = vor.u32 %v6681_v12, %v5314_v11  ;;  %v6680_v11 = vld [vmem:[%s10475_s4 + $0x124] sm:$0xf]  ;;  %v5316_v12 = vld [vmem:[%s10475_s4 + $0x128] sm:$0xf0] }
  0xf8   :  { %v5247_v49 = vor.u32 %v6662_v45, %v5244_v39  ;;  %v5340_v45 = vld [vmem:[%s10475_s4 + $0x158] sm:$0xf0] }
  0xf9   :  { %v1437_v31 = vpop.f32.mrf.mxu3 }
  0xfa   :  { %v8602_v37 = vadd.f32 %v1437_v31, %v1425_v27  ;;  %2104 = vmatpush.bf16.msrb.mxu2 %v5347_v34  ;;  %v6690_v31 = vld [vmem:[%s10475_s4 + $0x174] sm:$0xf] }
  0xfb   :  { %2133 = vmatpush.bf16.msra.mxu3 %v5199_v56  ;;  %2144 = vmatpush.bf16.msra.mxu1 %v5279_v9  ;;  %v6660_v56 = vld [vmem:[%s10475_s4 + $0x84] sm:$0xf]  ;;  %v6686_v34 = vld [vmem:[%s10475_s4 + $0x154] sm:$0xf] }
  0xfc   :  { %v1628_v38 = vand.u32 2147483647, %v8602_v37  ;;  %v5239_v59 = vor.u32 %v6660_v56, %v5236_v58  ;;  %v1624_v9 = vmax.f32 %v8602_v37, 0.0  ;;  %v5343_v39 = vor.u32 %v6686_v34, %v5340_v45  ;;  %v5402_v56 = vld [vmem:[%s10475_s4 + $0x1d0] sm:$0xf] }
  0xfd   :  { %v6703_v58 = vld [vmem:[%s10475_s4 + $0x1d4] sm:$0xf0]  ;;  %v5412_v34 = vld [vmem:[%s10475_s4 + $0x1e8] sm:$0xf0] }
  0xfe   :  { %v1632_v41 = vsub.f32 0.0, %v1628_v38  ;;  %2105 = vmatpush.bf16.msrb.mxu2 %v5339_v52  ;;  %v5348_v38 = vld [vmem:[%s10475_s4 + $0x168] sm:$0xf0]  ;;  %v5403_v62 = vor.u32 %v6703_v58, %v5402_v56 }
  0xff   :  { %2134 = vmatpush.bf16.msra.mxu3 %v5191_v54  ;;  %2145 = vmatpush.bf16.msra.mxu1 %v5271_v26  ;;  %v6677_v26 = vld [vmem:[%s10475_s4 + $0x104] sm:$0xf0]  ;;  %v5351_v36 = vor.u32 %v6688_v53, %v5348_v38  ;;  %v5332_v52 = vld [vmem:[%s10475_s4 + $0x148] sm:$0xf0]  ;;  %v6706_v38 = vld [vmem:[%s10475_s4 + $0x1f4] sm:$0xf] }
 0x100   :  { %v1637_v47 = vmul.f32 1.442695, %v1632_v41  ;;  %v5299_v30 = vor.u32 %v6677_v26, %v5298_v25  ;;  %v6707_v41 = vld [vmem:[%s10475_s4 + $0x1f4] sm:$0xf0]  ;;  %v5300_v25 = vld [vmem:[%s10475_s4 + $0x108] sm:$0xf0] }
 0x101   :  { %v1439_v46 = vpop.f32.mrf.mxu3  ;;  %v8629_v51 = vpop.f32.mrf.mxu0  ;;  %v5419_v44 = vor.u32 %v6707_v41, %v5418_v40  ;;  %v6693_v53 = vld [vmem:[%s10475_s4 + $0x184] sm:$0xf0] }
 0x102   :  { %6971 = vpow2.f32 %v1637_v47  ;;  %2106 = vmatpush.bf16.msrb.mxu2 %v5331_v63  ;;  %v6705_v47 = vld [vmem:[%s10475_s4 + $0x1e4] sm:$0xf0] }
 0x103   :  { %2135 = vmatpush.bf16.msra.mxu3 %v5183_v15  ;;  %2146 = vmatpush.bf16.msra.mxu1 %v5263_v32  ;;  %v5356_v32 = vld [vmem:[%s10475_s4 + $0x178] sm:$0xf0] }
 0x104   :  { %v5359_v29 = vor.u32 %v6690_v31, %v5356_v32  ;;  %2116 = vmatpush.bf16.msrb.mxu0 %v5419_v44  ;;  %v246_v31 = vperm.slane %v8322_v35, 3  ;;  %v5420_v35 = vld [vmem:[%s10475_s4 + $0x1f8] sm:$0xf0] }
 0x106   :  { %2107 = vmatpush.bf16.msrb.mxu2 %v5323_v8 }
 0x107   :  { %2136 = vmatpush.bf16.msra.mxu3 %v5175_v22  ;;  %2147 = vmatpush.bf16.msra.mxu1 %v5255_v43 }
 0x108   :  { %v6972_v0 = vpop.eup %6971 }
 0x109   :  { %v1652_v2 = vadd.f32 1.0, %v6972_v0  ;;  %v1478_v3 = vpop.f32.mrf.mxu0  ;;  %v1655_v4 = vmul.f32 -0.5, %v6972_v0  ;;  %v1658_v13 = vand.u32 2147483647, %v6972_v0 }
 0x10a   :  { %2137 = vmatmul.bf16.vlgmr.msra.gmra.mxu3 %v1683_v55  ;;  %v1450_v55 = vpop.f32.mrf.mxu1  ;;  %2108 = vmatpush.bf16.msrb.mxu2 %v5315_v57  ;;  %v5324_v3 = vld [vmem:[%s10475_s4 + $0x138] sm:$0xf0]  ;;  %v6699_v57 = vld [vmem:[%s10475_s4 + $0x1b4] sm:$0xf0] }
 0x10b   :  { %2148 = vmatpush.bf16.msra.mxu1 %v5247_v49  ;;  %6973 = vlog2.f32 %v1652_v2  ;;  %v1656_v10 = vadd.f32 1.0, %v1655_v4  ;;  %vm1659_vm2 = vcmp.lt.f32.partialorder %v1658_v13, 0.0004427343  ;;  %v1451_v28 = vadd.f32 %v1450_v55, %v245_v21  ;;  %v5386_v13 = vld [vmem:[%s10475_s4 + $0x1b0] sm:$0xf] }
 0x10c   :  { %v5411_v49 = vor.u32 %v6705_v47, %v5410_v42 }
 0x10d   :  { %v1463_v48 = vpop.f32.mrf.mxu3  ;;  %v1489_v54 = vpop.f32.mrf.mxu2  ;;  %v1657_v17 = vmul.f32 %v6972_v0, %v1656_v10 }
 0x10e   :  { %2109 = vmatpush.bf16.msrb.mxu2 %v5307_v19  ;;  %v1464_v37 = vadd.f32 %v1463_v48, %v1451_v28  ;;  %2117 = vmatpush.bf16.msrb.mxu0 %v5411_v49  ;;  %v6682_v48 = vld [vmem:[%s10475_s4 + $0x134] sm:$0xf]  ;;  %v6697_v19 = vld [vmem:[%s10475_s4 + $0x1a4] sm:$0xf0]  ;;  %v6695_v28 = vld [vmem:[%s10475_s4 + $0x194] sm:$0xf0] }
 0x10f   :  { %2149 = vmatpush.bf16.msra.mxu1 %v5239_v59  ;;  %v5327_v4 = vor.u32 %v6682_v48, %v5324_v3  ;;  %v6700_v48 = vld [vmem:[%s10475_s4 + $0x1c4] sm:$0xf]  ;;  %v5396_v3 = vld [vmem:[%s10475_s4 + $0x1c8] sm:$0xf0] }
 0x110   :  { %v1477_v60 = vadd.f32 %v8629_v51, %v1464_v37  ;;  %v6684_v51 = vld [vmem:[%s10475_s4 + $0x144] sm:$0xf]  ;;  %v5362_v37 = vld [vmem:[%s10475_s4 + $0x180] sm:$0xf] }
 0x111   :  { %v6974_v14 = vpop.eup %6973  ;;  %v8655_v1 = vpop.f32.mrf.mxu0  ;;  %v5335_v55 = vor.u32 %v6684_v51, %v5332_v52  ;;  %v5363_v41 = vor.u32 %v6693_v53, %v5362_v37  ;;  %v6702_v52 = vld [vmem:[%s10475_s4 + $0x1d4] sm:$0xf] }
 0x112   :  { %v1452_v7 = vpop.f32.mrf.mxu1  ;;  %v1654_v16 = vmul.f32 0.6931472, %v6974_v14  ;;  %2110 = vmatpush.bf16.msrb.mxu2 %v5299_v30  ;;  %v1490_v50 = vadd.f32 %v1489_v54, %v1477_v60  ;;  %2118 = vmatpush.bf16.msrb.mxu0 %v5403_v62  ;;  %v6704_v60 = vld [vmem:[%s10475_s4 + $0x1e4] sm:$0xf] }
 0x113   :  { %v5395_v7 = vor.u32 %v6701_v6, %v5394_v5  ;;  %v5415_v42 = vor.u32 %v6704_v60, %v5412_v34  ;;  %v5399_v6 = vor.u32 %v6700_v48, %v5396_v3  ;;  %v6737_v48 = vld [vmem:[%s10477_s6 + $0xec] sm:$0xf]  ;;  %v5548_v3 = vld [vmem:[%s10477_s6 + $0xf8] sm:$0xf0] }
 0x114   :  { %v1660_v23 = vsel %vm1659_vm2, %v1657_v17, %v1654_v16 }
 0x115   :  { %v1465_v15 = vpop.f32.mrf.mxu3  ;;  %v1491_v22 = vpop.f32.mrf.mxu2  ;;  %v1680_v24 = vadd.f32 %v1660_v23, %v1624_v9  ;;  %v5308_v9 = vld [vmem:[%s10475_s4 + $0x118] sm:$0xf0] }
 0x116   :  { %2155 = vmatpush.bf16.msra.mxu2 %v5359_v29  ;;  %2119 = vmatpush.bf16.msrb.mxu0 %v5395_v7  ;;  %v5319_v15 = vor.u32 %v6680_v11, %v5316_v12  ;;  %v5311_v21 = vor.u32 %v6678_v20, %v5308_v9  ;;  %v5378_v22 = vld [vmem:[%s10475_s4 + $0x1a0] sm:$0xf]  ;;  %v5372_v20 = vld [vmem:[%s10475_s4 + $0x198] sm:$0xf0] }
 0x117   :  { %v1684_v27 = vpack.c.bf16 %v1680_v24, %v1680_v24  ;;  %v5379_v23 = vor.u32 %v6697_v19, %v5378_v22  ;;  %v6676_v24 = vld [vmem:[%s10475_s4 + $0x104] sm:$0xf] }
 0x118   :  { %v5303_v26 = vor.u32 %v6676_v24, %v5300_v25  ;;  %v5364_v24 = vld [vmem:[%s10475_s4 + $0x188] sm:$0xf0] }
 0x119   :  { %2098 = vmatmul.bf16.vlgmr.msrb.gmra.mxu1 %v1684_v27  ;;  %v1530_v33 = vpop.f32.mrf.mxu0 }
 0x11a   :  { %2156 = vmatpush.bf16.msra.mxu2 %v5351_v36 }
 0x11e   :  { %2157 = vmatpush.bf16.msra.mxu2 %v5343_v39 }
 0x121   :  { %v1502_v43 = vpop.f32.mrf.mxu1 }
 0x122   :  { %v1503_v59 = vadd.f32 %v1502_v43, %v1490_v50  ;;  %2158 = vmatpush.bf16.msra.mxu2 %v5335_v55  ;;  %v5423_v43 = vor.u32 %v6706_v38, %v5420_v35  ;;  %v5404_v55 = vld [vmem:[%s10475_s4 + $0x1d8] sm:$0xf0] }
 0x125   :  { %v8702_v46 = vpop.f32.mrf.mxu0 }
 0x126   :  { %2159 = vmatpush.bf16.msra.mxu2 %v5327_v4 }
 0x129   :  { %v1504_v61 = vpop.f32.mrf.mxu1  ;;  %2150 = vmatmul.bf16.vlgmr.msra.gmra.mxu1 %v1684_v27  ;;  %v5370_v27 = vld [vmem:[%s10475_s4 + $0x190] sm:$0xf] }
 0x12a   :  { %2160 = vmatpush.bf16.msra.mxu2 %v5319_v15  ;;  %v5371_v30 = vor.u32 %v6695_v28, %v5370_v27  ;;  %v6696_v15 = vld [vmem:[%s10475_s4 + $0x1a4] sm:$0xf] }
 0x12d   :  { %v1515_v63 = vpop.f32.mrf.mxu3  ;;  %v1541_v2 = vpop.f32.mrf.mxu2 }
 0x12e   :  { %v1516_v0 = vadd.f32 %v1515_v63, %v1503_v59  ;;  %v1556_v10 = vpop.f32.mrf.mxu0  ;;  %2161 = vmatpush.bf16.msra.mxu2 %v5311_v21  ;;  %v1542_v36 = vadd.f32 %v1541_v2, %v246_v31 }
 0x12f   :  { %v5388_v10 = vld [vmem:[%s10475_s4 + $0x1b8] sm:$0xf0] }
 0x130   :  { %v8729_v54 = vadd.f32 %v8655_v1, %v1516_v0  ;;  %v5387_v1 = vor.u32 %v6699_v57, %v5386_v13  ;;  %v1555_v39 = vadd.f32 %v8702_v46, %v1542_v36  ;;  %v5407_v46 = vor.u32 %v6702_v52, %v5404_v55  ;;  %v5538_v55 = vld [vmem:[%s10477_s6 + $0xe0] sm:$0xf] }
 0x132   :  { %v1629_v8 = vand.u32 2147483647, %v8729_v54  ;;  %2120 = vmatpush.bf16.msrb.mxu0 %v5387_v1  ;;  %2162 = vmatpush.bf16.msra.mxu2 %v5303_v26  ;;  %v1625_v56 = vmax.f32 %v8729_v54, 0.0  ;;  %v5380_v1 = vld [vmem:[%s10475_s4 + $0x1a8] sm:$0xf0] }
 0x134   :  { %v1633_v14 = vsub.f32 0.0, %v1629_v8  ;;  %v6698_v8 = vld [vmem:[%s10475_s4 + $0x1b4] sm:$0xf] }
 0x135   :  { %v1517_v16 = vpop.f32.mrf.mxu3  ;;  %v1543_v18 = vpop.f32.mrf.mxu2  ;;  %v5391_v12 = vor.u32 %v6698_v8, %v5388_v10  ;;  %v5524_v8 = vld [vmem:[%s10477_s6 + $0xd0] sm:$0xf0]  ;;  %v5530_v10 = vld [vmem:[%s10477_s6 + $0xc8] sm:$0xf] }
 0x136   :  { %v1639_v17 = vmul.f32 1.442695, %v1633_v14  ;;  %2121 = vmatpush.bf16.msrb.mxu0 %v5379_v23  ;;  %v6694_v18 = vld [vmem:[%s10475_s4 + $0x194] sm:$0xf]  ;;  %v6692_v23 = vld [vmem:[%s10475_s4 + $0x184] sm:$0xf] }
 0x137   :  { %v5375_v22 = vor.u32 %v6694_v18, %v5372_v20  ;;  %v5367_v25 = vor.u32 %v6692_v23, %v5364_v24  ;;  %v5508_v18 = vld [vmem:[%s10477_s6 + $0xb0] sm:$0xf0]  ;;  %s4362_s4 = sshll.u32 %s10483_s12, 4  ;;  %s4338_s12 = sshll.u32 %s7093_s11, 4  ;;  %s4363_s4 = int_to_ptr.hbm [resolvable:$true] %s4362_s4  ;;  %s4339_s12 = int_to_ptr.vmem [resolvable:$true] %s4338_s12 }
 0x138   :  { %6975 = vpow2.f32 %v1639_v17  ;;  %v5383_v17 = vor.u32 %v6696_v15, %v5380_v1  ;;  %v5506_v15 = vld [vmem:[%s10477_s6 + $0xa0] sm:$0xf] }
 0x13a   :  { %2122 = vmatpush.bf16.msrb.mxu0 %v5371_v30 }
 0x13e   :  { %v6976_v32 = vpop.eup %6975  ;;  %2123 = vmatpush.bf16.msrb.mxu0 %v5363_v41 }
 0x13f   :  { %v1661_v29 = vadd.f32 1.0, %v6976_v32  ;;  %v1664_v33 = vmul.f32 -0.5, %v6976_v32  ;;  %v1667_v45 = vand.u32 2147483647, %v6976_v32 }
 0x141   :  { %6977 = vlog2.f32 %v1661_v29  ;;  %v1567_v40 = vpop.f32.mrf.mxu1  ;;  %v1665_v44 = vadd.f32 1.0, %v1664_v33  ;;  %vm1668_vm3 = vcmp.lt.f32.partialorder %v1667_v45, 0.0004427343 }
 0x142   :  { %2168 = vmatpush.bf16.msra.mxu0 %v5423_v43  ;;  %v1568_v58 = vadd.f32 %v1567_v40, %v1555_v39 }
 0x143   :  { %v1666_v51 = vmul.f32 %v6976_v32, %v1665_v44  ;;  %v1751_v44 = vld [vmem:[%s10476_s5] sm:$0x3] }
 0x144   :  { %v1753_v60 = vperm.slane %v1751_v44, 0 }
 0x145   :  { %v1606_v47 = vpop.f32.mrf.mxu0 }
 0x146   :  { %2169 = vmatpush.bf16.msra.mxu0 %v5415_v42 }
 0x147   :  { %v6978_v49 = vpop.eup %6977 }
 0x148   :  { %v1663_v50 = vmul.f32 0.6931472, %v6978_v49 }
 0x149   :  { %v1569_v59 = vpop.f32.mrf.mxu1 }
 0x14a   :  { %v1669_v61 = vsel %vm1668_vm3, %v1666_v51, %v1663_v50  ;;  %2170 = vmatpush.bf16.msra.mxu0 %v5407_v46 }
 0x14b   :  { %v1681_v63 = vadd.f32 %v1669_v61, %v1625_v56  ;;  %v6738_v56 = vld [vmem:[%s10477_s6 + $0xec] sm:$0xf0]  ;;  %v5540_v61 = vld [vmem:[%s10477_s6 + $0xf0] sm:$0xf0] }
 0x14c   :  { %v5539_v46 = vor.u32 %v6738_v56, %v5538_v55  ;;  %v5458_v56 = vld [vmem:[%s10477_s6 + $0x40] sm:$0xf] }
 0x14d   :  { %v1580_v62 = vpop.f32.mrf.mxu3  ;;  %v1593_v2 = vpop.f32.mrf.mxu2  ;;  %v1685_v4 = vpack.c.bf16 %v1681_v63, %v1681_v63  ;;  %v6739_v63 = vld [vmem:[%s10477_s6 + $0xf4] sm:$0xf0] }
 0x14e   :  { %v1581_v0 = vadd.f32 %v1580_v62, %v1568_v58  ;;  %v1608_v54 = vpop.f32.mrf.mxu0  ;;  %2171 = vmatpush.bf16.msra.mxu0 %v5399_v6  ;;  %v6736_v58 = vld [vmem:[%s10477_s6 + $0xe4] sm:$0xf]  ;;  %v5546_v62 = vld [vmem:[%s10477_s6 + $0xe8] sm:$0xf]  ;;  %2390 = vmatpush.bf16.msrb.mxu3 %v5539_v46  ;;  %v6734_v6 = vld [vmem:[%s10477_s6 + $0xcc] sm:$0xf0] }
 0x14f   :  { %2111 = vmatmul.bf16.vlgmr.msrb.gmra.mxu2 %v1685_v4  ;;  %v6732_v54 = vld [vmem:[%s10477_s6 + $0xc4] sm:$0xf] }
 0x150   :  { %v1594_v5 = vadd.f32 %v1593_v2, %v1581_v0  ;;  %v5543_v0 = vor.u32 %v6736_v58, %v5540_v61  ;;  %v5547_v2 = vor.u32 %v6739_v63, %v5546_v62  ;;  %v6718_v58 = vld [vmem:[%s10477_s6 + $0x4c] sm:$0xf0]  ;;  %v6716_v46 = vld [vmem:[%s10477_s6 + $0x44] sm:$0xf]  ;;  %v5460_v62 = vld [vmem:[%s10477_s6 + $0x50] sm:$0xf0] }
 0x151   :  { %v1619_v11 = vpop.f32.mrf.mxu1  ;;  %v5459_v61 = vor.u32 %v6718_v58, %v5458_v56  ;;  %v5466_v63 = vld [vmem:[%s10477_s6 + $0x48] sm:$0xf]  ;;  %v6946_v56 = vld [vmem:[%s10479_s8 + $0x670] sm:$0xf0]  ;;  %v5722_v58 = vld [vmem:[%s10479_s8 + $0x150] sm:$0xf] }
 0x152   :  { %v1607_v7 = vadd.f32 %v1606_v47, %v1594_v5  ;;  %2172 = vmatpush.bf16.msra.mxu0 %v5391_v12  ;;  %v1754_v47 = vperm.slane %v1751_v44, 1  ;;  %2403 = vmatpush.bf16.msrb.mxu1 %v5543_v0  ;;  %v5522_v5 = vld [vmem:[%s10477_s6 + $0xc0] sm:$0xf]  ;;  %v5527_v12 = vor.u32 %v6732_v54, %v5524_v8  ;;  %v6719_v0 = vld [vmem:[%s10477_s6 + $0x54] sm:$0xf0] }
 0x153   :  { %2416 = vmatpush.bf16.msrb.mxu2 %v5547_v2  ;;  %v5463_v2 = vor.u32 %v6716_v46, %v5460_v62  ;;  %v6714_v54 = vld [vmem:[%s10477_s6 + $0x2c] sm:$0xf0]  ;;  %v5444_v8 = vld [vmem:[%s10477_s6 + $0x30] sm:$0xf0]  ;;  %v6785_v46 = vld [vmem:[%s10479_s8 + $0x168] sm:$0xf0] }
 0x154   :  { %v1620_v13 = vadd.f32 %v1619_v11, %v1607_v7  ;;  %v5523_v7 = vor.u32 %v6734_v6, %v5522_v5  ;;  %v6735_v11 = vld [vmem:[%s10477_s6 + $0xd4] sm:$0xf0]  ;;  %v5442_v5 = vld [vmem:[%s10477_s6 + $0x20] sm:$0xf]  ;;  %v6170_v62 = vld [vmem:[%s10479_s8 + $0x4d0] sm:$0xf] }
 0x155   :  { %v1582_v57 = vpop.f32.mrf.mxu3  ;;  %v1595_v14 = vpop.f32.mrf.mxu2 }
 0x156   :  { %v1630_v16 = vand.u32 2147483647, %v1620_v13  ;;  %2173 = vmatpush.bf16.msra.mxu0 %v5383_v17  ;;  %v1626_v37 = vmax.f32 %v1620_v13, 0.0  ;;  %v5531_v13 = vor.u32 %v6735_v11, %v5530_v10  ;;  %v6733_v57 = vld [vmem:[%s10477_s6 + $0xcc] sm:$0xf]  ;;  %2391 = vmatpush.bf16.msrb.mxu3 %v5523_v7  ;;  %v5443_v10 = vor.u32 %v6714_v54, %v5442_v5 }
 0x157   :  { %v5532_v14 = vld [vmem:[%s10477_s6 + $0xd8] sm:$0xf0]  ;;  %v6728_v17 = vld [vmem:[%s10477_s6 + $0xa4] sm:$0xf]  ;;  %2404 = vmatpush.bf16.msrb.mxu1 %v5527_v12  ;;  %v5450_v12 = vld [vmem:[%s10477_s6 + $0x28] sm:$0xf] }
 0x158   :  { %v1634_v9 = vsub.f32 0.0, %v1630_v16  ;;  %v5535_v1 = vor.u32 %v6733_v57, %v5532_v14  ;;  %v6730_v16 = vld [vmem:[%s10477_s6 + $0xac] sm:$0xf0]  ;;  %2417 = vmatpush.bf16.msrb.mxu2 %v5531_v13  ;;  %v6712_v7 = vld [vmem:[%s10477_s6 + $0x24] sm:$0xf] }
 0x159   :  { %v1621_v19 = vpop.f32.mrf.mxu1  ;;  %v5507_v20 = vor.u32 %v6730_v16, %v5506_v15  ;;  %v5447_v11 = vor.u32 %v6712_v7, %v5444_v8  ;;  %v6715_v13 = vld [vmem:[%s10477_s6 + $0x34] sm:$0xf0]  ;;  %v6713_v57 = vld [vmem:[%s10477_s6 + $0x2c] sm:$0xf]  ;;  %v5426_v16 = vld [vmem:[%s10477_s6] sm:$0xf] }
 0x15a   :  { %v1641_v21 = vmul.f32 1.442695, %v1634_v9  ;;  %2174 = vmatpush.bf16.msra.mxu0 %v5375_v22  ;;  %v5511_v9 = vor.u32 %v6728_v17, %v5508_v18  ;;  %v6731_v22 = vld [vmem:[%s10477_s6 + $0xb4] sm:$0xf0]  ;;  %v6729_v19 = vld [vmem:[%s10477_s6 + $0xac] sm:$0xf]  ;;  %v5451_v15 = vor.u32 %v6715_v13, %v5450_v12 }
 0x15b   :  { %2392 = vmatpush.bf16.msrb.mxu3 %v5507_v20  ;;  %v6710_v17 = vld [vmem:[%s10477_s6 + $0xc] sm:$0xf0]  ;;  %v6708_v20 = vld [vmem:[%s10477_s6 + $0x4] sm:$0xf]  ;;  %v5694_v5 = vld [vmem:[%s10479_s8 + $0x118] sm:$0xf] }
 0x15c   :  { %6979 = vpow2.f32 %v1641_v21  ;;  %v5514_v21 = vld [vmem:[%s10477_s6 + $0xa8] sm:$0xf]  ;;  %2405 = vmatpush.bf16.msrb.mxu1 %v5511_v9  ;;  %v5428_v9 = vld [vmem:[%s10477_s6 + $0x10] sm:$0xf0]  ;;  %v6142_v54 = vld [vmem:[%s10479_s8 + $0x498] sm:$0xf] }
 0x15d   :  { %v5515_v24 = vor.u32 %v6731_v22, %v5514_v21  ;;  %v5434_v21 = vld [vmem:[%s10477_s6 + $0x8] sm:$0xf]  ;;  %v5427_v22 = vor.u32 %v6710_v17, %v5426_v16  ;;  %v6338_v7 = vld [vmem:[%s10479_s8 + $0x620] sm:$0xf]  ;;  %v6939_v8 = vld [vmem:[%s10479_s8 + $0x638] sm:$0xf0] }
 0x15e   :  { %2175 = vmatpush.bf16.msra.mxu0 %v5367_v25  ;;  %v5516_v25 = vld [vmem:[%s10477_s6 + $0xb8] sm:$0xf0]  ;;  %v6114_v16 = vld [vmem:[%s10479_s8 + $0x460] sm:$0xf]  ;;  %v6339_v17 = vor.u32 %v6939_v8, %v6338_v7 }
 0x15f   :  { %2163 = vmatmul.bf16.vlgmr.msra.gmra.mxu2 %v1685_v4  ;;  %v5551_v4 = vor.u32 %v6737_v48, %v5548_v3  ;;  %v5467_v48 = vor.u32 %v6719_v0, %v5466_v63  ;;  %v6717_v3 = vld [vmem:[%s10477_s6 + $0x4c] sm:$0xf] }
 0x160   :  { %2418 = vmatpush.bf16.msrb.mxu2 %v5515_v24  ;;  %v5436_v24 = vld [vmem:[%s10477_s6 + $0x18] sm:$0xf0]  ;;  %v6897_v63 = vld [vmem:[%s10479_s8 + $0x4e8] sm:$0xf0] }
 0x162   :  { %v6980_v26 = vpop.eup %6979 }
 0x163   :  { %v1670_v27 = vadd.f32 1.0, %v6980_v26  ;;  %v1673_v28 = vmul.f32 -0.5, %v6980_v26  ;;  %v1676_v31 = vand.u32 2147483647, %v6980_v26 }
 0x165   :  { %6981 = vlog2.f32 %v1670_v27  ;;  %v1674_v30 = vadd.f32 1.0, %v1673_v28  ;;  %vm1677_vm4 = vcmp.lt.f32.partialorder %v1676_v31, 0.0004427343  ;;  %v5490_v27 = vld [vmem:[%s10477_s6 + $0x80] sm:$0xf] }
 0x166   :  { %v6726_v28 = vld [vmem:[%s10477_s6 + $0x8c] sm:$0xf0] }
 0x167   :  { %v1675_v33 = vmul.f32 %v6980_v26, %v1674_v30  ;;  %v5519_v26 = vor.u32 %v6729_v19, %v5516_v25  ;;  %v6724_v30 = vld [vmem:[%s10477_s6 + $0x84] sm:$0xf]  ;;  %v5491_v31 = vor.u32 %v6726_v28, %v5490_v27  ;;  %v6711_v19 = vld [vmem:[%s10477_s6 + $0x14] sm:$0xf0] }
 0x168   :  { %v5435_v27 = vor.u32 %v6711_v19, %v5434_v21  ;;  %v6932_v21 = vld [vmem:[%s10479_s8 + $0x600] sm:$0xf0] }
 0x169   :  { %2393 = vmatpush.bf16.msrb.mxu3 %v5491_v31 }
 0x16b   :  { %v6982_v32 = vpop.eup %6981 }
 0x16c   :  { %v1672_v29 = vmul.f32 0.6931472, %v6982_v32  ;;  %v5492_v32 = vld [vmem:[%s10477_s6 + $0x90] sm:$0xf0] }
 0x16d   :  { %v2086_v36 = vpop.f32.mrf.mxu3 }
 0x16e   :  { %v1678_v53 = vsel %vm1677_vm4, %v1675_v33, %v1672_v29  ;;  %v2087_v34 = vadd.f32 %v2086_v36, %v1753_v60  ;;  %v5498_v29 = vld [vmem:[%s10477_s6 + $0x88] sm:$0xf]  ;;  %v6727_v33 = vld [vmem:[%s10477_s6 + $0x94] sm:$0xf0] }
 0x16f   :  { %v1682_v38 = vadd.f32 %v1678_v53, %v1626_v37  ;;  %v5495_v37 = vor.u32 %v6724_v30, %v5492_v32  ;;  %v5499_v53 = vor.u32 %v6727_v33, %v5498_v29  ;;  %v5974_v32 = vld [vmem:[%s10479_s8 + $0x348] sm:$0xf]  ;;  %v6960_v33 = vld [vmem:[%s10479_s8 + $0x6e0] sm:$0xf0] }
 0x171   :  { %v1686_v35 = vpack.c.bf16 %v1682_v38, %v1682_v38  ;;  %v6725_v38 = vld [vmem:[%s10477_s6 + $0x8c] sm:$0xf]  ;;  %2406 = vmatpush.bf16.msrb.mxu1 %v5495_v37  ;;  %2419 = vmatpush.bf16.msrb.mxu2 %v5499_v53  ;;  %v5946_v37 = vld [vmem:[%s10479_s8 + $0x310] sm:$0xf] }
 0x172   :  { %v6841_v53 = vld [vmem:[%s10479_s8 + $0x328] sm:$0xf0] }
 0x173   :  { %2124 = vmatmul.bf16.vlgmr.msrb.gmra.mxu0 %v1686_v35 }
 0x174   :  { %2429 = vmatpush.bf16.msrb.mxu0 %v5551_v4  ;;  %v5468_v4 = vld [vmem:[%s10477_s6 + $0x58] sm:$0xf0] }
 0x175   :  { %v2088_v40 = vpop.f32.mrf.mxu3  ;;  %v5471_v6 = vor.u32 %v6717_v3, %v5468_v4  ;;  %v6827_v3 = vld [vmem:[%s10479_s8 + $0x2b8] sm:$0xf0] }
 0x176   :  { %v5474_v40 = vld [vmem:[%s10477_s6 + $0x60] sm:$0xf] }
 0x178   :  { %2430 = vmatpush.bf16.msrb.mxu0 %v5535_v1  ;;  %v5452_v1 = vld [vmem:[%s10477_s6 + $0x38] sm:$0xf0] }
 0x179   :  { %v5455_v18 = vor.u32 %v6713_v57, %v5452_v1  ;;  %v5666_v57 = vld [vmem:[%s10479_s8 + $0xe0] sm:$0xf]  ;;  %v6771_v1 = vld [vmem:[%s10479_s8 + $0xf8] sm:$0xf0] }
 0x17a   :  { %v5667_v19 = vor.u32 %v6771_v1, %v5666_v57  ;;  %v6862_v57 = vld [vmem:[%s10479_s8 + $0x3d0] sm:$0xf0]  ;;  %v5948_v1 = vld [vmem:[%s10479_s8 + $0x32c] sm:$0xf0] }
 0x17c   :  { %2431 = vmatpush.bf16.msrb.mxu0 %v5519_v26  ;;  %v5431_v26 = vor.u32 %v6708_v20, %v5428_v9  ;;  %v6820_v20 = vld [vmem:[%s10479_s8 + $0x280] sm:$0xf0]  ;;  %v6310_v9 = vld [vmem:[%s10479_s8 + $0x5e8] sm:$0xf] }
 0x183   :  { %2176 = vmatmul.bf16.vlgmr.msra.gmra.mxu0 %v1686_v35  ;;  %v5500_v35 = vld [vmem:[%s10477_s6 + $0x98] sm:$0xf0] }
 0x184   :  { %v5503_v36 = vor.u32 %v6725_v38, %v5500_v35  ;;  %v6394_v35 = vld [vmem:[%s10479_s8 + $0x690] sm:$0xf] }
 0x186   :  { %2432 = vmatpush.bf16.msrb.mxu0 %v5503_v36  ;;  %v6953_v36 = vld [vmem:[%s10479_s8 + $0x6a8] sm:$0xf0] }
 0x18d   :  { %v2138_v41 = vpop.f32.mrf.mxu3 }
 0x18e   :  { %v2139_v49 = vadd.f32 %v2138_v41, %v1754_v47  ;;  %v6722_v41 = vld [vmem:[%s10477_s6 + $0x6c] sm:$0xf0] }
 0x18f   :  { %v5475_v60 = vor.u32 %v6722_v41, %v5474_v40  ;;  %v5750_v40 = vld [vmem:[%s10479_s8 + $0x188] sm:$0xf] }
 0x191   :  { %2394 = vmatpush.bf16.msrb.mxu3 %v5475_v60  ;;  %v6792_v60 = vld [vmem:[%s10479_s8 + $0x1a0] sm:$0xf0] }
 0x195   :  { %v2140_v43 = vpop.f32.mrf.mxu3  ;;  %2395 = vmatpush.bf16.msrb.mxu3 %v5459_v61  ;;  %v5723_v61 = vor.u32 %v6785_v46, %v5722_v58  ;;  %v6058_v58 = vld [vmem:[%s10479_s8 + $0x3f0] sm:$0xf]  ;;  %v6869_v46 = vld [vmem:[%s10479_s8 + $0x408] sm:$0xf0] }
 0x196   :  { %v2099_v45 = vpop.f32.mrf.mxu1  ;;  %v6720_v43 = vld [vmem:[%s10477_s6 + $0x64] sm:$0xf] }
 0x197   :  { %v8828_v39 = vadd.f32 %v2099_v45, %v2087_v34  ;;  %v5476_v34 = vld [vmem:[%s10477_s6 + $0x70] sm:$0xf0]  ;;  %v5482_v45 = vld [vmem:[%s10477_s6 + $0x68] sm:$0xf] }
 0x198   :  { %v5479_v47 = vor.u32 %v6720_v43, %v5476_v34  ;;  %v5947_v43 = vor.u32 %v6841_v53, %v5946_v37  ;;  %v6198_v34 = vld [vmem:[%s10479_s8 + $0x508] sm:$0xf] }
 0x199   :  { %2396 = vmatpush.bf16.msrb.mxu3 %v5443_v10  ;;  %v6890_v10 = vld [vmem:[%s10479_s8 + $0x4b0] sm:$0xf0] }
 0x19a   :  { %2407 = vmatpush.bf16.msrb.mxu1 %v5479_v47  ;;  %v5751_v47 = vor.u32 %v6792_v60, %v5750_v40  ;;  %v6143_v13 = vor.u32 %v6890_v10, %v6142_v54  ;;  %v5806_v40 = vld [vmem:[%s10479_s8 + $0x1f8] sm:$0xf]  ;;  %v6918_v60 = vld [vmem:[%s10479_s8 + $0x590] sm:$0xf0]  ;;  %v6424_v54 = vld [vmem:[%s10479_s8 + $0x6e4] sm:$0xf0] }
 0x19b   :  { %v5582_v10 = vld [vmem:[%s10479_s8 + $0x38] sm:$0xf] }
 0x19d   :  { %2397 = vmatpush.bf16.msrb.mxu3 %v5427_v22 }
 0x19e   :  { %v2101_v42 = vpop.f32.mrf.mxu1  ;;  %2408 = vmatpush.bf16.msrb.mxu1 %v5463_v2  ;;  %v6171_v2 = vor.u32 %v6897_v63, %v6170_v62  ;;  %v5778_v62 = vld [vmem:[%s10479_s8 + $0x1c0] sm:$0xf]  ;;  %v6799_v63 = vld [vmem:[%s10479_s8 + $0x1d8] sm:$0xf0] }
 0x19f   :  { %v6723_v42 = vld [vmem:[%s10477_s6 + $0x74] sm:$0xf0] }
 0x1a1   :  { %3930 = vmatpush.bf16.msra.mxu3 %v5751_v47 }
 0x1a2   :  { %2409 = vmatpush.bf16.msrb.mxu1 %v5447_v11 }
 0x1a5   :  { %3931 = vmatpush.bf16.msra.mxu3 %v5723_v61  ;;  %v6059_v61 = vor.u32 %v6869_v46, %v6058_v58  ;;  %v6817_v58 = vld [vmem:[%s10479_s8 + $0x26c] sm:$0xf] }
 0x1a6   :  { %v2151_v50 = vpop.f32.mrf.mxu1  ;;  %2410 = vmatpush.bf16.msrb.mxu1 %v5431_v26  ;;  %v6764_v26 = vld [vmem:[%s10479_s8 + $0xc0] sm:$0xf0]  ;;  %v6929_v46 = vld [vmem:[%s10479_s8 + $0x5ec] sm:$0xf] }
 0x1a7   :  { %v8830_v51 = vadd.f32 %v2151_v50, %v2139_v49  ;;  %v5483_v49 = vor.u32 %v6723_v42, %v5482_v45  ;;  %v6721_v50 = vld [vmem:[%s10477_s6 + $0x6c] sm:$0xf]  ;;  %v6904_v45 = vld [vmem:[%s10479_s8 + $0x520] sm:$0xf0]  ;;  %v6395_v42 = vor.u32 %v6953_v36, %v6394_v35 }
 0x1a9   :  { %2420 = vmatpush.bf16.msrb.mxu2 %v5483_v49  ;;  %v6199_v49 = vor.u32 %v6904_v45, %v6198_v34  ;;  %v2184_v34 = vld [vmem:[%s10472_s1] sm:$0xff] }
 0x1ad   :  { %2421 = vmatpush.bf16.msrb.mxu2 %v5467_v48  ;;  %v5890_v48 = vld [vmem:[%s10479_s8 + $0x2a0] sm:$0xf] }
 0x1ae   :  { %v2153_v52 = vpop.f32.mrf.mxu1 }
 0x1af   :  { %v5484_v52 = vld [vmem:[%s10477_s6 + $0x78] sm:$0xf0] }
 0x1b0   :  { %v5487_v55 = vor.u32 %v6721_v50, %v5484_v52  ;;  %v5918_v50 = vld [vmem:[%s10479_s8 + $0x2d8] sm:$0xf]  ;;  %v6834_v52 = vld [vmem:[%s10479_s8 + $0x2f0] sm:$0xf0] }
 0x1b1   :  { %2422 = vmatpush.bf16.msrb.mxu2 %v5451_v15  ;;  %v5919_v0 = vor.u32 %v6834_v52, %v5918_v50  ;;  %v5891_v15 = vor.u32 %v6827_v3, %v5890_v48  ;;  %v6911_v48 = vld [vmem:[%s10479_s8 + $0x558] sm:$0xf0]  ;;  %v6845_v3 = vld [vmem:[%s10479_s8 + $0x34c] sm:$0xf] }
 0x1b2   :  { %2433 = vmatpush.bf16.msrb.mxu0 %v5487_v55  ;;  %v6366_v55 = vld [vmem:[%s10479_s8 + $0x658] sm:$0xf] }
 0x1b3   :  { %v6367_v4 = vor.u32 %v6946_v56, %v6366_v55  ;;  %v5610_v55 = vld [vmem:[%s10479_s8 + $0x70] sm:$0xf]  ;;  %v6757_v56 = vld [vmem:[%s10479_s8 + $0x88] sm:$0xf0] }
 0x1b5   :  { %2423 = vmatpush.bf16.msrb.mxu2 %v5435_v27  ;;  %v6086_v27 = vld [vmem:[%s10479_s8 + $0x428] sm:$0xf] }
 0x1b6   :  { %2434 = vmatpush.bf16.msrb.mxu0 %v5471_v6  ;;  %v6778_v6 = vld [vmem:[%s10479_s8 + $0x130] sm:$0xf0] }
 0x1b7   :  { %v5695_v12 = vor.u32 %v6778_v6, %v5694_v5  ;;  %v5976_v5 = vld [vmem:[%s10479_s8 + $0x364] sm:$0xf0]  ;;  %v6957_v6 = vld [vmem:[%s10479_s8 + $0x6cc] sm:$0xf] }
 0x1b8   :  { %v5979_v7 = vor.u32 %v6845_v3, %v5976_v5  ;;  %v6427_v8 = vor.u32 %v6957_v6, %v6424_v54  ;;  %v6810_v6 = vld [vmem:[%s10479_s8 + $0x234] sm:$0xf]  ;;  %v5836_v54 = vld [vmem:[%s10479_s8 + $0x24c] sm:$0xf0] }
 0x1b9   :  { %3956 = vmatpush.bf16.msra.mxu2 %v6199_v49  ;;  %3932 = vmatpush.bf16.msra.mxu3 %v5695_v12  ;;  %v6030_v12 = vld [vmem:[%s10479_s8 + $0x3b8] sm:$0xf] }
 0x1ba   :  { %2435 = vmatpush.bf16.msrb.mxu0 %v5455_v18  ;;  %v5862_v18 = vld [vmem:[%s10479_s8 + $0x268] sm:$0xf] }
 0x1bd   :  { %3957 = vmatpush.bf16.msra.mxu2 %v6171_v2  ;;  %3933 = vmatpush.bf16.msra.mxu3 %v5667_v19  ;;  %v6226_v2 = vld [vmem:[%s10479_s8 + $0x540] sm:$0xf] }
 0x1c1   :  { %3958 = vmatpush.bf16.msra.mxu2 %v6143_v13 }
 0x1d2   :  { %v8841_v59 = vpop.f32.mrf.mxu2 }
 0x1d3   :  { %v2113_v25 = vadd.f32 %v8841_v59, %v8828_v39  ;;  %v6848_v39 = vld [vmem:[%s10479_s8 + $0x360] sm:$0xf0]  ;;  %v6422_v59 = vld [vmem:[%s10479_s8 + $0x6c8] sm:$0xf] }
 0x1d4   :  { %v5975_v29 = vor.u32 %v6848_v39, %v5974_v32  ;;  %v6423_v38 = vor.u32 %v6960_v33, %v6422_v59  ;;  %v6311_v32 = vor.u32 %v6932_v21, %v6310_v9  ;;  %v5834_v39 = vld [vmem:[%s10479_s8 + $0x230] sm:$0xf]  ;;  %v6813_v59 = vld [vmem:[%s10479_s8 + $0x248] sm:$0xf0]  ;;  %v6002_v9 = vld [vmem:[%s10479_s8 + $0x380] sm:$0xf] }
 0x1d5   :  { %v6925_v33 = vld [vmem:[%s10479_s8 + $0x5c8] sm:$0xf0]  ;;  %v5835_v35 = vor.u32 %v6813_v59, %v5834_v39  ;;  %v6855_v21 = vld [vmem:[%s10479_s8 + $0x398] sm:$0xf0] }
 0x1d6   :  { %3943 = vmatpush.bf16.msra.mxu1 %v5975_v29  ;;  %v6282_v29 = vld [vmem:[%s10479_s8 + $0x5b0] sm:$0xf]  ;;  %v6003_v19 = vor.u32 %v6855_v21, %v6002_v9  ;;  %v6943_v59 = vld [vmem:[%s10479_s8 + $0x65c] sm:$0xf]  ;;  %v6754_v21 = vld [vmem:[%s10479_s8 + $0x74] sm:$0xf] }
 0x1d7   :  { %v6283_v36 = vor.u32 %v6925_v33, %v6282_v29  ;;  %v6368_v29 = vld [vmem:[%s10479_s8 + $0x674] sm:$0xf0] }
 0x1d8   :  { %v6371_v33 = vor.u32 %v6943_v59, %v6368_v29  ;;  %v6228_v59 = vld [vmem:[%s10479_s8 + $0x55c] sm:$0xf0] }
 0x1da   :  { %v2114_v23 = vpop.f32.mrf.mxu2  ;;  %3944 = vmatpush.bf16.msra.mxu1 %v5947_v43  ;;  %v6254_v43 = vld [vmem:[%s10479_s8 + $0x578] sm:$0xf] }
 0x1db   :  { %v6709_v23 = vld [vmem:[%s10477_s6 + $0xc] sm:$0xf]  ;;  %v6255_v47 = vor.u32 %v6918_v60, %v6254_v43  ;;  %v5892_v43 = vld [vmem:[%s10479_s8 + $0x2bc] sm:$0xf0]  ;;  %v6936_v60 = vld [vmem:[%s10479_s8 + $0x624] sm:$0xf] }
 0x1dc   :  { %v5439_v30 = vor.u32 %v6709_v23, %v5436_v24  ;;  %v5638_v24 = vld [vmem:[%s10479_s8 + $0xa8] sm:$0xf] }
 0x1dd   :  { %v5639_v37 = vor.u32 %v6764_v26, %v5638_v24  ;;  %v5752_v24 = vld [vmem:[%s10479_s8 + $0x1a4] sm:$0xf0] }
 0x1de   :  { %2436 = vmatpush.bf16.msrb.mxu0 %v5439_v30  ;;  %3945 = vmatpush.bf16.msra.mxu1 %v5919_v0  ;;  %v5779_v0 = vor.u32 %v6799_v63, %v5778_v62  ;;  %v6312_v62 = vld [vmem:[%s10479_s8 + $0x604] sm:$0xf0] }
 0x1df   :  { %3934 = vmatpush.bf16.msra.mxu3 %v5639_v37  ;;  %v6782_v37 = vld [vmem:[%s10479_s8 + $0x154] sm:$0xf]  ;;  %v6315_v63 = vor.u32 %v6929_v46, %v6312_v62  ;;  %v6852_v62 = vld [vmem:[%s10479_s8 + $0x384] sm:$0xf] }
 0x1e2   :  { %v8939_v44 = vpop.f32.mrf.mxu2  ;;  %3969 = vmatpush.bf16.msra.mxu0 %v6423_v38  ;;  %3946 = vmatpush.bf16.msra.mxu1 %v5891_v15  ;;  %v6838_v15 = vld [vmem:[%s10479_s8 + $0x314] sm:$0xf] }
 0x1e3   :  { %v2165_v11 = vadd.f32 %v8939_v44, %v8830_v51  ;;  %v6883_v51 = vld [vmem:[%s10479_s8 + $0x478] sm:$0xf0] }
 0x1e4   :  { %v6115_v23 = vor.u32 %v6883_v51, %v6114_v16  ;;  %v6950_v16 = vld [vmem:[%s10479_s8 + $0x694] sm:$0xf]  ;;  %v5951_v51 = vor.u32 %v6838_v15, %v5948_v1  ;;  %v6088_v1 = vld [vmem:[%s10479_s8 + $0x444] sm:$0xf0] }
 0x1e6   :  { %3970 = vmatpush.bf16.msra.mxu0 %v6395_v42  ;;  %3959 = vmatpush.bf16.msra.mxu2 %v6115_v23  ;;  %v6789_v23 = vld [vmem:[%s10479_s8 + $0x18c] sm:$0xf] }
 0x1e7   :  { %v5755_v26 = vor.u32 %v6789_v23, %v5752_v24 }
 0x1ea   :  { %v2166_v14 = vpop.f32.mrf.mxu2  ;;  %3971 = vmatpush.bf16.msra.mxu0 %v6367_v4  ;;  %v6227_v4 = vor.u32 %v6911_v48, %v6226_v2  ;;  %v5668_v2 = vld [vmem:[%s10479_s8 + $0xfc] sm:$0xf0]  ;;  %v6880_v48 = vld [vmem:[%s10479_s8 + $0x464] sm:$0xf] }
 0x1ee   :  { %3972 = vmatpush.bf16.msra.mxu0 %v6339_v17  ;;  %v5554_v17 = vld [vmem:[%s10479_s8] sm:$0xf] }
 0x1f0   :  { %v2125_v28 = vpop.f32.mrf.mxu0 }
 0x1f1   :  { %v9030_v31 = vadd.f32 %v2125_v28, %v2113_v25  ;;  %v5863_v25 = vor.u32 %v6820_v20, %v5862_v18  ;;  %v6876_v28 = vld [vmem:[%s10479_s8 + $0x440] sm:$0xf0]  ;;  %v6743_v20 = vld [vmem:[%s10479_s8 + $0x18] sm:$0xf0] }
 0x1f2   :  { %v6087_v53 = vor.u32 %v6876_v28, %v6086_v27  ;;  %3973 = vmatpush.bf16.msra.mxu0 %v6311_v32  ;;  %v6200_v27 = vld [vmem:[%s10479_s8 + $0x524] sm:$0xf0]  ;;  %v6831_v28 = vld [vmem:[%s10479_s8 + $0x2dc] sm:$0xf] }
 0x1f3   :  { %4331 = vst [vmem:[#allocation4] sm:$0xff] %v9030_v31  ;;  %3947 = vmatpush.bf16.msra.mxu1 %v5863_v25  ;;  %v6901_v25 = vld [vmem:[%s10479_s8 + $0x50c] sm:$0xf] }
 0x1f4   :  { %3960 = vmatpush.bf16.msra.mxu2 %v6087_v53  ;;  %v6203_v32 = vor.u32 %v6901_v25, %v6200_v27  ;;  %v5724_v53 = vld [vmem:[%s10479_s8 + $0x16c] sm:$0xf0]  ;;  %v6796_v27 = vld [vmem:[%s10479_s8 + $0x1c4] sm:$0xf] }
 0x1f5   :  { %v6060_v25 = vld [vmem:[%s10479_s8 + $0x40c] sm:$0xf0] }
 0x1f6   :  { %3974 = vmatpush.bf16.msra.mxu0 %v6283_v36  ;;  %v6172_v36 = vld [vmem:[%s10479_s8 + $0x4ec] sm:$0xf0] }
 0x1f7   :  { %3948 = vmatpush.bf16.msra.mxu1 %v5835_v35  ;;  %v5727_v35 = vor.u32 %v6782_v37, %v5724_v53  ;;  %v6747_v37 = vld [vmem:[%s10479_s8 + $0x3c] sm:$0xf]  ;;  %v5584_v53 = vld [vmem:[%s10479_s8 + $0x54] sm:$0xf0] }
 0x1f8   :  { %v2127_v41 = vpop.f32.mrf.mxu0  ;;  %3961 = vmatpush.bf16.msra.mxu2 %v6059_v61 }
 0x1f9   :  { %v6806_v41 = vld [vmem:[%s10479_s8 + $0x210] sm:$0xf0] }
 0x1fa   :  { %v5807_v45 = vor.u32 %v6806_v41, %v5806_v40  ;;  %3975 = vmatpush.bf16.msra.mxu0 %v6255_v47  ;;  %v6824_v41 = vld [vmem:[%s10479_s8 + $0x2a4] sm:$0xf]  ;;  %v6775_v47 = vld [vmem:[%s10479_s8 + $0x11c] sm:$0xf] }
 0x1fc   :  { %3949 = vmatpush.bf16.msra.mxu1 %v5807_v45  ;;  %v6340_v45 = vld [vmem:[%s10479_s8 + $0x63c] sm:$0xf0] }
 0x1fe   :  { %3976 = vmatpush.bf16.msra.mxu0 %v6227_v4  ;;  %v6116_v4 = vld [vmem:[%s10479_s8 + $0x47c] sm:$0xf0] }
 0x1ff   :  { %v6119_v5 = vor.u32 %v6880_v48, %v6116_v4 }
 0x200   :  { %v2177_v14 = vpop.f32.mrf.mxu0  ;;  %3950 = vmatpush.bf16.msra.mxu1 %v5779_v0  ;;  %v6768_v0 = vld [vmem:[%s10479_s8 + $0xe4] sm:$0xf] }
 0x201   :  { %v2178_v44 = vadd.f32 %v2177_v14, %v2165_v11  ;;  %v6750_v11 = vld [vmem:[%s10479_s8 + $0x50] sm:$0xf0]  ;;  %v6031_v14 = vor.u32 %v6862_v57, %v6030_v12  ;;  %v5671_v3 = vor.u32 %v6768_v0, %v5668_v2  ;;  %v6761_v12 = vld [vmem:[%s10479_s8 + $0xac] sm:$0xf] }
 0x202   :  { %v5583_v13 = vor.u32 %v6750_v11, %v5582_v10  ;;  %v6284_v10 = vld [vmem:[%s10479_s8 + $0x5cc] sm:$0xf0]  ;;  %v6873_v57 = vld [vmem:[%s10479_s8 + $0x42c] sm:$0xf] }
 0x203   :  { %v2181_v22 = vmul.f32 0.5, %v2178_v44  ;;  %4332 = vst [vmem:[#allocation6] sm:$0xff] %v2178_v44  ;;  %v6396_v44 = vld [vmem:[%s10479_s8 + $0x6ac] sm:$0xf0]  ;;  %3962 = vmatpush.bf16.msra.mxu2 %v6031_v14  ;;  %v9363_v14 = vld [vmem:[%s10478_s7] sm:$0xf] }
 0x204   :  { %v6399_v18 = vor.u32 %v6950_v16, %v6396_v44  ;;  %v6091_v16 = vor.u32 %v6873_v57, %v6088_v1  ;;  %v5808_v44 = vld [vmem:[%s10479_s8 + $0x214] sm:$0xf0]  ;;  %v2223_v23 = vperm.slane %v9363_v14, 1 }
 0x205   :  { %v2182_v30 = vmul.f32 1.442695, %v2181_v22  ;;  %v5555_v22 = vor.u32 %v6743_v20, %v5554_v17  ;;  %v6915_v17 = vld [vmem:[%s10479_s8 + $0x57c] sm:$0xf]  ;;  %v6256_v20 = vld [vmem:[%s10479_s8 + $0x594] sm:$0xf0] }
 0x206   :  { %v6259_v9 = vor.u32 %v6915_v17, %v6256_v20 }
 0x207   :  { %6983 = vpow2.f32 %v2182_v30  ;;  %v5920_v30 = vld [vmem:[%s10479_s8 + $0x2f4] sm:$0xf0]  ;;  %3963 = vmatpush.bf16.msra.mxu2 %v6003_v19  ;;  %v6866_v19 = vld [vmem:[%s10479_s8 + $0x3f4] sm:$0xf] }
 0x208   :  { %v2179_v38 = vpop.f32.mrf.mxu0  ;;  %v5923_v39 = vor.u32 %v6831_v28, %v5920_v30  ;;  %v5780_v28 = vld [vmem:[%s10479_s8 + $0x1dc] sm:$0xf0]  ;;  %v6908_v30 = vld [vmem:[%s10479_s8 + $0x544] sm:$0xf] }
 0x209   :  { %v6894_v38 = vld [vmem:[%s10479_s8 + $0x4d4] sm:$0xf]  ;;  %v6231_v29 = vor.u32 %v6908_v30, %v6228_v59  ;;  %v6849_v30 = vld [vmem:[%s10479_s8 + $0x368] sm:$0xf0] }
 0x20a   :  { %v6175_v40 = vor.u32 %v6894_v38, %v6172_v36  ;;  %v6859_v38 = vld [vmem:[%s10479_s8 + $0x3bc] sm:$0xf] }
 0x20d   :  { %v6984_v42 = vpop.eup %6983 }
 0x20e   :  { %v2185_v49 = vmul.f32 %v6984_v42, %v2184_v34  ;;  %v5895_v34 = vor.u32 %v6824_v41, %v5892_v43  ;;  %v6343_v42 = vor.u32 %v6936_v60, %v6340_v45  ;;  %v6032_v41 = vld [vmem:[%s10479_s8 + $0x3d4] sm:$0xf0]  ;;  %v2222_v45 = vperm.slane %v9363_v14, 0 }
 0x20f   :  { %v6035_v60 = vor.u32 %v6859_v38, %v6032_v41  ;;  %v6961_v38 = vld [vmem:[%s10479_s8 + $0x6e8] sm:$0xf0] }
 0x210   :  { %v2186_v50 = vadd.f32 %v2185_v49, %v9030_v31  ;;  %v5611_v31 = vor.u32 %v6757_v56, %v5610_v55  ;;  %v5696_v49 = vld [vmem:[%s10479_s8 + $0x134] sm:$0xf0] }
 0x211   :  { %v6144_v55 = vld [vmem:[%s10479_s8 + $0x4b4] sm:$0xf0] }
 0x212   :  { %v2187_v52 = vpack.c.bf16 %v2186_v50, %v2186_v50  ;;  %3935 = vmatpush.bf16.msra.mxu3 %v5611_v31  ;;  %v6887_v50 = vld [vmem:[%s10479_s8 + $0x49c] sm:$0xf]  ;;  %v5864_v31 = vld [vmem:[%s10479_s8 + $0x284] sm:$0xf0] }
 0x213   :  { %v6147_v56 = vor.u32 %v6887_v50, %v6144_v55  ;;  %v5867_v61 = vor.u32 %v6817_v58, %v5864_v31  ;;  %v6740_v55 = vld [vmem:[%s10479_s8 + $0x4] sm:$0xf] }
 0x214   :  { %2398 = vmatmul.bf16.vlgmr.msrb.gmra.mxu3 %v2187_v52  ;;  %2411 = vmatmul.bf16.vlgmr.msrb.gmra.mxu1 %v2187_v52 }
 0x215   :  { %2424 = vmatmul.bf16.vlgmr.msrb.gmra.mxu2 %v2187_v52  ;;  %2437 = vmatmul.bf16.vlgmr.msrb.gmra.mxu0 %v2187_v52  ;;  %v5699_v52 = vor.u32 %v6775_v47, %v5696_v49  ;;  %v2224_v47 = vperm.slane %v9363_v14, 2 }
 0x216   :  { %3995 = vmatpush.bf16.msrb.mxu1 %v5979_v7  ;;  %4021 = vmatpush.bf16.msrb.mxu0 %v6427_v8  ;;  %v6922_v7 = vld [vmem:[%s10479_s8 + $0x5b4] sm:$0xf]  ;;  %v5839_v8 = vor.u32 %v6810_v6, %v5836_v54 }
 0x217   :  { %3936 = vmatpush.bf16.msra.mxu3 %v5583_v13  ;;  %4008 = vmatpush.bf16.msrb.mxu2 %v6203_v32  ;;  %v6287_v11 = vor.u32 %v6922_v7, %v6284_v10  ;;  %v5640_v13 = vld [vmem:[%s10479_s8 + $0xc4] sm:$0xf0]  ;;  %v2225_v32 = vperm.slane %v9363_v14, 3 }
 0x218   :  { %v5643_v15 = vor.u32 %v6761_v12, %v5640_v13 }
 0x21a   :  { %3996 = vmatpush.bf16.msrb.mxu1 %v5951_v51  ;;  %4022 = vmatpush.bf16.msrb.mxu0 %v6399_v18  ;;  %v6803_v51 = vld [vmem:[%s10479_s8 + $0x1fc] sm:$0xf] }
 0x21b   :  { %3937 = vmatpush.bf16.msra.mxu3 %v5555_v22  ;;  %4009 = vmatpush.bf16.msrb.mxu2 %v6175_v40  ;;  %v5811_v18 = vor.u32 %v6803_v51, %v5808_v44  ;;  %v5612_v22 = vld [vmem:[%s10479_s8 + $0x8c] sm:$0xf0]  ;;  %v5587_v40 = vor.u32 %v6747_v37, %v5584_v53 }
 0x21c   :  { %v5615_v24 = vor.u32 %v6754_v21, %v5612_v22 }
 0x21e   :  { %3997 = vmatpush.bf16.msrb.mxu1 %v5923_v39  ;;  %4023 = vmatpush.bf16.msrb.mxu0 %v6371_v33  ;;  %v5783_v39 = vor.u32 %v6796_v27, %v5780_v28 }
 0x21f   :  { %3982 = vmatpush.bf16.msrb.mxu3 %v5755_v26  ;;  %4010 = vmatpush.bf16.msrb.mxu2 %v6147_v56  ;;  %v6063_v26 = vor.u32 %v6866_v19, %v6060_v25  ;;  %v5556_v56 = vld [vmem:[%s10479_s8 + $0x1c] sm:$0xf0]  ;;  %v5982_v25 = vld [vmem:[%s10479_s8 + $0x350] sm:$0xf] }
 0x222   :  { %3998 = vmatpush.bf16.msrb.mxu1 %v5895_v34  ;;  %4024 = vmatpush.bf16.msrb.mxu0 %v6343_v42 }
 0x223   :  { %3983 = vmatpush.bf16.msrb.mxu3 %v5727_v35  ;;  %4011 = vmatpush.bf16.msrb.mxu2 %v6119_v5 }
 0x226   :  { %3999 = vmatpush.bf16.msrb.mxu1 %v5867_v61  ;;  %4025 = vmatpush.bf16.msrb.mxu0 %v6315_v63  ;;  %v5559_v61 = vor.u32 %v6740_v55, %v5556_v56  ;;  %v6004_v63 = vld [vmem:[%s10479_s8 + $0x39c] sm:$0xf0]  ;;  %v6954_v55 = vld [vmem:[%s10479_s8 + $0x6b0] sm:$0xf0]  ;;  %v5758_v56 = vld [vmem:[%s10479_s8 + $0x190] sm:$0xf] }
 0x227   :  { %3984 = vmatpush.bf16.msrb.mxu3 %v5699_v52  ;;  %4012 = vmatpush.bf16.msrb.mxu2 %v6091_v16 }
 0x22a   :  { %4000 = vmatpush.bf16.msrb.mxu1 %v5839_v8  ;;  %4026 = vmatpush.bf16.msrb.mxu0 %v6287_v11 }
 0x22b   :  { %3985 = vmatpush.bf16.msrb.mxu3 %v5671_v3  ;;  %4013 = vmatpush.bf16.msrb.mxu2 %v6063_v26  ;;  %v6007_v3 = vor.u32 %v6852_v62, %v6004_v63 }
 0x22e   :  { %4001 = vmatpush.bf16.msrb.mxu1 %v5811_v18  ;;  %4027 = vmatpush.bf16.msrb.mxu0 %v6259_v9 }
 0x22f   :  { %3986 = vmatpush.bf16.msrb.mxu3 %v5643_v15  ;;  %4014 = vmatpush.bf16.msrb.mxu2 %v6035_v60 }
 0x232   :  { %4002 = vmatpush.bf16.msrb.mxu1 %v5783_v39  ;;  %4028 = vmatpush.bf16.msrb.mxu0 %v6231_v29 }
 0x233   :  { %3987 = vmatpush.bf16.msrb.mxu3 %v5615_v24  ;;  %4015 = vmatpush.bf16.msrb.mxu2 %v6007_v3 }
 0x237   :  { %3988 = vmatpush.bf16.msrb.mxu3 %v5587_v40 }
 0x23b   :  { %3989 = vmatpush.bf16.msrb.mxu3 %v5559_v61 }
 0x291   :  { %v2412_v33 = vpop.f32.mrf.mxu1 }
 0x292   :  { %v9415_v35 = vadd.f32 %v2412_v33, %v2223_v23  ;;  %v2438_v36 = vpop.f32.mrf.mxu0 }
 0x293   :  { %v9420_v43 = vadd.f32 %v2438_v36, %v2225_v32  ;;  %v6430_v32 = vld [vmem:[%s10479_s8 + $0x6d0] sm:$0xf] }
 0x294   :  { %v2447_v34 = vand.u32 2147483647, %v9415_v35  ;;  %v2443_v39 = vmax.f32 %v9415_v35, 0.0  ;;  %v5954_v35 = vld [vmem:[%s10479_s8 + $0x318] sm:$0xf] }
 0x295   :  { %v2449_v42 = vand.u32 2147483647, %v9420_v43  ;;  %v2445_v37 = vmax.f32 %v9420_v43, 0.0  ;;  %v6842_v43 = vld [vmem:[%s10479_s8 + $0x330] sm:$0xf0] }
 0x296   :  { %v2451_v49 = vsub.f32 0.0, %v2447_v34 }
 0x297   :  { %v2453_v50 = vsub.f32 0.0, %v2449_v42  ;;  %v2399_v52 = vpop.f32.mrf.mxu3  ;;  %v5983_v42 = vor.u32 %v6849_v30, %v5982_v25  ;;  %v6150_v30 = vld [vmem:[%s10479_s8 + $0x4a0] sm:$0xf] }
 0x298   :  { %v2456_v58 = vmul.f32 1.442695, %v2451_v49  ;;  %v9432_v31 = vadd.f32 %v2399_v52, %v2222_v45  ;;  %v2425_v46 = vpop.f32.mrf.mxu2  ;;  %v6402_v52 = vld [vmem:[%s10479_s8 + $0x698] sm:$0xf] }
 0x299   :  { %v2460_v0 = vmul.f32 1.442695, %v2453_v50  ;;  %v9440_v2 = vadd.f32 %v2425_v46, %v2224_v47  ;;  %v2414_v48 = vpop.f32.mrf.mxu1  ;;  %v6431_v50 = vor.u32 %v6961_v38, %v6430_v32  ;;  %v6891_v32 = vld [vmem:[%s10479_s8 + $0x4b8] sm:$0xf0] }
 0x29a   :  { %6985 = vpow2.f32 %v2456_v58  ;;  %v2446_v4 = vand.u32 2147483647, %v9432_v31  ;;  %v2440_v5 = vpop.f32.mrf.mxu0  ;;  %v2442_v61 = vmax.f32 %v9432_v31, 0.0  ;;  %v5955_v31 = vor.u32 %v6842_v43, %v5954_v35  ;;  %v6814_v35 = vld [vmem:[%s10479_s8 + $0x250] sm:$0xf0] }
 0x29b   :  { %6987 = vpow2.f32 %v2460_v0  ;;  %v2448_v6 = vand.u32 2147483647, %v9440_v2  ;;  %v6793_v0 = vld [vmem:[%s10479_s8 + $0x1a8] sm:$0xf0]  ;;  %v6151_v38 = vor.u32 %v6891_v32, %v6150_v30  ;;  %v6951_v30 = vld [vmem:[%s10479_s8 + $0x69c] sm:$0xf] }
 0x29c   :  { %v2450_v54 = vsub.f32 0.0, %v2446_v4  ;;  %v6206_v4 = vld [vmem:[%s10479_s8 + $0x510] sm:$0xf]  ;;  %v6404_v32 = vld [vmem:[%s10479_s8 + $0x6b4] sm:$0xf0] }
 0x29d   :  { %v2452_v7 = vsub.f32 0.0, %v2448_v6  ;;  %v2444_v6 = vmax.f32 %v9440_v2, 0.0  ;;  %v6835_v2 = vld [vmem:[%s10479_s8 + $0x2f8] sm:$0xf0] }
 0x29e   :  { %v2454_v8 = vmul.f32 1.442695, %v2450_v54  ;;  %v6905_v54 = vld [vmem:[%s10479_s8 + $0x528] sm:$0xf0] }
 0x29f   :  { %v2458_v10 = vmul.f32 1.442695, %v2452_v7  ;;  %v2401_v11 = vpop.f32.mrf.mxu3 }
 0x2a0   :  { %v6986_v12 = vpop.eup %6985  ;;  %6989 = vpow2.f32 %v2454_v8  ;;  %v2427_v13 = vpop.f32.mrf.mxu2  ;;  %v5926_v11 = vld [vmem:[%s10479_s8 + $0x2e0] sm:$0xf] }
 0x2a1   :  { %v6988_v57 = vpop.eup %6987  ;;  %v2471_v14 = vadd.f32 1.0, %v6986_v12  ;;  %6991 = vpow2.f32 %v2458_v10  ;;  %v2474_v15 = vmul.f32 -0.5, %v6986_v12  ;;  %v2477_v18 = vand.u32 2147483647, %v6986_v12 }
 0x2a2   :  { %v2489_v1 = vadd.f32 1.0, %v6988_v57  ;;  %v2492_v16 = vmul.f32 -0.5, %v6988_v57  ;;  %v2495_v21 = vand.u32 2147483647, %v6988_v57  ;;  %v6403_v10 = vor.u32 %v6954_v55, %v6402_v52  ;;  %v5646_v55 = vld [vmem:[%s10479_s8 + $0xb0] sm:$0xf] }
 0x2a3   :  { %6993 = vlog2.f32 %v2471_v14  ;;  %v2475_v44 = vadd.f32 1.0, %v2474_v15  ;;  %vm2478_vm5 = vcmp.lt.f32.partialorder %v2477_v18, 0.0004427343  ;;  %v5759_v13 = vor.u32 %v6793_v0, %v5758_v56  ;;  %v6947_v14 = vld [vmem:[%s10479_s8 + $0x678] sm:$0xf0] }
 0x2a4   :  { %6995 = vlog2.f32 %v2489_v1  ;;  %v2493_v20 = vadd.f32 1.0, %v2492_v16  ;;  %vm2496_vm6 = vcmp.lt.f32.partialorder %v2495_v21, 0.0004427343  ;;  %v6207_v1 = vor.u32 %v6905_v54, %v6206_v4  ;;  %v5730_v16 = vld [vmem:[%s10479_s8 + $0x158] sm:$0xf] }
 0x2a5   :  { %v2476_v28 = vmul.f32 %v6986_v12, %v2475_v44  ;;  %v6178_v18 = vld [vmem:[%s10479_s8 + $0x4d8] sm:$0xf]  ;;  %v5898_v21 = vld [vmem:[%s10479_s8 + $0x2a8] sm:$0xf]  ;;  %v6765_v56 = vld [vmem:[%s10479_s8 + $0xc8] sm:$0xf0] }
 0x2a6   :  { %v6990_v51 = vpop.eup %6989  ;;  %v2494_v29 = vmul.f32 %v6988_v57, %v2493_v20  ;;  %v6374_v57 = vld [vmem:[%s10479_s8 + $0x660] sm:$0xf]  ;;  %v6898_v20 = vld [vmem:[%s10479_s8 + $0x4f0] sm:$0xf0] }
 0x2a7   :  { %v6992_v17 = vpop.eup %6991  ;;  %v2462_v9 = vadd.f32 1.0, %v6990_v51  ;;  %v2465_v22 = vmul.f32 -0.5, %v6990_v51  ;;  %v2468_v41 = vand.u32 2147483647, %v6990_v51  ;;  %v6179_v25 = vor.u32 %v6898_v20, %v6178_v18  ;;  %v5814_v0 = vld [vmem:[%s10479_s8 + $0x200] sm:$0xf] }
 0x2a8   :  { %v2480_v19 = vadd.f32 1.0, %v6992_v17  ;;  %v2483_v24 = vmul.f32 -0.5, %v6992_v17  ;;  %v2486_v45 = vand.u32 2147483647, %v6992_v17  ;;  %v6262_v4 = vld [vmem:[%s10479_s8 + $0x580] sm:$0xf] }
 0x2a9   :  { %v6994_v23 = vpop.eup %6993  ;;  %6997 = vlog2.f32 %v2462_v9  ;;  %v2466_v53 = vadd.f32 1.0, %v2465_v22  ;;  %vm2469_vm7 = vcmp.lt.f32.partialorder %v2468_v41, 0.0004427343  ;;  %v6375_v9 = vor.u32 %v6947_v14, %v6374_v57  ;;  %v6828_v22 = vld [vmem:[%s10479_s8 + $0x2c0] sm:$0xf0] }
 0x2aa   :  { %v6996_v26 = vpop.eup %6995  ;;  %v2473_v27 = vmul.f32 0.6931472, %v6994_v23  ;;  %6999 = vlog2.f32 %v2480_v19  ;;  %v2484_v60 = vadd.f32 1.0, %v2483_v24  ;;  %vm2487_vm8 = vcmp.lt.f32.partialorder %v2486_v45, 0.0004427343 }
 0x2ab   :  { %v2491_v59 = vmul.f32 0.6931472, %v6996_v26  ;;  %v2467_v63 = vmul.f32 %v6990_v51, %v2466_v53  ;;  %v6786_v51 = vld [vmem:[%s10479_s8 + $0x170] sm:$0xf0]  ;;  %v6346_v23 = vld [vmem:[%s10479_s8 + $0x628] sm:$0xf] }
 0x2ac   :  { %v2479_v33 = vsel %vm2478_vm5, %v2476_v28, %v2473_v27  ;;  %v2485_v3 = vmul.f32 %v6992_v17, %v2484_v60  ;;  %v5927_v17 = vor.u32 %v6835_v2, %v5926_v11  ;;  %v5731_v19 = vor.u32 %v6786_v51, %v5730_v16  ;;  %v6940_v24 = vld [vmem:[%s10479_s8 + $0x640] sm:$0xf0]  ;;  %v5702_v26 = vld [vmem:[%s10479_s8 + $0x120] sm:$0xf]  ;;  %v6779_v27 = vld [vmem:[%s10479_s8 + $0x138] sm:$0xf0] }
 0x2ad   :  { %v2499_v36 = vadd.f32 %v2479_v33, %v2443_v39  ;;  %v2497_v40 = vsel %vm2496_vm6, %v2494_v29, %v2491_v59  ;;  %v5899_v28 = vor.u32 %v6828_v22, %v5898_v21  ;;  %v6347_v39 = vor.u32 %v6940_v24, %v6346_v23  ;;  %v5870_v59 = vld [vmem:[%s10479_s8 + $0x270] sm:$0xf]  ;;  %v6821_v29 = vld [vmem:[%s10479_s8 + $0x288] sm:$0xf0]  ;;  %v6122_v60 = vld [vmem:[%s10479_s8 + $0x468] sm:$0xf] }
 0x2ae   :  { %v2501_v34 = vadd.f32 %v2497_v40, %v2445_v37  ;;  %v5703_v33 = vor.u32 %v6779_v27, %v5702_v26  ;;  %v6318_v37 = vld [vmem:[%s10479_s8 + $0x5f0] sm:$0xf]  ;;  %v6933_v53 = vld [vmem:[%s10479_s8 + $0x608] sm:$0xf0]  ;;  %v6772_v40 = vld [vmem:[%s10479_s8 + $0x100] sm:$0xf0]  ;;  %v5871_v41 = vor.u32 %v6821_v29, %v5870_v59 }
 0x2af   :  { %v6998_v47 = vpop.eup %6997  ;;  %v9464_v49 = vpack.c.bf16 %v2499_v36, %v2499_v36  ;;  %v5674_v36 = vld [vmem:[%s10479_s8 + $0xe8] sm:$0xf]  ;;  %v6319_v45 = vor.u32 %v6933_v53, %v6318_v37  ;;  %v6758_v54 = vld [vmem:[%s10479_s8 + $0x90] sm:$0xf0]  ;;  %v6912_v57 = vld [vmem:[%s10479_s8 + $0x560] sm:$0xf0] }
 0x2b0   :  { %v7000_v58 = vpop.eup %6999  ;;  %v9475_v46 = vpack.c.bf16 %v2501_v34, %v2501_v34  ;;  %v2464_v62 = vmul.f32 0.6931472, %v6998_v47  ;;  %v6884_v34 = vld [vmem:[%s10479_s8 + $0x480] sm:$0xf0]  ;;  %v5675_v43 = vor.u32 %v6772_v40, %v5674_v36  ;;  %v6290_v47 = vld [vmem:[%s10479_s8 + $0x5b8] sm:$0xf] }
 0x2b1   :  { %v2482_v48 = vmul.f32 0.6931472, %v7000_v58  ;;  %3951 = vmatmul.bf16.vlgmr.msra.gmra.mxu1 %v9464_v49  ;;  %v6123_v52 = vor.u32 %v6884_v34, %v6122_v60  ;;  %v5786_v11 = vld [vmem:[%s10479_s8 + $0x1c8] sm:$0xf]  ;;  %v5984_v16 = vld [vmem:[%s10479_s8 + $0x36c] sm:$0xf0]  ;;  %v6407_v60 = vor.u32 %v6951_v30, %v6404_v32 }
 0x2b2   :  { %v2470_v5 = vsel %vm2469_vm7, %v2467_v63, %v2464_v62  ;;  %3977 = vmatmul.bf16.vlgmr.msra.gmra.mxu0 %v9475_v46  ;;  %4047 = vmatpush.bf16.msra.mxu1 %v5983_v42  ;;  %v5842_v42 = vld [vmem:[%s10479_s8 + $0x238] sm:$0xf]  ;;  %v6877_v62 = vld [vmem:[%s10479_s8 + $0x448] sm:$0xf0]  ;;  %v6958_v51 = vld [vmem:[%s10479_s8 + $0x6d4] sm:$0xf] }
 0x2b3   :  { %v2498_v7 = vadd.f32 %v2470_v5, %v2442_v61  ;;  %v2488_v8 = vsel %vm2487_vm8, %v2485_v3, %v2482_v48  ;;  %4073 = vmatpush.bf16.msra.mxu0 %v6431_v50  ;;  %v6926_v50 = vld [vmem:[%s10479_s8 + $0x5d0] sm:$0xf0]  ;;  %v5843_v58 = vor.u32 %v6814_v35, %v5842_v42  ;;  %v6094_v61 = vld [vmem:[%s10479_s8 + $0x430] sm:$0xf]  ;;  %v6807_v48 = vld [vmem:[%s10479_s8 + $0x218] sm:$0xf0]  ;;  %v5647_v3 = vor.u32 %v6765_v56, %v5646_v55 }
 0x2b4   :  { %v2500_v12 = vadd.f32 %v2488_v8, %v2444_v6  ;;  %v6291_v63 = vor.u32 %v6926_v50, %v6290_v47  ;;  %v6919_v5 = vld [vmem:[%s10479_s8 + $0x598] sm:$0xf0]  ;;  %v6095_v6 = vor.u32 %v6877_v62, %v6094_v61  ;;  %v6066_v8 = vld [vmem:[%s10479_s8 + $0x3f8] sm:$0xf]  ;;  %v6432_v18 = vld [vmem:[%s10479_s8 + $0x6ec] sm:$0xf0] }
 0x2b5   :  { %v9502_v15 = vpack.c.bf16 %v2498_v7, %v2498_v7  ;;  %v5815_v7 = vor.u32 %v6807_v48, %v5814_v0  ;;  %v6263_v2 = vor.u32 %v6919_v5, %v6262_v4  ;;  %v5590_v20 = vld [vmem:[%s10479_s8 + $0x40] sm:$0xf]  ;;  %v6435_v26 = vor.u32 %v6958_v51, %v6432_v18  ;;  %v5562_v59 = vld [vmem:[%s10479_s8 + $0x8] sm:$0xf]  ;;  %v6744_v29 = vld [vmem:[%s10479_s8 + $0x20] sm:$0xf0] }
 0x2b6   :  { %v9510_v44 = vpack.c.bf16 %v2500_v12, %v2500_v12  ;;  %4048 = vmatpush.bf16.msra.mxu1 %v5955_v31  ;;  %v5618_v31 = vld [vmem:[%s10479_s8 + $0x78] sm:$0xf]  ;;  %v6800_v12 = vld [vmem:[%s10479_s8 + $0x1e0] sm:$0xf0]  ;;  %v6038_v22 = vld [vmem:[%s10479_s8 + $0x3c0] sm:$0xf]  ;;  %v5563_v34 = vor.u32 %v6744_v29, %v5562_v59 }
 0x2b7   :  { %4074 = vmatpush.bf16.msra.mxu0 %v6403_v10  ;;  %3938 = vmatmul.bf16.vlgmr.msra.gmra.mxu3 %v9502_v15  ;;  %v6870_v10 = vld [vmem:[%s10479_s8 + $0x410] sm:$0xf0]  ;;  %v5619_v14 = vor.u32 %v6758_v54, %v5618_v31  ;;  %v5787_v21 = vor.u32 %v6800_v12, %v5786_v11  ;;  %v6856_v37 = vld [vmem:[%s10479_s8 + $0x3a0] sm:$0xf0]  ;;  %v5928_v42 = vld [vmem:[%s10479_s8 + $0x2fc] sm:$0xf0] }
 0x2b8   :  { %3964 = vmatmul.bf16.vlgmr.msra.gmra.mxu2 %v9510_v44  ;;  %4034 = vmatpush.bf16.msra.mxu3 %v5759_v13  ;;  %v6234_v13 = vld [vmem:[%s10479_s8 + $0x548] sm:$0xf]  ;;  %v6790_v53 = vld [vmem:[%s10479_s8 + $0x194] sm:$0xf]  ;;  %v6944_v47 = vld [vmem:[%s10479_s8 + $0x664] sm:$0xf] }
 0x2b9   :  { %4060 = vmatpush.bf16.msra.mxu2 %v6207_v1  ;;  %v6846_v1 = vld [vmem:[%s10479_s8 + $0x354] sm:$0xf]  ;;  %v6235_v23 = vor.u32 %v6912_v57, %v6234_v13  ;;  %v6376_v50 = vld [vmem:[%s10479_s8 + $0x67c] sm:$0xf0]  ;;  %v6783_v55 = vld [vmem:[%s10479_s8 + $0x15c] sm:$0xf] }
 0x2ba   :  { %4049 = vmatpush.bf16.msra.mxu1 %v5927_v17  ;;  %v6067_v17 = vor.u32 %v6870_v10, %v6066_v8  ;;  %v5987_v24 = vor.u32 %v6846_v1, %v5984_v16  ;;  %v6902_v40 = vld [vmem:[%s10479_s8 + $0x514] sm:$0xf]  ;;  %v5732_v56 = vld [vmem:[%s10479_s8 + $0x174] sm:$0xf0]  ;;  %v6895_v61 = vld [vmem:[%s10479_s8 + $0x4dc] sm:$0xf] }
 0x2bb   :  { %4075 = vmatpush.bf16.msra.mxu0 %v6375_v9  ;;  %v6751_v9 = vld [vmem:[%s10479_s8 + $0x58] sm:$0xf0]  ;;  %v6180_v62 = vld [vmem:[%s10479_s8 + $0x4f4] sm:$0xf0]  ;;  %v6825_v0 = vld [vmem:[%s10479_s8 + $0x2ac] sm:$0xf] }
 0x2bc   :  { %4035 = vmatpush.bf16.msra.mxu3 %v5731_v19  ;;  %v6863_v19 = vld [vmem:[%s10479_s8 + $0x3d8] sm:$0xf0]  ;;  %v5591_v27 = vor.u32 %v6751_v9, %v5590_v20  ;;  %v5900_v48 = vld [vmem:[%s10479_s8 + $0x2c4] sm:$0xf0]  ;;  %v6937_v4 = vld [vmem:[%s10479_s8 + $0x62c] sm:$0xf] }
 0x2bd   :  { %4061 = vmatpush.bf16.msra.mxu2 %v6179_v25  ;;  %v6839_v25 = vld [vmem:[%s10479_s8 + $0x31c] sm:$0xf]  ;;  %v6348_v5 = vld [vmem:[%s10479_s8 + $0x644] sm:$0xf0]  ;;  %v6776_v31 = vld [vmem:[%s10479_s8 + $0x124] sm:$0xf] }
 0x2be   :  { %4050 = vmatpush.bf16.msra.mxu1 %v5899_v28  ;;  %v5956_v28 = vld [vmem:[%s10479_s8 + $0x334] sm:$0xf0]  ;;  %v5704_v54 = vld [vmem:[%s10479_s8 + $0x13c] sm:$0xf0]  ;;  %v6888_v8 = vld [vmem:[%s10479_s8 + $0x4a4] sm:$0xf]  ;;  %v6351_v11 = vor.u32 %v6937_v4, %v6348_v5 }
 0x2bf   :  { %4076 = vmatpush.bf16.msra.mxu0 %v6347_v39  ;;  %v6039_v39 = vor.u32 %v6863_v19, %v6038_v22  ;;  %v5959_v36 = vor.u32 %v6839_v25, %v5956_v28  ;;  %v6152_v10 = vld [vmem:[%s10479_s8 + $0x4bc] sm:$0xf0]  ;;  %v5872_v12 = vld [vmem:[%s10479_s8 + $0x28c] sm:$0xf0]  ;;  %v5707_v13 = vor.u32 %v6776_v31, %v5704_v54  ;;  %v6930_v57 = vld [vmem:[%s10479_s8 + $0x5f4] sm:$0xf] }
 0x2c0   :  { %4036 = vmatpush.bf16.msra.mxu3 %v5703_v33  ;;  %v6010_v33 = vld [vmem:[%s10479_s8 + $0x388] sm:$0xf]  ;;  %v6155_v1 = vor.u32 %v6888_v8, %v6152_v10  ;;  %v6769_v16 = vld [vmem:[%s10479_s8 + $0xec] sm:$0xf]  ;;  %v5844_v22 = vld [vmem:[%s10479_s8 + $0x254] sm:$0xf0] }
 0x2c1   :  { %4062 = vmatpush.bf16.msra.mxu2 %v6151_v38  ;;  %4003 = vmatmul.bf16.vlgmr.msrb.gmra.mxu1 %v9464_v49  ;;  %v5760_v38 = vld [vmem:[%s10479_s8 + $0x1ac] sm:$0xf0]  ;;  %v6011_v35 = vor.u32 %v6856_v37, %v6010_v33  ;;  %v5676_v51 = vld [vmem:[%s10479_s8 + $0x104] sm:$0xf0]  ;;  %v6881_v18 = vld [vmem:[%s10479_s8 + $0x46c] sm:$0xf] }
 0x2c2   :  { %4029 = vmatmul.bf16.vlgmr.msrb.gmra.mxu0 %v9475_v46  ;;  %4051 = vmatpush.bf16.msra.mxu1 %v5871_v41  ;;  %v6208_v41 = vld [vmem:[%s10479_s8 + $0x52c] sm:$0xf0]  ;;  %v6124_v20 = vld [vmem:[%s10479_s8 + $0x484] sm:$0xf0]  ;;  %v5679_v19 = vor.u32 %v6769_v16, %v5676_v51  ;;  %v6874_v30 = vld [vmem:[%s10479_s8 + $0x434] sm:$0xf] }
 0x2c3   :  { %4077 = vmatpush.bf16.msra.mxu0 %v6319_v45  ;;  %v6832_v45 = vld [vmem:[%s10479_s8 + $0x2e4] sm:$0xf]  ;;  %v6127_v25 = vor.u32 %v6881_v18, %v6124_v20  ;;  %v6096_v32 = vld [vmem:[%s10479_s8 + $0x44c] sm:$0xf0]  ;;  %v5816_v29 = vld [vmem:[%s10479_s8 + $0x21c] sm:$0xf0] }
 0x2c4   :  { %4037 = vmatpush.bf16.msra.mxu3 %v5675_v43  ;;  %v5763_v43 = vor.u32 %v6790_v53, %v5760_v38  ;;  %v6804_v59 = vld [vmem:[%s10479_s8 + $0x204] sm:$0xf]  ;;  %v6264_v53 = vld [vmem:[%s10479_s8 + $0x59c] sm:$0xf0]  ;;  %v6099_v38 = vor.u32 %v6874_v30, %v6096_v32  ;;  %v6955_v10 = vld [vmem:[%s10479_s8 + $0x6b8] sm:$0xf0] }
 0x2c5   :  { %4063 = vmatpush.bf16.msra.mxu2 %v6123_v52  ;;  %v6211_v52 = vor.u32 %v6902_v40, %v6208_v41  ;;  %v6916_v37 = vld [vmem:[%s10479_s8 + $0x584] sm:$0xf]  ;;  %v5620_v40 = vld [vmem:[%s10479_s8 + $0x94] sm:$0xf0]  ;;  %v5819_v41 = vor.u32 %v6804_v59, %v5816_v29  ;;  %v6410_v8 = vld [vmem:[%s10479_s8 + $0x6a0] sm:$0xf] }
 0x2c6   :  { %4052 = vmatpush.bf16.msra.mxu1 %v5843_v58  ;;  %v5931_v58 = vor.u32 %v6832_v45, %v5928_v42  ;;  %v6797_v45 = vld [vmem:[%s10479_s8 + $0x1cc] sm:$0xf]  ;;  %v6267_v42 = vor.u32 %v6916_v37, %v6264_v53  ;;  %v6214_v51 = vld [vmem:[%s10479_s8 + $0x518] sm:$0xf]  ;;  %v6411_v18 = vor.u32 %v6955_v10, %v6410_v8  ;;  %v6186_v30 = vld [vmem:[%s10479_s8 + $0x4e0] sm:$0xf] }
 0x2c7   :  { %4078 = vmatpush.bf16.msra.mxu0 %v6291_v63  ;;  %3990 = vmatmul.bf16.vlgmr.msrb.gmra.mxu3 %v9502_v15  ;;  %v6379_v63 = vor.u32 %v6944_v47, %v6376_v50  ;;  %v6236_v47 = vld [vmem:[%s10479_s8 + $0x564] sm:$0xf0]  ;;  %v6899_v32 = vld [vmem:[%s10479_s8 + $0x4f8] sm:$0xf0]  ;;  %v5906_v59 = vld [vmem:[%s10479_s8 + $0x2b0] sm:$0xf] }
 0x2c8   :  { %4016 = vmatmul.bf16.vlgmr.msrb.gmra.mxu2 %v9510_v44  ;;  %4038 = vmatpush.bf16.msra.mxu3 %v5647_v3  ;;  %v5735_v3 = vor.u32 %v6783_v55, %v5732_v56  ;;  %v6850_v55 = vld [vmem:[%s10479_s8 + $0x370] sm:$0xf0]  ;;  %v6438_v56 = vld [vmem:[%s10479_s8 + $0x6d8] sm:$0xf]  ;;  %v6829_v29 = vld [vmem:[%s10479_s8 + $0x2c8] sm:$0xf0] }
 0x2c9   :  { %4064 = vmatpush.bf16.msra.mxu2 %v6095_v6  ;;  %v6183_v6 = vor.u32 %v6895_v61, %v6180_v62  ;;  %v6962_v61 = vld [vmem:[%s10479_s8 + $0x6f0] sm:$0xf0]  ;;  %v6748_v62 = vld [vmem:[%s10479_s8 + $0x44] sm:$0xf]  ;;  %v6354_v37 = vld [vmem:[%s10479_s8 + $0x630] sm:$0xf] }
 0x2ca   :  { %4053 = vmatpush.bf16.msra.mxu1 %v5815_v7  ;;  %v5903_v7 = vor.u32 %v6825_v0, %v5900_v48  ;;  %v6860_v48 = vld [vmem:[%s10479_s8 + $0x3c4] sm:$0xf]  ;;  %v6439_v31 = vor.u32 %v6962_v61, %v6438_v56  ;;  %v6941_v53 = vld [vmem:[%s10479_s8 + $0x648] sm:$0xf0]  ;;  %v6130_v61 = vld [vmem:[%s10479_s8 + $0x470] sm:$0xf] }
 0x2cb   :  { %4079 = vmatpush.bf16.msra.mxu0 %v6263_v2  ;;  %v6818_v2 = vld [vmem:[%s10479_s8 + $0x274] sm:$0xf]  ;;  %v6773_v56 = vld [vmem:[%s10479_s8 + $0x108] sm:$0xf0]  ;;  %v6102_v8 = vld [vmem:[%s10479_s8 + $0x438] sm:$0xf] }
 0x2cc   :  { %4039 = vmatpush.bf16.msra.mxu3 %v5619_v14  ;;  %v6320_v14 = vld [vmem:[%s10479_s8 + $0x60c] sm:$0xf0]  ;;  %v6878_v10 = vld [vmem:[%s10479_s8 + $0x450] sm:$0xf0] }
 0x2cd   :  { %4065 = vmatpush.bf16.msra.mxu2 %v6067_v17  ;;  %v5875_v17 = vor.u32 %v6818_v2, %v5872_v12  ;;  %v6323_v9 = vor.u32 %v6930_v57, %v6320_v14  ;;  %v6741_v2 = vld [vmem:[%s10479_s8 + $0xc] sm:$0xf]  ;;  %v5564_v12 = vld [vmem:[%s10479_s8 + $0x24] sm:$0xf0]  ;;  %v5766_v14 = vld [vmem:[%s10479_s8 + $0x198] sm:$0xf] }
 0x2ce   :  { %4054 = vmatpush.bf16.msra.mxu1 %v5787_v21  ;;  %v6811_v21 = vld [vmem:[%s10479_s8 + $0x23c] sm:$0xf]  ;;  %v6012_v57 = vld [vmem:[%s10479_s8 + $0x3a4] sm:$0xf0]  ;;  %v5567_v20 = vor.u32 %v6741_v2, %v5564_v12  ;;  %v6808_v12 = vld [vmem:[%s10479_s8 + $0x220] sm:$0xf0] }
 0x2cf   :  { %4080 = vmatpush.bf16.msra.mxu0 %v6235_v23  ;;  %v6923_v23 = vld [vmem:[%s10479_s8 + $0x5bc] sm:$0xf]  ;;  %v5847_v28 = vor.u32 %v6811_v21, %v5844_v22  ;;  %v6836_v21 = vld [vmem:[%s10479_s8 + $0x300] sm:$0xf0]  ;;  %v5822_v2 = vld [vmem:[%s10479_s8 + $0x208] sm:$0xf] }
 0x2d0   :  { %4040 = vmatpush.bf16.msra.mxu3 %v5591_v27  ;;  %v5648_v27 = vld [vmem:[%s10479_s8 + $0xcc] sm:$0xf0] }
 0x2d1   :  { %4066 = vmatpush.bf16.msra.mxu2 %v6039_v39  ;;  %4055 = vmatmul.bf16.vlgmr.msra.gmra.mxu1 %v9464_v49 }
 0x2d2   :  { %4099 = vmatpush.bf16.msrb.mxu1 %v5987_v24  ;;  %4081 = vmatmul.bf16.vlgmr.msra.gmra.mxu0 %v9475_v46  ;;  %v6292_v24 = vld [vmem:[%s10479_s8 + $0x5d4] sm:$0xf0] }
 0x2d3   :  { %4125 = vmatpush.bf16.msrb.mxu0 %v6435_v26  ;;  %v6762_v26 = vld [vmem:[%s10479_s8 + $0xb4] sm:$0xf]  ;;  %v6295_v39 = vor.u32 %v6923_v23, %v6292_v24  ;;  %v6382_v23 = vld [vmem:[%s10479_s8 + $0x668] sm:$0xf]  ;;  %v6948_v24 = vld [vmem:[%s10479_s8 + $0x680] sm:$0xf0] }
 0x2d4   :  { %4041 = vmatpush.bf16.msra.mxu3 %v5563_v34  ;;  %v5651_v33 = vor.u32 %v6762_v26, %v5648_v27  ;;  %v6068_v34 = vld [vmem:[%s10479_s8 + $0x414] sm:$0xf0]  ;;  %v5738_v26 = vld [vmem:[%s10479_s8 + $0x160] sm:$0xf]  ;;  %v6787_v27 = vld [vmem:[%s10479_s8 + $0x178] sm:$0xf0] }
 0x2d5   :  { %4067 = vmatpush.bf16.msra.mxu2 %v6011_v35  ;;  %v5788_v35 = vld [vmem:[%s10479_s8 + $0x1e4] sm:$0xf0] }
 0x2d6   :  { %4100 = vmatpush.bf16.msrb.mxu1 %v5959_v36  ;;  %v6755_v36 = vld [vmem:[%s10479_s8 + $0x7c] sm:$0xf]  ;;  %v5791_v0 = vor.u32 %v6797_v45, %v5788_v35  ;;  %v6355_v45 = vor.u32 %v6941_v53, %v6354_v37  ;;  %v6822_v35 = vld [vmem:[%s10479_s8 + $0x290] sm:$0xf0] }
 0x2d7   :  { %4126 = vmatpush.bf16.msrb.mxu0 %v6407_v60  ;;  %4042 = vmatmul.bf16.vlgmr.msra.gmra.mxu3 %v9502_v15  ;;  %v6867_v60 = vld [vmem:[%s10479_s8 + $0x3fc] sm:$0xf]  ;;  %v5623_v50 = vor.u32 %v6755_v36, %v5620_v40  ;;  %v5710_v36 = vld [vmem:[%s10479_s8 + $0x128] sm:$0xf]  ;;  %v6780_v40 = vld [vmem:[%s10479_s8 + $0x140] sm:$0xf0] }
 0x2d8   :  { %4086 = vmatpush.bf16.msrb.mxu3 %v5763_v43  ;;  %4068 = vmatmul.bf16.vlgmr.msra.gmra.mxu2 %v9510_v44  ;;  %v6909_v43 = vld [vmem:[%s10479_s8 + $0x54c] sm:$0xf] }
 0x2d9   :  { %4112 = vmatpush.bf16.msrb.mxu2 %v6211_v52  ;;  %v5990_v52 = vld [vmem:[%s10479_s8 + $0x358] sm:$0xf]  ;;  %v6239_v4 = vor.u32 %v6909_v43, %v6236_v47  ;;  %v5711_v43 = vor.u32 %v6780_v40, %v5710_v36 }
 0x2da   :  { %4101 = vmatpush.bf16.msrb.mxu1 %v5931_v58  ;;  %v6071_v58 = vor.u32 %v6867_v60, %v6068_v34  ;;  %v5991_v5 = vor.u32 %v6850_v55, %v5990_v52  ;;  %v6158_v60 = vld [vmem:[%s10479_s8 + $0x4a8] sm:$0xf]  ;;  %v6892_v34 = vld [vmem:[%s10479_s8 + $0x4c0] sm:$0xf0]  ;;  %v6326_v47 = vld [vmem:[%s10479_s8 + $0x5f8] sm:$0xf] }
 0x2db   :  { %4127 = vmatpush.bf16.msrb.mxu0 %v6379_v63  ;;  %v5592_v63 = vld [vmem:[%s10479_s8 + $0x5c] sm:$0xf0]  ;;  %v6159_v52 = vor.u32 %v6892_v34, %v6158_v60  ;;  %v5682_v55 = vld [vmem:[%s10479_s8 + $0xf0] sm:$0xf]  ;;  %v6952_v60 = vld [vmem:[%s10479_s8 + $0x6a4] sm:$0xf] }
 0x2dc   :  { %4087 = vmatpush.bf16.msrb.mxu3 %v5735_v3  ;;  %v6040_v3 = vld [vmem:[%s10479_s8 + $0x3dc] sm:$0xf0]  ;;  %v5595_v54 = vor.u32 %v6748_v62, %v5592_v63  ;;  %v6885_v62 = vld [vmem:[%s10479_s8 + $0x488] sm:$0xf0] }
 0x2dd   :  { %4113 = vmatpush.bf16.msrb.mxu2 %v6183_v6  ;;  %v5962_v6 = vld [vmem:[%s10479_s8 + $0x320] sm:$0xf] }
 0x2de   :  { %4102 = vmatpush.bf16.msrb.mxu1 %v5903_v7  ;;  %v6843_v7 = vld [vmem:[%s10479_s8 + $0x338] sm:$0xf0]  ;;  %v6412_v34 = vld [vmem:[%s10479_s8 + $0x6bc] sm:$0xf0] }
 0x2df   :  { %4128 = vmatpush.bf16.msrb.mxu0 %v6351_v11  ;;  %v6043_v11 = vor.u32 %v6860_v48, %v6040_v3  ;;  %v5963_v16 = vor.u32 %v6843_v7, %v5962_v6  ;;  %v6815_v48 = vld [vmem:[%s10479_s8 + $0x258] sm:$0xf0]  ;;  %v5683_v3 = vor.u32 %v6773_v56, %v5682_v55  ;;  %v6131_v6 = vor.u32 %v6885_v62, %v6130_v61 }
 0x2e0   :  { %4088 = vmatpush.bf16.msrb.mxu3 %v5707_v13  ;;  %v6853_v13 = vld [vmem:[%s10479_s8 + $0x38c] sm:$0xf]  ;;  %v6903_v56 = vld [vmem:[%s10479_s8 + $0x51c] sm:$0xf]  ;;  %v6415_v61 = vor.u32 %v6952_v60, %v6412_v34  ;;  %v6104_v34 = vld [vmem:[%s10479_s8 + $0x454] sm:$0xf0] }
 0x2e1   :  { %4114 = vmatpush.bf16.msrb.mxu2 %v6155_v1  ;;  %v6794_v1 = vld [vmem:[%s10479_s8 + $0x1b0] sm:$0xf0]  ;;  %v6015_v22 = vor.u32 %v6853_v13, %v6012_v57  ;;  %v6270_v57 = vld [vmem:[%s10479_s8 + $0x588] sm:$0xf]  ;;  %v6875_v60 = vld [vmem:[%s10479_s8 + $0x43c] sm:$0xf] }
 0x2e2   :  { %4103 = vmatpush.bf16.msrb.mxu1 %v5875_v17  ;;  %v6906_v17 = vld [vmem:[%s10479_s8 + $0x530] sm:$0xf0] }
 0x2e3   :  { %4129 = vmatpush.bf16.msrb.mxu0 %v6323_v9  ;;  %v5934_v9 = vld [vmem:[%s10479_s8 + $0x2e8] sm:$0xf] }
 0x2e4   :  { %4089 = vmatpush.bf16.msrb.mxu3 %v5679_v19  ;;  %v5767_v19 = vor.u32 %v6794_v1, %v5766_v14  ;;  %v6920_v14 = vld [vmem:[%s10479_s8 + $0x5a0] sm:$0xf0]  ;;  %v6103_v1 = vor.u32 %v6878_v10, %v6102_v8  ;;  %v6188_v10 = vld [vmem:[%s10479_s8 + $0x4fc] sm:$0xf0] }
 0x2e5   :  { %4115 = vmatpush.bf16.msrb.mxu2 %v6127_v25  ;;  %v6215_v25 = vor.u32 %v6906_v17, %v6214_v51  ;;  %v6759_v51 = vld [vmem:[%s10479_s8 + $0x98] sm:$0xf0]  ;;  %v5823_v17 = vor.u32 %v6808_v12, %v5822_v2  ;;  %v6896_v8 = vld [vmem:[%s10479_s8 + $0x4e4] sm:$0xf]  ;;  %v6826_v2 = vld [vmem:[%s10479_s8 + $0x2b4] sm:$0xf] }
 0x2e6   :  { %4104 = vmatpush.bf16.msrb.mxu1 %v5847_v28  ;;  %v5935_v28 = vor.u32 %v6836_v21, %v5934_v9  ;;  %v5794_v9 = vld [vmem:[%s10479_s8 + $0x1d0] sm:$0xf]  ;;  %v6271_v21 = vor.u32 %v6920_v14, %v6270_v57  ;;  %v6938_v57 = vld [vmem:[%s10479_s8 + $0x634] sm:$0xf] }
 0x2e7   :  { %4130 = vmatpush.bf16.msrb.mxu0 %v6295_v39  ;;  %v6383_v39 = vor.u32 %v6948_v24, %v6382_v23  ;;  %v6913_v23 = vld [vmem:[%s10479_s8 + $0x568] sm:$0xf0]  ;;  %v5908_v12 = vld [vmem:[%s10479_s8 + $0x2cc] sm:$0xf0] }
 0x2e8   :  { %4090 = vmatpush.bf16.msrb.mxu3 %v5651_v33  ;;  %v5739_v33 = vor.u32 %v6787_v27, %v5738_v26  ;;  %v5992_v26 = vld [vmem:[%s10479_s8 + $0x374] sm:$0xf0]  ;;  %v6959_v27 = vld [vmem:[%s10479_s8 + $0x6dc] sm:$0xf]  ;;  %v6356_v14 = vld [vmem:[%s10479_s8 + $0x64c] sm:$0xf0] }
 0x2e9   :  { %4116 = vmatpush.bf16.msrb.mxu2 %v6099_v38  ;;  %v6187_v38 = vor.u32 %v6899_v32, %v6186_v30  ;;  %v6440_v30 = vld [vmem:[%s10479_s8 + $0x6f4] sm:$0xf0]  ;;  %v5598_v32 = vld [vmem:[%s10479_s8 + $0x48] sm:$0xf] }
 0x2ea   :  { %4105 = vmatpush.bf16.msrb.mxu1 %v5819_v41  ;;  %v5907_v41 = vor.u32 %v6829_v29, %v5906_v59  ;;  %v6046_v29 = vld [vmem:[%s10479_s8 + $0x3c8] sm:$0xf]  ;;  %v6443_v36 = vor.u32 %v6959_v27, %v6440_v30  ;;  %v5684_v27 = vld [vmem:[%s10479_s8 + $0x10c] sm:$0xf0]  ;;  %v6882_v30 = vld [vmem:[%s10479_s8 + $0x474] sm:$0xf] }
 0x2eb   :  { %4131 = vmatpush.bf16.msrb.mxu0 %v6267_v42  ;;  %v5878_v42 = vld [vmem:[%s10479_s8 + $0x278] sm:$0xf] }
 0x2ec   :  { %4091 = vmatpush.bf16.msrb.mxu3 %v5623_v50  ;;  %v6934_v50 = vld [vmem:[%s10479_s8 + $0x610] sm:$0xf0] }
 0x2ed   :  { %4117 = vmatpush.bf16.msrb.mxu2 %v6071_v58  ;;  %v5879_v58 = vor.u32 %v6822_v35, %v5878_v42  ;;  %v6327_v63 = vor.u32 %v6934_v50, %v6326_v47  ;;  %v5570_v42 = vld [vmem:[%s10479_s8 + $0x10] sm:$0xf]  ;;  %v6745_v35 = vld [vmem:[%s10479_s8 + $0x28] sm:$0xf0]  ;;  %v6791_v50 = vld [vmem:[%s10479_s8 + $0x19c] sm:$0xf] }
 0x2ee   :  { %4106 = vmatpush.bf16.msrb.mxu1 %v5791_v0  ;;  %v5850_v0 = vld [vmem:[%s10479_s8 + $0x240] sm:$0xf]  ;;  %v6857_v47 = vld [vmem:[%s10479_s8 + $0x3a8] sm:$0xf0]  ;;  %v5571_v62 = vor.u32 %v6745_v35, %v5570_v42  ;;  %v5824_v35 = vld [vmem:[%s10479_s8 + $0x224] sm:$0xf0] }
 0x2ef   :  { %4132 = vmatpush.bf16.msrb.mxu0 %v6239_v4  ;;  %v6298_v4 = vld [vmem:[%s10479_s8 + $0x5c0] sm:$0xf]  ;;  %v5851_v7 = vor.u32 %v6815_v48, %v5850_v0  ;;  %v5936_v0 = vld [vmem:[%s10479_s8 + $0x304] sm:$0xf0]  ;;  %v6805_v42 = vld [vmem:[%s10479_s8 + $0x20c] sm:$0xf] }
 0x2f0   :  { %4092 = vmatpush.bf16.msrb.mxu3 %v5595_v54  ;;  %v6766_v54 = vld [vmem:[%s10479_s8 + $0xd0] sm:$0xf0] }
 0x2f1   :  { %4118 = vmatpush.bf16.msrb.mxu2 %v6043_v11  ;;  %4107 = vmatmul.bf16.vlgmr.msrb.gmra.mxu1 %v9464_v49 }
 0x2f2   :  { %4151 = vmatpush.bf16.msra.mxu1 %v5991_v5  ;;  %4133 = vmatmul.bf16.vlgmr.msrb.gmra.mxu0 %v9475_v46  ;;  %v6927_v5 = vld [vmem:[%s10479_s8 + $0x5d8] sm:$0xf0] }
 0x2f3   :  { %4177 = vmatpush.bf16.msra.mxu0 %v6439_v31  ;;  %v5654_v31 = vld [vmem:[%s10479_s8 + $0xb8] sm:$0xf]  ;;  %v6299_v11 = vor.u32 %v6927_v5, %v6298_v4  ;;  %v6945_v4 = vld [vmem:[%s10479_s8 + $0x66c] sm:$0xf]  ;;  %v6384_v5 = vld [vmem:[%s10479_s8 + $0x684] sm:$0xf0] }
 0x2f4   :  { %4093 = vmatpush.bf16.msrb.mxu3 %v5567_v20  ;;  %v5655_v13 = vor.u32 %v6766_v54, %v5654_v31  ;;  %v6871_v20 = vld [vmem:[%s10479_s8 + $0x418] sm:$0xf0]  ;;  %v6784_v31 = vld [vmem:[%s10479_s8 + $0x164] sm:$0xf]  ;;  %v5740_v54 = vld [vmem:[%s10479_s8 + $0x17c] sm:$0xf0] }
 0x2f5   :  { %4119 = vmatpush.bf16.msrb.mxu2 %v6015_v22  ;;  %v6801_v22 = vld [vmem:[%s10479_s8 + $0x1e8] sm:$0xf0] }
 0x2f6   :  { %4152 = vmatpush.bf16.msra.mxu1 %v5963_v16  ;;  %v5626_v16 = vld [vmem:[%s10479_s8 + $0x80] sm:$0xf]  ;;  %v5795_v59 = vor.u32 %v6801_v22, %v5794_v9  ;;  %v6359_v9 = vor.u32 %v6938_v57, %v6356_v14  ;;  %v5880_v22 = vld [vmem:[%s10479_s8 + $0x294] sm:$0xf0] }
 0x2f7   :  { %4178 = vmatpush.bf16.msra.mxu0 %v6411_v18  ;;  %4094 = vmatmul.bf16.vlgmr.msrb.gmra.mxu3 %v9502_v15  ;;  %v6074_v18 = vld [vmem:[%s10479_s8 + $0x400] sm:$0xf]  ;;  %v5627_v24 = vor.u32 %v6759_v51, %v5626_v16  ;;  %v6777_v16 = vld [vmem:[%s10479_s8 + $0x12c] sm:$0xf]  ;;  %v5712_v51 = vld [vmem:[%s10479_s8 + $0x144] sm:$0xf0] }
 0x2f8   :  { %4138 = vmatpush.bf16.msra.mxu3 %v5767_v19  ;;  %4120 = vmatmul.bf16.vlgmr.msrb.gmra.mxu2 %v9510_v44  ;;  %v6242_v19 = vld [vmem:[%s10479_s8 + $0x550] sm:$0xf] }
 0x2f9   :  { %4164 = vmatpush.bf16.msra.mxu2 %v6215_v25  ;;  %v6847_v25 = vld [vmem:[%s10479_s8 + $0x35c] sm:$0xf]  ;;  %v6243_v37 = vor.u32 %v6913_v23, %v6242_v19  ;;  %v5715_v19 = vor.u32 %v6777_v16, %v5712_v51 }
 0x2fa   :  { %4153 = vmatpush.bf16.msra.mxu1 %v5935_v28  ;;  %v6075_v28 = vor.u32 %v6871_v20, %v6074_v18  ;;  %v5995_v53 = vor.u32 %v6847_v25, %v5992_v26  ;;  %v6889_v18 = vld [vmem:[%s10479_s8 + $0x4ac] sm:$0xf]  ;;  %v6160_v20 = vld [vmem:[%s10479_s8 + $0x4c4] sm:$0xf0]  ;;  %v6931_v23 = vld [vmem:[%s10479_s8 + $0x5fc] sm:$0xf] }
 0x2fb   :  { %4179 = vmatpush.bf16.msra.mxu0 %v6383_v39  ;;  %v6752_v39 = vld [vmem:[%s10479_s8 + $0x60] sm:$0xf0]  ;;  %v6163_v25 = vor.u32 %v6889_v18, %v6160_v20  ;;  %v6770_v26 = vld [vmem:[%s10479_s8 + $0xf4] sm:$0xf]  ;;  %v6418_v18 = vld [vmem:[%s10479_s8 + $0x6a8] sm:$0xf] }
 0x2fc   :  { %4139 = vmatpush.bf16.msra.mxu3 %v5739_v33  ;;  %v6864_v33 = vld [vmem:[%s10479_s8 + $0x3e0] sm:$0xf0]  ;;  %v5599_v40 = vor.u32 %v6752_v39, %v5598_v32  ;;  %v6132_v32 = vld [vmem:[%s10479_s8 + $0x48c] sm:$0xf0] }
 0x2fd   :  { %4165 = vmatpush.bf16.msra.mxu2 %v6187_v38  ;;  %v6840_v38 = vld [vmem:[%s10479_s8 + $0x324] sm:$0xf] }
 0x2fe   :  { %4154 = vmatpush.bf16.msra.mxu1 %v5907_v41  ;;  %v5964_v41 = vld [vmem:[%s10479_s8 + $0x33c] sm:$0xf0]  ;;  %v6956_v20 = vld [vmem:[%s10479_s8 + $0x6c0] sm:$0xf0] }
 0x2ff   :  { %4180 = vmatpush.bf16.msra.mxu0 %v6355_v45  ;;  %v6047_v45 = vor.u32 %v6864_v33, %v6046_v29  ;;  %v5967_v55 = vor.u32 %v6840_v38, %v5964_v41  ;;  %v5852_v29 = vld [vmem:[%s10479_s8 + $0x25c] sm:$0xf0]  ;;  %v5687_v33 = vor.u32 %v6770_v26, %v5684_v27  ;;  %v6135_v38 = vor.u32 %v6882_v30, %v6132_v32 }
 0x300   :  { %4140 = vmatpush.bf16.msra.mxu3 %v5711_v43  ;;  %v6018_v43 = vld [vmem:[%s10479_s8 + $0x390] sm:$0xf]  ;;  %v6222_v27 = vld [vmem:[%s10479_s8 + $0x520] sm:$0xf]  ;;  %v6419_v30 = vor.u32 %v6956_v20, %v6418_v18  ;;  %v6767_v18 = vld [vmem:[%s10479_s8 + $0xd8] sm:$0xf0] }
 0x301   :  { %4166 = vmatpush.bf16.msra.mxu2 %v6159_v52  ;;  %v5768_v52 = vld [vmem:[%s10479_s8 + $0x1b4] sm:$0xf0]  ;;  %v6019_v48 = vor.u32 %v6857_v47, %v6018_v43  ;;  %v6917_v47 = vld [vmem:[%s10479_s8 + $0x58c] sm:$0xf] }
 0x302   :  { %4155 = vmatpush.bf16.msra.mxu1 %v5879_v58  ;;  %v6216_v58 = vld [vmem:[%s10479_s8 + $0x534] sm:$0xf0] }
 0x303   :  { %4181 = vmatpush.bf16.msra.mxu0 %v6327_v63  ;;  %v6833_v63 = vld [vmem:[%s10479_s8 + $0x2ec] sm:$0xf] }
 0x304   :  { %4141 = vmatpush.bf16.msra.mxu3 %v5683_v3  ;;  %v5771_v3 = vor.u32 %v6791_v50, %v5768_v52  ;;  %v6272_v50 = vld [vmem:[%s10479_s8 + $0x5a4] sm:$0xf0]  ;;  %v6107_v52 = vor.u32 %v6875_v60, %v6104_v34  ;;  %v6900_v34 = vld [vmem:[%s10479_s8 + $0x500] sm:$0xf0] }
 0x305   :  { %4167 = vmatpush.bf16.msra.mxu2 %v6131_v6  ;;  %v6219_v6 = vor.u32 %v6903_v56, %v6216_v58  ;;  %v5628_v56 = vld [vmem:[%s10479_s8 + $0x9c] sm:$0xf0]  ;;  %v5827_v58 = vor.u32 %v6805_v42, %v5824_v35  ;;  %v6194_v60 = vld [vmem:[%s10479_s8 + $0x4e8] sm:$0xf]  ;;  %v5914_v42 = vld [vmem:[%s10479_s8 + $0x2b8] sm:$0xf] }
 0x306   :  { %4156 = vmatpush.bf16.msra.mxu1 %v5851_v7  ;;  %v5939_v7 = vor.u32 %v6833_v63, %v5936_v0  ;;  %v6798_v63 = vld [vmem:[%s10479_s8 + $0x1d4] sm:$0xf]  ;;  %v6275_v0 = vor.u32 %v6917_v47, %v6272_v50  ;;  %v6362_v47 = vld [vmem:[%s10479_s8 + $0x638] sm:$0xf] }
 0x307   :  { %4182 = vmatpush.bf16.msra.mxu0 %v6299_v11  ;;  %v6387_v11 = vor.u32 %v6945_v4, %v6384_v5  ;;  %v6244_v4 = vld [vmem:[%s10479_s8 + $0x56c] sm:$0xf0]  ;;  %v6830_v35 = vld [vmem:[%s10479_s8 + $0x2d0] sm:$0xf0] }
 0x308   :  { %4142 = vmatpush.bf16.msra.mxu3 %v5655_v13  ;;  %v5743_v13 = vor.u32 %v6784_v31, %v5740_v54  ;;  %v6851_v31 = vld [vmem:[%s10479_s8 + $0x378] sm:$0xf0]  ;;  %v6446_v54 = vld [vmem:[%s10479_s8 + $0x6e0] sm:$0xf]  ;;  %v6942_v50 = vld [vmem:[%s10479_s8 + $0x650] sm:$0xf0] }
 0x309   :  { %4168 = vmatpush.bf16.msra.mxu2 %v6103_v1  ;;  %v6191_v1 = vor.u32 %v6896_v8, %v6188_v10  ;;  %v6963_v8 = vld [vmem:[%s10479_s8 + $0x6f8] sm:$0xf0]  ;;  %v6749_v10 = vld [vmem:[%s10479_s8 + $0x4c] sm:$0xf] }
 0x30a   :  { %4157 = vmatpush.bf16.msra.mxu1 %v5823_v17  ;;  %v5911_v17 = vor.u32 %v6826_v2, %v5908_v12  ;;  %v6861_v12 = vld [vmem:[%s10479_s8 + $0x3cc] sm:$0xf]  ;;  %v6447_v16 = vor.u32 %v6963_v8, %v6446_v54  ;;  %v6774_v8 = vld [vmem:[%s10479_s8 + $0x110] sm:$0xf0] }
 0x30b   :  { %4183 = vmatpush.bf16.msra.mxu0 %v6271_v21  ;;  %v6819_v21 = vld [vmem:[%s10479_s8 + $0x27c] sm:$0xf] }
 0x30c   :  { %4143 = vmatpush.bf16.msra.mxu3 %v5627_v24  ;;  %v6328_v24 = vld [vmem:[%s10479_s8 + $0x614] sm:$0xf0] }
 0x30d   :  { %4169 = vmatpush.bf16.msra.mxu2 %v6075_v28  ;;  %v5883_v28 = vor.u32 %v6819_v21, %v5880_v22  ;;  %v6331_v39 = vor.u32 %v6931_v23, %v6328_v24  ;;  %v6742_v21 = vld [vmem:[%s10479_s8 + $0x14] sm:$0xf]  ;;  %v5572_v22 = vld [vmem:[%s10479_s8 + $0x2c] sm:$0xf0]  ;;  %v5774_v24 = vld [vmem:[%s10479_s8 + $0x1a0] sm:$0xf] }
 0x30e   :  { %4158 = vmatpush.bf16.msra.mxu1 %v5795_v59  ;;  %v6812_v59 = vld [vmem:[%s10479_s8 + $0x244] sm:$0xf]  ;;  %v6020_v23 = vld [vmem:[%s10479_s8 + $0x3ac] sm:$0xf0]  ;;  %v5575_v32 = vor.u32 %v6742_v21, %v5572_v22  ;;  %v6110_v22 = vld [vmem:[%s10479_s8 + $0x440] sm:$0xf] }
 0x30f   :  { %4184 = vmatpush.bf16.msra.mxu0 %v6243_v37  ;;  %v6924_v37 = vld [vmem:[%s10479_s8 + $0x5c4] sm:$0xf]  ;;  %v5855_v41 = vor.u32 %v6812_v59, %v5852_v29  ;;  %v6837_v59 = vld [vmem:[%s10479_s8 + $0x308] sm:$0xf0] }
 0x310   :  { %4144 = vmatpush.bf16.msra.mxu3 %v5599_v40  ;;  %v5656_v40 = vld [vmem:[%s10479_s8 + $0xd4] sm:$0xf0]  ;;  %v10381_v21 = vld [vmem:[%s10480_s9] sm:$0x7f] }
 0x311   :  { %4170 = vmatpush.bf16.msra.mxu2 %v6047_v45  ;;  %4159 = vmatmul.bf16.vlgmr.msra.gmra.mxu1 %v9464_v49 }
 0x312   :  { %4203 = vmatpush.bf16.msrb.mxu1 %v5995_v53  ;;  %4185 = vmatmul.bf16.vlgmr.msra.gmra.mxu0 %v9475_v46  ;;  %v6300_v53 = vld [vmem:[%s10479_s8 + $0x5dc] sm:$0xf0] }
 0x313   :  { %4229 = vmatpush.bf16.msrb.mxu0 %v6443_v36  ;;  %v6763_v36 = vld [vmem:[%s10479_s8 + $0xbc] sm:$0xf]  ;;  %v6303_v45 = vor.u32 %v6924_v37, %v6300_v53  ;;  %v6390_v37 = vld [vmem:[%s10479_s8 + $0x670] sm:$0xf]  ;;  %v6949_v53 = vld [vmem:[%s10479_s8 + $0x688] sm:$0xf0] }
 0x314   :  { %4145 = vmatpush.bf16.msra.mxu3 %v5571_v62  ;;  %v5659_v43 = vor.u32 %v6763_v36, %v5656_v40  ;;  %v6076_v62 = vld [vmem:[%s10479_s8 + $0x41c] sm:$0xf0]  ;;  %v5746_v36 = vld [vmem:[%s10479_s8 + $0x168] sm:$0xf]  ;;  %v6788_v40 = vld [vmem:[%s10479_s8 + $0x180] sm:$0xf0] }
 0x315   :  { %4171 = vmatpush.bf16.msra.mxu2 %v6019_v48  ;;  %v5796_v48 = vld [vmem:[%s10479_s8 + $0x1ec] sm:$0xf0] }
 0x316   :  { %4204 = vmatpush.bf16.msrb.mxu1 %v5967_v55  ;;  %v6756_v55 = vld [vmem:[%s10479_s8 + $0x84] sm:$0xf]  ;;  %v5799_v2 = vor.u32 %v6798_v63, %v5796_v48  ;;  %v6893_v63 = vld [vmem:[%s10479_s8 + $0x4c8] sm:$0xf0]  ;;  %v6363_v48 = vor.u32 %v6942_v50, %v6362_v47  ;;  %v5606_v47 = vld [vmem:[%s10479_s8 + $0x50] sm:$0xf] }
 0x317   :  { %4230 = vmatpush.bf16.msrb.mxu0 %v6415_v61  ;;  %4146 = vmatmul.bf16.vlgmr.msra.gmra.mxu3 %v9502_v15  ;;  %v6868_v61 = vld [vmem:[%s10479_s8 + $0x404] sm:$0xf]  ;;  %v5631_v5 = vor.u32 %v6756_v55, %v5628_v56  ;;  %v5718_v55 = vld [vmem:[%s10479_s8 + $0x130] sm:$0xf]  ;;  %v6781_v56 = vld [vmem:[%s10479_s8 + $0x148] sm:$0xf0] }
 0x318   :  { %4190 = vmatpush.bf16.msrb.mxu3 %v5771_v3  ;;  %4172 = vmatmul.bf16.vlgmr.msra.gmra.mxu2 %v9510_v44  ;;  %v6910_v3 = vld [vmem:[%s10479_s8 + $0x554] sm:$0xf]  ;;  %v6753_v50 = vld [vmem:[%s10479_s8 + $0x68] sm:$0xf0] }
 0x319   :  { %4216 = vmatpush.bf16.msrb.mxu2 %v6219_v6  ;;  %v5998_v6 = vld [vmem:[%s10479_s8 + $0x360] sm:$0xf]  ;;  %v6247_v57 = vor.u32 %v6910_v3, %v6244_v4  ;;  %v6823_v4 = vld [vmem:[%s10479_s8 + $0x298] sm:$0xf0] }
 0x31a   :  { %4205 = vmatpush.bf16.msrb.mxu1 %v5939_v7  ;;  %v6079_v7 = vor.u32 %v6868_v61, %v6076_v62  ;;  %v5999_v14 = vor.u32 %v6851_v31, %v5998_v6  ;;  %v5915_v61 = vor.u32 %v6830_v35, %v5914_v42  ;;  %v6166_v62 = vld [vmem:[%s10479_s8 + $0x4b0] sm:$0xf]  ;;  %v5886_v3 = vld [vmem:[%s10479_s8 + $0x280] sm:$0xf]  ;;  %v6935_v31 = vld [vmem:[%s10479_s8 + $0x618] sm:$0xf0] }
 0x31b   :  { %4231 = vmatpush.bf16.msrb.mxu0 %v6387_v11  ;;  %v5600_v11 = vld [vmem:[%s10479_s8 + $0x64] sm:$0xf0]  ;;  %v6334_v6 = vld [vmem:[%s10479_s8 + $0x600] sm:$0xf]  ;;  %v6167_v54 = vor.u32 %v6893_v63, %v6166_v62  ;;  %v6914_v42 = vld [vmem:[%s10479_s8 + $0x570] sm:$0xf0] }
 0x31c   :  { %4191 = vmatpush.bf16.msrb.mxu3 %v5743_v13  ;;  %v6048_v13 = vld [vmem:[%s10479_s8 + $0x3e4] sm:$0xf0]  ;;  %v5603_v51 = vor.u32 %v6749_v10, %v5600_v11  ;;  %v5887_v10 = vor.u32 %v6823_v4, %v5886_v3  ;;  %v6138_v11 = vld [vmem:[%s10479_s8 + $0x478] sm:$0xf] }
 0x31d   :  { %4217 = vmatpush.bf16.msrb.mxu2 %v6191_v1  ;;  %v5970_v1 = vld [vmem:[%s10479_s8 + $0x328] sm:$0xf] }
 0x31e   :  { %4206 = vmatpush.bf16.msrb.mxu1 %v5911_v17  ;;  %v6844_v17 = vld [vmem:[%s10479_s8 + $0x340] sm:$0xf0] }
 0x31f   :  { %4232 = vmatpush.bf16.msrb.mxu0 %v6359_v9  ;;  %v6051_v9 = vor.u32 %v6861_v12, %v6048_v13  ;;  %v5971_v26 = vor.u32 %v6844_v17, %v5970_v1  ;;  %v6335_v12 = vor.u32 %v6935_v31, %v6334_v6  ;;  %v5858_v13 = vld [vmem:[%s10479_s8 + $0x248] sm:$0xf]  ;;  %v5662_v17 = vld [vmem:[%s10479_s8 + $0xc0] sm:$0xf]  ;;  %v6746_v6 = vld [vmem:[%s10479_s8 + $0x30] sm:$0xf0] }
 0x320   :  { %4192 = vmatpush.bf16.msrb.mxu3 %v5715_v19  ;;  %v6854_v19 = vld [vmem:[%s10479_s8 + $0x394] sm:$0xf]  ;;  %v6306_v1 = vld [vmem:[%s10479_s8 + $0x5c8] sm:$0xf] }
 0x321   :  { %4218 = vmatpush.bf16.msrb.mxu2 %v6163_v25  ;;  %v6795_v25 = vld [vmem:[%s10479_s8 + $0x1b8] sm:$0xf0]  ;;  %v6023_v29 = vor.u32 %v6854_v19, %v6020_v23 }
 0x322   :  { %4207 = vmatpush.bf16.msrb.mxu1 %v5883_v28  ;;  %v6907_v28 = vld [vmem:[%s10479_s8 + $0x538] sm:$0xf0] }
 0x323   :  { %4233 = vmatpush.bf16.msrb.mxu0 %v6331_v39  ;;  %v5942_v39 = vld [vmem:[%s10479_s8 + $0x2f0] sm:$0xf]  ;;  %v6879_v19 = vld [vmem:[%s10479_s8 + $0x458] sm:$0xf0] }
 0x324   :  { %4193 = vmatpush.bf16.msrb.mxu3 %v5687_v33  ;;  %v5775_v33 = vor.u32 %v6795_v25, %v5774_v24  ;;  %v5830_v25 = vld [vmem:[%s10479_s8 + $0x210] sm:$0xf] }
 0x325   :  { %4219 = vmatpush.bf16.msrb.mxu2 %v6135_v38  ;;  %v6223_v38 = vor.u32 %v6907_v28, %v6222_v27  ;;  %v5663_v27 = vor.u32 %v6767_v18, %v5662_v17  ;;  %v6278_v28 = vld [vmem:[%s10479_s8 + $0x590] sm:$0xf] }
 0x326   :  { %4208 = vmatpush.bf16.msrb.mxu1 %v5855_v41  ;;  %v5943_v41 = vor.u32 %v6837_v59, %v5942_v39  ;;  %v6111_v39 = vor.u32 %v6879_v19, %v6110_v22  ;;  %v5634_v59 = vld [vmem:[%s10479_s8 + $0x88] sm:$0xf] }
 0x327   :  { %4234 = vmatpush.bf16.msrb.mxu0 %v6303_v45  ;;  %v6391_v45 = vor.u32 %v6949_v53, %v6390_v37  ;;  %v6082_v53 = vld [vmem:[%s10479_s8 + $0x408] sm:$0xf] }
 0x328   :  { %4194 = vmatpush.bf16.msrb.mxu3 %v5659_v43  ;;  %v5747_v43 = vor.u32 %v6788_v40, %v5746_v36 }
 0x329   :  { %4220 = vmatpush.bf16.msrb.mxu2 %v6107_v52  ;;  %v6195_v52 = vor.u32 %v6900_v34, %v6194_v60  ;;  %v6802_v60 = vld [vmem:[%s10479_s8 + $0x1f0] sm:$0xf0] }
 0x32a   :  { %4209 = vmatpush.bf16.msrb.mxu1 %v5827_v58 }
 0x32b   :  { %4235 = vmatpush.bf16.msrb.mxu0 %v6275_v0 }
 0x32c   :  { %4195 = vmatpush.bf16.msrb.mxu3 %v5631_v5  ;;  %v5719_v5 = vor.u32 %v6781_v56, %v5718_v55  ;;  %v6054_v56 = vld [vmem:[%s10479_s8 + $0x3d0] sm:$0xf] }
 0x32d   :  { %4221 = vmatpush.bf16.msrb.mxu2 %v6079_v7  ;;  %v5690_v7 = vld [vmem:[%s10479_s8 + $0xf8] sm:$0xf] }
 0x32e   :  { %4210 = vmatpush.bf16.msrb.mxu1 %v5799_v2  ;;  %v10325_v58 = vpop.f32.mrf.mxu1  ;;  %v6886_v2 = vld [vmem:[%s10479_s8 + $0x490] sm:$0xf0] }
 0x32f   :  { %4236 = vmatpush.bf16.msrb.mxu0 %v6247_v57  ;;  %v10334_v0 = vpop.f32.mrf.mxu0  ;;  %v6816_v57 = vld [vmem:[%s10479_s8 + $0x260] sm:$0xf0] }
 0x330   :  { %4196 = vmatpush.bf16.msrb.mxu3 %v5603_v51  ;;  %v6139_v51 = vor.u32 %v6886_v2, %v6138_v11 }
 0x331   :  { %4222 = vmatpush.bf16.msrb.mxu2 %v6051_v9  ;;  %4211 = vmatmul.bf16.vlgmr.msrb.gmra.mxu1 %v9464_v49  ;;  %v5859_v9 = vor.u32 %v6816_v57, %v5858_v13  ;;  %v2765_v13 = vperm.slane %v10381_v21, 1 }
 0x332   :  { %4255 = vmatpush.bf16.msra.mxu1 %v5999_v14  ;;  %4237 = vmatmul.bf16.vlgmr.msrb.gmra.mxu0 %v9475_v46  ;;  %v5691_v14 = vor.u32 %v6774_v8, %v5690_v7 }
 0x333   :  { %4281 = vmatpush.bf16.msra.mxu0 %v6447_v16  ;;  %v6928_v16 = vld [vmem:[%s10479_s8 + $0x5e0] sm:$0xf0] }
 0x334   :  { %4197 = vmatpush.bf16.msrb.mxu3 %v5575_v32  ;;  %v6307_v24 = vor.u32 %v6928_v16, %v6306_v1  ;;  %v2764_v32 = vperm.slane %v10381_v21, 0 }
 0x335   :  { %4223 = vmatpush.bf16.msrb.mxu2 %v6023_v29  ;;  %v6760_v29 = vld [vmem:[%s10479_s8 + $0xa0] sm:$0xf0] }
 0x336   :  { %4256 = vmatpush.bf16.msra.mxu1 %v5971_v26  ;;  %v3954_v20 = vpop.f32.mrf.mxu1  ;;  %v6809_v26 = vld [vmem:[%s10479_s8 + $0x228] sm:$0xf0]  ;;  %v5635_v34 = vor.u32 %v6760_v29, %v5634_v59  ;;  %v2766_v29 = vperm.slane %v10381_v21, 2 }
 0x337   :  { %4282 = vmatpush.bf16.msra.mxu0 %v6419_v30  ;;  %4198 = vmatmul.bf16.vlgmr.msrb.gmra.mxu3 %v9502_v15  ;;  %v3980_v23 = vpop.f32.mrf.mxu0  ;;  %v6921_v30 = vld [vmem:[%s10479_s8 + $0x5a8] sm:$0xf0]  ;;  %v5831_v37 = vor.u32 %v6809_v26, %v5830_v25 }
 0x338   :  { %4242 = vmatpush.bf16.msra.mxu3 %v5775_v33  ;;  %4224 = vmatmul.bf16.vlgmr.msrb.gmra.mxu2 %v9510_v44  ;;  %v6279_v40 = vor.u32 %v6921_v30, %v6278_v28 }
 0x339   :  { %4268 = vmatpush.bf16.msra.mxu2 %v6223_v38  ;;  %v6872_v38 = vld [vmem:[%s10479_s8 + $0x420] sm:$0xf0] }
 0x33a   :  { %4257 = vmatpush.bf16.msra.mxu1 %v5943_v41  ;;  %v3939_v33 = vpop.f32.mrf.mxu3  ;;  %v5802_v41 = vld [vmem:[%s10479_s8 + $0x1d8] sm:$0xf] }
 0x33b   :  { %4283 = vmatpush.bf16.msra.mxu0 %v6391_v45  ;;  %v3965_v36 = vpop.f32.mrf.mxu2  ;;  %v6250_v45 = vld [vmem:[%s10479_s8 + $0x558] sm:$0xf]  ;;  %v3940_v35 = vadd.f32 %v3939_v33, %v2764_v32  ;;  %v5803_v55 = vor.u32 %v6802_v60, %v5802_v41  ;;  %v2767_v60 = vperm.slane %v10381_v21, 3 }
 0x33c   :  { %4243 = vmatpush.bf16.msra.mxu3 %v5747_v43  ;;  %v6083_v43 = vor.u32 %v6872_v38, %v6082_v53  ;;  %v6251_v63 = vor.u32 %v6914_v42, %v6250_v45 }
 0x33d   :  { %4269 = vmatpush.bf16.msra.mxu2 %v6195_v52  ;;  %v3953_v3 = vadd.f32 %v10325_v58, %v3940_v35  ;;  %v6858_v58 = vld [vmem:[%s10479_s8 + $0x3b0] sm:$0xf0] }
 0x33e   :  { %4258 = vmatpush.bf16.msra.mxu1 %v5915_v61  ;;  %v4004_v52 = vpop.f32.mrf.mxu1  ;;  %v6865_v61 = vld [vmem:[%s10479_s8 + $0x3e8] sm:$0xf0] }
 0x33f   :  { %4284 = vmatpush.bf16.msra.mxu0 %v6363_v48  ;;  %v4030_v62 = vpop.f32.mrf.mxu0  ;;  %v5607_v48 = vor.u32 %v6753_v50, %v5606_v47  ;;  %v6055_v4 = vor.u32 %v6865_v61, %v6054_v56 }
 0x340   :  { %4244 = vmatpush.bf16.msra.mxu3 %v5719_v5  ;;  %v5578_v5 = vld [vmem:[%s10479_s8 + $0x18] sm:$0xf] }
 0x341   :  { %4270 = vmatpush.bf16.msra.mxu2 %v6167_v54  ;;  %v6026_v54 = vld [vmem:[%s10479_s8 + $0x398] sm:$0xf]  ;;  %v5579_v8 = vor.u32 %v6746_v6, %v5578_v5  ;;  %s7091_s8 = smov [#allocation4]  }
 0x342   :  { %4259 = vmatpush.bf16.msra.mxu1 %v5887_v10  ;;  %v3941_v31 = vpop.f32.mrf.mxu3  ;;  %v3966_v10 = vadd.f32 %v3965_v36, %v3953_v3  ;;  %v6027_v11 = vor.u32 %v6858_v58, %v6026_v54  ;;  %s4349_s3 = sshll.u32 %s7091_s8, 4  ;;  %s4350_s3 = int_to_ptr.vmem [resolvable:$true] %s4349_s3 }
 0x343   :  { %4285 = vmatpush.bf16.msra.mxu0 %v6335_v12  ;;  %v3967_v7 = vpop.f32.mrf.mxu2  ;;  %4354 = dma.vmem_to_hbm [thread:$0]  %s4350_s3, 128, %s4352_s27, [#allocation5]  }
 0x344   :  { %4245 = vmatpush.bf16.msra.mxu3 %v5691_v14  ;;  %v3979_v57 = vadd.f32 %v10334_v0, %v3966_v10  ;;  %4365 = dma.vmem_to_hbm [thread:$0]  %s4361_s29, 128, %s4363_s4, [#allocation5]  }
 0x345   :  { %4271 = vmatpush.bf16.msra.mxu2 %v6139_v51 }
 0x346   :  { %4260 = vmatpush.bf16.msra.mxu1 %v5859_v9  ;;  %v4006_v2 = vpop.f32.mrf.mxu1  ;;  %v4294_v51 = vmul.f32 0.5, %v3979_v57 }
 0x347   :  { %4286 = vmatpush.bf16.msra.mxu0 %v6307_v24  ;;  %v4032_v12 = vpop.f32.mrf.mxu0 }
 0x348   :  { %4246 = vmatpush.bf16.msra.mxu3 %v5663_v27  ;;  %7001 = vtanh.f32 %v4294_v51  ;;  %v2768_v12 = vperm.slane %v10381_v21, 4 }
 0x349   :  { %4272 = vmatpush.bf16.msra.mxu2 %v6111_v39 }
 0x34a   :  { %4261 = vmatpush.bf16.msra.mxu1 %v5831_v37  ;;  %v3991_v14 = vpop.f32.mrf.mxu3 }
 0x34b   :  { %4287 = vmatpush.bf16.msra.mxu0 %v6279_v40  ;;  %v3992_v1 = vadd.f32 %v3991_v14, %v2765_v13  ;;  %v4017_v16 = vpop.f32.mrf.mxu2 }
 0x34c   :  { %4247 = vmatpush.bf16.msra.mxu3 %v5635_v34 }
 0x34d   :  { %4273 = vmatpush.bf16.msra.mxu2 %v6083_v43 }
 0x34e   :  { %4262 = vmatpush.bf16.msra.mxu1 %v5803_v55  ;;  %v4056_v17 = vpop.f32.mrf.mxu1  ;;  %v7002_v23 = vpop.eup %7001 }
 0x34f   :  { %4288 = vmatpush.bf16.msra.mxu0 %v6251_v63  ;;  %v4308_v25 = vadd.f32 1.0, %v7002_v23 }
 0x350   :  { %4248 = vmatpush.bf16.msra.mxu3 %v5607_v48 }
 0x351   :  { %4274 = vmatpush.bf16.msra.mxu2 %v6055_v4  ;;  %4263 = vmatmul.bf16.vlgmr.msra.gmra.mxu1 %v9464_v49  ;;  %v4005_v49 = vadd.f32 %v4004_v52, %v3992_v1 }
 0x352   :  { %4289 = vmatmul.bf16.vlgmr.msra.gmra.mxu0 %v9475_v46  ;;  %v4082_v46 = vpop.f32.mrf.mxu0  ;;  %v3993_v9 = vpop.f32.mrf.mxu3 }
 0x353   :  { %v4018_v18 = vadd.f32 %v4017_v16, %v4005_v49  ;;  %v4019_v19 = vpop.f32.mrf.mxu2 }
 0x354   :  { %4249 = vmatpush.bf16.msra.mxu3 %v5579_v8 }
 0x355   :  { %4275 = vmatpush.bf16.msra.mxu2 %v6027_v11  ;;  %v4031_v20 = vadd.f32 %v4030_v62, %v4018_v18 }
 0x356   :  { %v4058_v0 = vpop.f32.mrf.mxu1 }
 0x357   :  { %4250 = vmatmul.bf16.vlgmr.msra.gmra.mxu3 %v9502_v15  ;;  %v4295_v22 = vmul.f32 0.5, %v4031_v20 }
 0x358   :  { %4276 = vmatmul.bf16.vlgmr.msra.gmra.mxu2 %v9510_v44  ;;  %v4315_v44 = vmul.f32 0.5, %v4308_v25 }
 0x359   :  { %7003 = vtanh.f32 %v4295_v22 }
 0x35a   :  { %v4084_v24 = vpop.f32.mrf.mxu0  ;;  %v4043_v26 = vpop.f32.mrf.mxu3 }
 0x35b   :  { %v4069_v15 = vpop.f32.mrf.mxu2  ;;  %v4044_v33 = vadd.f32 %v4043_v26, %v2766_v29 }
 0x35d   :  { %v4057_v38 = vadd.f32 %v4056_v17, %v4044_v33  ;;  %v2769_v17 = vperm.slane %v10381_v21, 5 }
 0x35f   :  { %v7004_v27 = vpop.eup %7003  ;;  %v4070_v36 = vadd.f32 %v4069_v15, %v4057_v38 }
 0x360   :  { %v4309_v28 = vadd.f32 1.0, %v7004_v27 }
 0x361   :  { %v4083_v34 = vadd.f32 %v4082_v46, %v4070_v36 }
 0x362   :  { %v4316_v30 = vmul.f32 0.5, %v4309_v28  ;;  %v4045_v39 = vpop.f32.mrf.mxu3 }
 0x363   :  { %v4071_v59 = vpop.f32.mrf.mxu2  ;;  %v4296_v43 = vmul.f32 0.5, %v4083_v34 }
 0x364   :  { %v4322_v32 = vpack.c.bf16 %v4316_v30, %v4315_v44 }
 0x365   :  { %7005 = vtanh.f32 %v4296_v43 }
 0x366   :  { %4326 = vst [vmem:[#allocation2] sm:$0xff] %v4322_v32 }
 0x36b   :  { %v7006_v62 = vpop.eup %7005 }
 0x36c   :  { %v4310_v63 = vadd.f32 1.0, %v7006_v62 }
 0x36e   :  { %v4108_v37 = vpop.f32.mrf.mxu1  ;;  %v4317_v6 = vmul.f32 0.5, %v4310_v63 }
 0x36f   :  { %v4134_v53 = vpop.f32.mrf.mxu0 }
 0x376   :  { %v4110_v40 = vpop.f32.mrf.mxu1 }
 0x377   :  { %v4136_v41 = vpop.f32.mrf.mxu0 }
 0x37a   :  { %v4095_v45 = vpop.f32.mrf.mxu3 }
 0x37b   :  { %v4096_v42 = vadd.f32 %v4095_v45, %v2767_v60  ;;  %v4121_v35 = vpop.f32.mrf.mxu2 }
 0x37d   :  { %v4109_v47 = vadd.f32 %v4108_v37, %v4096_v42 }
 0x37f   :  { %v4122_v50 = vadd.f32 %v4121_v35, %v4109_v47 }
 0x381   :  { %v4135_v52 = vadd.f32 %v4134_v53, %v4122_v50  ;;  %v2770_v53 = vperm.slane %v10381_v21, 6 }
 0x382   :  { %v4097_v55 = vpop.f32.mrf.mxu3 }
 0x383   :  { %v4297_v56 = vmul.f32 0.5, %v4135_v52  ;;  %v4123_v61 = vpop.f32.mrf.mxu2 }
 0x385   :  { %7007 = vtanh.f32 %v4297_v56 }
 0x38b   :  { %v7008_v48 = vpop.eup %7007 }
 0x38c   :  { %v4311_v4 = vadd.f32 1.0, %v7008_v48 }
 0x38e   :  { %v4160_v3 = vpop.f32.mrf.mxu1  ;;  %v4318_v31 = vmul.f32 0.5, %v4311_v4 }
 0x38f   :  { %v4186_v5 = vpop.f32.mrf.mxu0 }
 0x390   :  { %v4323_v54 = vpack.c.bf16 %v4318_v31, %v4317_v6 }
 0x392   :  { %4327 = vst [vmem:[#allocation2 + $0x8] sm:$0xff] %v4323_v54 }
 0x396   :  { %v4162_v58 = vpop.f32.mrf.mxu1 }
 0x397   :  { %v4188_v7 = vpop.f32.mrf.mxu0 }
 0x39a   :  { %v4147_v8 = vpop.f32.mrf.mxu3 }
 0x39b   :  { %v4173_v10 = vpop.f32.mrf.mxu2  ;;  %v4148_v13 = vadd.f32 %v4147_v8, %v2768_v12 }
 0x39d   :  { %v4161_v1 = vadd.f32 %v4160_v3, %v4148_v13 }
 0x39f   :  { %v4174_v16 = vadd.f32 %v4173_v10, %v4161_v1 }
 0x3a1   :  { %v4187_v18 = vadd.f32 %v4186_v5, %v4174_v16 }
 0x3a2   :  { %v4149_v11 = vpop.f32.mrf.mxu3 }
 0x3a3   :  { %v4175_v2 = vpop.f32.mrf.mxu2  ;;  %v4298_v22 = vmul.f32 0.5, %v4187_v18 }
 0x3a5   :  { %7009 = vtanh.f32 %v4298_v22 }
 0x3ab   :  { %v7010_v27 = vpop.eup %7009 }
 0x3ac   :  { %v4312_v15 = vadd.f32 1.0, %v7010_v27 }
 0x3ae   :  { %v4212_v57 = vpop.f32.mrf.mxu1  ;;  %v4319_v39 = vmul.f32 0.5, %v4312_v15 }
 0x3af   :  { %v4238_v14 = vpop.f32.mrf.mxu0 }
 0x3b6   :  { %v4214_v51 = vpop.f32.mrf.mxu1 }
 0x3b7   :  { %v4240_v49 = vpop.f32.mrf.mxu0 }
 0x3ba   :  { %v4199_v46 = vpop.f32.mrf.mxu3 }
 0x3bb   :  { %v4200_v20 = vadd.f32 %v4199_v46, %v2769_v17  ;;  %v4225_v9 = vpop.f32.mrf.mxu2 }
 0x3bd   :  { %v4213_v19 = vadd.f32 %v4212_v57, %v4200_v20 }
 0x3bf   :  { %v4226_v0 = vadd.f32 %v4225_v9, %v4213_v19 }
 0x3c1   :  { %v4239_v23 = vadd.f32 %v4238_v14, %v4226_v0 }
 0x3c2   :  { %v4201_v24 = vpop.f32.mrf.mxu3 }
 0x3c3   :  { %v4299_v25 = vmul.f32 0.5, %v4239_v23  ;;  %v4227_v26 = vpop.f32.mrf.mxu2 }
 0x3c5   :  { %7011 = vtanh.f32 %v4299_v25 }
 0x3cb   :  { %v7012_v28 = vpop.eup %7011 }
 0x3cc   :  { %v4313_v30 = vadd.f32 1.0, %v7012_v28 }
 0x3ce   :  { %v4264_v44 = vpop.f32.mrf.mxu1  ;;  %v4320_v59 = vmul.f32 0.5, %v4313_v30 }
 0x3cf   :  { %v4290_v32 = vpop.f32.mrf.mxu0 }
 0x3d0   :  { %v4324_v29 = vpack.c.bf16 %v4320_v59, %v4319_v39 }
 0x3d2   :  { %4328 = vst [vmem:[#allocation2 + $0x10] sm:$0xff] %v4324_v29 }
 0x3d6   :  { %v4266_v33 = vpop.f32.mrf.mxu1 }
 0x3d7   :  { %v4292_v37 = vpop.f32.mrf.mxu0 }
 0x3da   :  { %v4251_v38 = vpop.f32.mrf.mxu3 }
 0x3db   :  { %v4252_v36 = vadd.f32 %v4251_v38, %v2770_v53  ;;  %v4277_v40 = vpop.f32.mrf.mxu2 }
 0x3dd   :  { %v4265_v41 = vadd.f32 %v4264_v44, %v4252_v36 }
 0x3df   :  { %v4278_v60 = vadd.f32 %v4277_v40, %v4265_v41 }
 0x3e1   :  { %v4291_v34 = vadd.f32 %v4290_v32, %v4278_v60 }
 0x3e2   :  { %v4253_v45 = vpop.f32.mrf.mxu3 }
 0x3e3   :  { %v4300_v42 = vmul.f32 0.5, %v4291_v34  ;;  %v4279_v35 = vpop.f32.mrf.mxu2 }
 0x3e5   :  { %7013 = vtanh.f32 %v4300_v42 }
 0x3eb   :  { %v7014_v43 = vpop.eup %7013 }
 0x3ec   :  { %v4314_v47 = vadd.f32 1.0, %v7014_v43 }
 0x3ee   :  { %v4321_v50 = vmul.f32 0.5, %v4314_v47 }
 0x3f0   :  { %v4325_v21 = vpack.c.bf16 %v4321_v50, %v4321_v50 }
 0x3f2   :  { %4330 = vst.msk [vmem:[#allocation2 + $0x18] sm:$0xf] %vm4329_vm9, %v4325_v21 }
 0x3f3   :  { %4343 = dma.vmem_to_hbm [thread:$0]  %s4339_s12, 448, %s4341_s15, [#allocation3]  }
 0x3f4   :  { %7087 = dma.done.wait [#allocation3], 448  }
 0x3f5   :  { %7088 = vsyncadd [#allocation3], 4294966848 }
 0x3f6   :  { %7089 = dma.done.wait [#allocation5], 256  }
 0x3f7   :  { %7090 = vsyncadd [#allocation5], 4294967040 }
 0x3f8   :  { %4378 = vsyncpa [#allocation3], 1 }
 0x3f9   :  { %4379 = vsyncpa [#allocation5], 1 }

</bundles_post_ra>
